<compile_context>
chip_gen: v6e
topology: v6e:2x2x1
jax: 0.10.0
libtpu: 0.0.40
codegen_flags: <defaults>
</compile_context>

<pallas_src>
import math

import jax
import jax.numpy as jnp
from jax import lax
from jax.experimental import pallas as pl
from jax.experimental.pallas import tpu as pltpu

EPS = 1e-6
HALF_LOG_2PI = 0.5 * math.log(2.0 * math.pi)


# --------------------------------------------------------------------------
# Fused encoder kernel factory (static flags/shapes baked in via closure)
# --------------------------------------------------------------------------
def _make_encoder_kernel(*, apply_embed, has_u, with_sampling, T, Bt, dh, dx):
    def kernel(*refs):
        idx = 0
        x_ref = refs[idx]; idx += 1
        u_ref = None
        if has_u:
            u_ref = refs[idx]; idx += 1
        noise_ref = None
        if with_sampling:
            noise_ref = refs[idx]; idx += 1
        if apply_embed:
            w1, b1, w2, b2, w3, b3 = refs[idx:idx + 6]; idx += 6
        wif, bif, wib, bib = refs[idx:idx + 4]; idx += 4
        whf, bhf, whb, bhb = refs[idx:idx + 4]; idx += 4
        w_mu_d, b_mu, w_lv_d, b_lv = refs[idx:idx + 4]; idx += 4
        if with_sampling:
            samples_ref, mu_ref, var_ref, logp_ref = refs[idx:idx + 4]; idx += 4
        else:
            mu_ref, var_ref = refs[idx:idx + 2]; idx += 2
        (gfr, gfz, gfn, gbr, gbz, gbn, hfs, hbs, mu_s, var_s) = refs[idx:idx + 10]

        # ---- Stage 1: embedding MLP over all Bt*T rows (big, hoisted matmuls) ----
        x = x_ref[...]                                   # (Bt, T, dy)
        x2 = x.reshape(Bt * T, x.shape[-1])              # batch-major rows
        if apply_embed:
            h = jnp.dot(x2, w1[...], preferred_element_type=jnp.float32) + b1[...]
            h = jnp.maximum(h, 0.0)
            h = jnp.dot(h, w2[...], preferred_element_type=jnp.float32) + b2[...]
            h = jnp.maximum(h, 0.0)
            e = jnp.dot(h, w3[...], preferred_element_type=jnp.float32) + b3[...]
        else:
            e = x2
        if has_u:
            u2 = u_ref[...].reshape(Bt * T, u_ref.shape[-1])
            e = jnp.concatenate([e, u2], axis=-1)

        # ---- Stage 2: hoisted GRU input projections (fwd & bwd), one MXU call each;
        #      scattered once into per-gate, time-major scratch so the recurrence only
        #      does lane-aligned leading-dim reads. ----
        gif = jnp.dot(e, wif[...], preferred_element_type=jnp.float32) + bif[...]
        gib = jnp.dot(e, wib[...], preferred_element_type=jnp.float32) + bib[...]
        gif3 = gif.reshape(Bt, T, 3 * dh)
        gib3 = gib.reshape(Bt, T, 3 * dh)
        for b in range(Bt):                               # static, Bt is small
            gfr[:, b, :] = gif3[b, :, 0 * dh:1 * dh]
            gfz[:, b, :] = gif3[b, :, 1 * dh:2 * dh]
            gfn[:, b, :] = gif3[b, :, 2 * dh:3 * dh]
            gbr[:, b, :] = gib3[b, :, 0 * dh:1 * dh]
            gbz[:, b, :] = gib3[b, :, 1 * dh:2 * dh]
            gbn[:, b, :] = gib3[b, :, 2 * dh:3 * dh]

        # hidden weights / biases loaded once; each gate lane-aligned at offset 0
        whf_r, whf_z, whf_n = whf[0], whf[1], whf[2]
        whb_r, whb_z, whb_n = whb[0], whb[1], whb[2]
        bhf_r, bhf_z, bhf_n = bhf[0], bhf[1], bhf[2]
        bhb_r, bhb_z, bhb_n = bhb[0], bhb[1], bhb[2]

        # ---- Stage 3: bidirectional GRU recurrence (PyTorch gate order [r, z, n], h0=0) ----
        def step(t, carry):
            h_f, h_b = carry
            tb = T - 1 - t
            # forward direction (time t)
            ghr = jnp.dot(h_f, whf_r, preferred_element_type=jnp.float32) + bhf_r
            ghz = jnp.dot(h_f, whf_z, preferred_element_type=jnp.float32) + bhf_z
            ghn = jnp.dot(h_f, whf_n, preferred_element_type=jnp.float32) + bhf_n
            r = jax.nn.sigmoid(gfr[t] + ghr)
            z = jax.nn.sigmoid(gfz[t] + ghz)
            n = jnp.tanh(gfn[t] + r * ghn)
            h_f = (1.0 - z) * n + z * h_f
            # backward direction (consumes inputs in reversed time order)
            ghr_b = jnp.dot(h_b, whb_r, preferred_element_type=jnp.float32) + bhb_r
            ghz_b = jnp.dot(h_b, whb_z, preferred_element_type=jnp.float32) + bhb_z
            ghn_b = jnp.dot(h_b, whb_n, preferred_element_type=jnp.float32) + bhb_n
            rb = jax.nn.sigmoid(gbr[tb] + ghr_b)
            zb = jax.nn.sigmoid(gbz[tb] + ghz_b)
            nb = jnp.tanh(gbn[tb] + rb * ghn_b)
            h_b = (1.0 - zb) * nb + zb * h_b
            hfs[t] = h_f
            hbs[tb] = h_b
            return (h_f, h_b)

        h0 = jnp.zeros((Bt, dh), dtype=jnp.float32)
        unroll = T if T <= 32 else 8
        lax.fori_loop(0, T, step, (h0, h0), unroll=unroll)

        # ---- Stage 4: direction-split readout in time-major layout (no lane-concat of
        #      the hidden states), then softplus, then a tiny batch-major reorder of the
        #      (T, Bt, dx) results. ----
        hf2 = hfs[...].reshape(T * Bt, dh)                # time-major rows
        hb2 = hbs[...].reshape(T * Bt, dh)
        mu_tm = (jnp.dot(hf2, w_mu_d[0], preferred_element_type=jnp.float32)
                 + jnp.dot(hb2, w_mu_d[1], preferred_element_type=jnp.float32)
                 + b_mu[...])
        lv_tm = (jnp.dot(hf2, w_lv_d[0], preferred_element_type=jnp.float32)
                 + jnp.dot(hb2, w_lv_d[1], preferred_element_type=jnp.float32)
                 + b_lv[...])
        var_tm = jax.nn.softplus(lv_tm) + EPS

        mu_s[...] = mu_tm.reshape(T, Bt, dx)
        var_s[...] = var_tm.reshape(T, Bt, dx)
        for b in range(Bt):                               # static, Bt is small
            mu_ref[b] = mu_s[:, b, :]
            var_ref[b] = var_s[:, b, :]

        if with_sampling:
            mu3 = mu_ref[...]                             # (Bt, T, dx), batch-major
            var3 = var_ref[...]
            std3 = jnp.sqrt(var3)
            inv_var3 = 1.0 / var3                         # hoisted out of the S broadcast
            log_var3 = jnp.log(var3)                      # hoisted out of the S broadcast

            noise = noise_ref[...]                        # (Bt, S, T, dx)
            mu4 = mu3[:, None, :, :]
            samples = mu4 + std3[:, None, :, :] * noise
            samples_ref[...] = samples

            diff = samples - mu4
            lp = diff * diff * inv_var3[:, None, :, :] + log_var3[:, None, :, :]
            lp = jnp.sum(lp, axis=3, keepdims=True)       # (Bt, S, T, 1)
            lp = jnp.sum(lp, axis=2)                      # (Bt, S, 1)
            logp_ref[...] = -0.5 * lp - (T * dx) * HALF_LOG_2PI

    return kernel


# --------------------------------------------------------------------------
# Parameter init (deterministic, PyTorch-style uniform fan-in bounds)
# --------------------------------------------------------------------------
def _init_linear(key, d_in, d_out):
    k1, k2 = jax.random.split(key)
    bound = 1.0 / math.sqrt(d_in)
    w = jax.random.uniform(k1, (d_in, d_out), jnp.float32, -bound, bound)
    b = jax.random.uniform(k2, (1, d_out), jnp.float32, -bound, bound)
    return w, b


def _init_gru_direction(key, d_in, dh):
    k1, k2, k3, k4 = jax.random.split(key, 4)
    bound = 1.0 / math.sqrt(dh)
    wi = jax.random.uniform(k1, (d_in, 3 * dh), jnp.float32, -bound, bound)
    wh = jax.random.uniform(k2, (dh, 3 * dh), jnp.float32, -bound, bound)
    bi = jax.random.uniform(k3, (1, 3 * dh), jnp.float32, -bound, bound)
    bh = jax.random.uniform(k4, (1, 3 * dh), jnp.float32, -bound, bound)
    return wi, wh, bi, bh


def _split_gate_cols(w, dh):
    # (*, 3*dh) -> (3, *, dh), gate order [r, z, n]; each gate lane-aligned at offset 0.
    return jnp.stack([w[:, 0:dh], w[:, dh:2 * dh], w[:, 2 * dh:3 * dh]], axis=0)


def _pick_batch_tile(B, max_tile=16):
    for t in range(min(B, max_tile), 0, -1):
        if B % t == 0:
            return t
    return 1


class EmbeddingEncoderPallas:
    def __init__(self, dy, dx, dh, d_embed, du=0, param_key=None):
        if param_key is None:
            param_key = jax.random.PRNGKey(42)
        self.dy, self.dx, self.dh, self.d_embed, self.du = dy, dx, dh, d_embed, du
        ks = jax.random.split(param_key, 6)
        # embed MLP  Linear(dy,dh) -> ReLU -> Linear(dh,dh) -> ReLU -> Linear(dh,d_embed)
        self.w1, self.b1 = _init_linear(ks[0], dy, dh)
        self.w2, self.b2 = _init_linear(ks[1], dh, dh)
        self.w3, self.b3 = _init_linear(ks[2], dh, d_embed)
        # bidirectional GRU (input_size = d_embed + du, hidden = dh)
        d_in = d_embed + du
        wif, whf, bif, bhf = _init_gru_direction(ks[3], d_in, dh)
        wib, whb, bib, bhb = _init_gru_direction(ks[4], d_in, dh)
        self.wif, self.bif = wif, bif                     # hoisted input projections
        self.wib, self.bib = wib, bib
        self.whf_g = _split_gate_cols(whf, dh)            # (3, dh, dh)
        self.whb_g = _split_gate_cols(whb, dh)
        self.bhf_g = _split_gate_cols(bhf, dh)            # (3, 1, dh)
        self.bhb_g = _split_gate_cols(bhb, dh)
        # readout Linear(2*dh, 2*dx), pre-split by GRU direction (rows) and mu/logvar (cols)
        wr, br = _init_linear(ks[5], 2 * dh, 2 * dx)
        self.w_mu_d = jnp.stack([wr[0:dh, 0:dx], wr[dh:2 * dh, 0:dx]], axis=0)           # (2, dh, dx)
        self.w_lv_d = jnp.stack([wr[0:dh, dx:2 * dx], wr[dh:2 * dh, dx:2 * dx]], axis=0)  # (2, dh, dx)
        self.b_mu = br[:, 0:dx]
        self.b_lv = br[:, dx:2 * dx]

    # ---------------- fused forward pass ----------------
    def _run(self, x, u=None, n_samples=1, key=None, with_sampling=True):
        B, T, D = x.shape
        dh, dx = self.dh, self.dx
        apply_embed = (D != self.d_embed)     # same shape check as the PyTorch module
        has_u = u is not None
        Bt = _pick_batch_tile(B)
        grid = (B // Bt,)

        def batch_spec(shape):
            zeros = (0,) * (len(shape) - 1)
            return pl.BlockSpec((Bt,) + tuple(shape[1:]),
                                lambda i, z=zeros: (i,) + z)

        def full_spec(arr):
            zeros = (0,) * arr.ndim
            return pl.BlockSpec(tuple(arr.shape), lambda i, z=zeros: z)

        inputs = [x]
        in_specs = [batch_spec(x.shape)]
        if has_u:
            inputs.append(u)
            in_specs.append(batch_spec(u.shape))
        if with_sampling:
            S = int(n_samples)
            if key is None:
                key = jax.random.PRNGKey(1)
            # TODO(synk): generate the Gaussian noise in-kernel with pltpu.prng_seed /
            # stateful_normal to drop this HBM tensor entirely (kept host-side for safety).
            noise = jax.random.normal(key, (B, S, T, dx), jnp.float32)
            inputs.append(noise)
            in_specs.append(batch_spec(noise.shape))

        weights = []
        if apply_embed:
            weights += [self.w1, self.b1, self.w2, self.b2, self.w3, self.b3]
        weights += [self.wif, self.bif, self.wib, self.bib,
                    self.whf_g, self.bhf_g, self.whb_g, self.bhb_g,
                    self.w_mu_d, self.b_mu, self.w_lv_d, self.b_lv]
        inputs += weights
        in_specs += [full_spec(w) for w in weights]

        if with_sampling:
            out_shape = (
                jax.ShapeDtypeStruct((B, S, T, dx), jnp.float32),   # samples
                jax.ShapeDtypeStruct((B, T, dx), jnp.float32),      # mu
                jax.ShapeDtypeStruct((B, T, dx), jnp.float32),      # var
                jax.ShapeDtypeStruct((B, S, 1), jnp.float32),       # log-prob
            )
            out_specs = (batch_spec((B, S, T, dx)),
                         batch_spec((B, T, dx)),
                         batch_spec((B, T, dx)),
                         batch_spec((B, S, 1)))
        else:
            out_shape = (jax.ShapeDtypeStruct((B, T, dx), jnp.float32),   # mu
                         jax.ShapeDtypeStruct((B, T, dx), jnp.float32))   # var
            out_specs = (batch_spec((B, T, dx)), batch_spec((B, T, dx)))

        # 6 per-gate input-projection buffers + 2 hidden-state buffers (time-major)
        # + 2 tiny time-major readout buffers for the batch-major reorder.
        scratch_shapes = ([pltpu.VMEM((T, Bt, dh), jnp.float32) for _ in range(8)]
                          + [pltpu.VMEM((T, Bt, dx), jnp.float32) for _ in range(2)])

        kernel = _make_encoder_kernel(apply_embed=apply_embed, has_u=has_u,
                                      with_sampling=with_sampling,
                                      T=T, Bt=Bt, dh=dh, dx=dx)

        return pl.pallas_call(
            kernel,
            grid=grid,
            in_specs=in_specs,
            out_specs=out_specs,
            out_shape=out_shape,
            scratch_shapes=scratch_shapes,
            compiler_params=pltpu.CompilerParams(
                dimension_semantics=("parallel",)),
        )(*inputs)

    def compute_param(self, x, u=None):
        mu, var = self._run(x, u=u, with_sampling=False)
        return mu, var

    def sample(self, x, u=None, n_samples=1, key=None):
        samples4, mu, var, _ = self._run(x, u=u, n_samples=n_samples, key=key,
                                         with_sampling=True)
        if n_samples == 1:
            samples = samples4[:, 0]                            # (B, T, dx)
        else:
            samples = jnp.transpose(samples4, (1, 0, 2, 3))     # (S, B, T, dx)
        return samples, mu, var

    def __call__(self, x, u=None, n_samples=1, key=None):
        samples4, mu, var, logp = self._run(x, u=u, n_samples=n_samples, key=key,
                                            with_sampling=True)
        if n_samples == 1:
            samples = samples4[:, 0]                            # torch .squeeze(0)
            log_prob = logp[:, 0, 0]                            # (B,)
        else:
            samples = jnp.transpose(samples4, (1, 0, 2, 3))     # (S, B, T, dx)
            log_prob = jnp.transpose(logp[:, :, 0], (1, 0))     # (S, B)
        return samples, mu, var, log_prob
        # TODO(synk): optional bf16 matmul inputs for v6e/v7x (keep f32 gate math on v5e).


if __name__ == "__main__":
    # Small shapes consistent with the module: Batch x Time x dy observations.
    B, T = 2, 8
    dy, dx, dh, d_embed = 6, 3, 16, 12

    enc = EmbeddingEncoderPallas(dy=dy, dx=dx, dh=dh, d_embed=d_embed, du=0,
                                 param_key=jax.random.PRNGKey(42))

    x = jax.random.normal(jax.random.PRNGKey(0), (B, T, dy), jnp.float32)

    # mu/var-only path (compute_param variant)
    mu_p, var_p = enc.compute_param(x)
    jax.block_until_ready((mu_p, var_p))
    assert mu_p.shape == (B, T, dx) and var_p.shape == (B, T, dx)
    assert bool(jnp.all(var_p > 0.0))

    # full forward (sampling variant)
    samples, mu, var, log_prob = enc(x, n_samples=1, key=jax.random.PRNGKey(1))
    jax.block_until_ready((samples, mu, var, log_prob))
    assert samples.shape == (B, T, dx)
    assert mu.shape == (B, T, dx)
    assert var.shape == (B, T, dx)
    assert log_prob.shape == (B,)
    assert bool(jnp.all(var > 0.0))
    assert bool(jnp.all(jnp.isfinite(samples)))
    assert bool(jnp.all(jnp.isfinite(log_prob)))
    # the two variants must agree on mu/var
    assert bool(jnp.allclose(mu, mu_p, atol=1e-5))
    assert bool(jnp.allclose(var, var_p, atol=1e-5))
    print("KERNEL_OK")
</pallas_src>

<mosaic_0001>
module attributes {stable_mosaic.version = 11 : i64} {
  func.func @kernel(%arg0: i32, %arg1: memref<2x8x6xf32, #tpu.memory_space<vmem>>, %arg2: memref<6x16xf32, #tpu.memory_space<vmem>>, %arg3: memref<1x16xf32, #tpu.memory_space<vmem>>, %arg4: memref<16x16xf32, #tpu.memory_space<vmem>>, %arg5: memref<1x16xf32, #tpu.memory_space<vmem>>, %arg6: memref<16x12xf32, #tpu.memory_space<vmem>>, %arg7: memref<1x12xf32, #tpu.memory_space<vmem>>, %arg8: memref<12x48xf32, #tpu.memory_space<vmem>>, %arg9: memref<1x48xf32, #tpu.memory_space<vmem>>, %arg10: memref<12x48xf32, #tpu.memory_space<vmem>>, %arg11: memref<1x48xf32, #tpu.memory_space<vmem>>, %arg12: memref<3x16x16xf32, #tpu.memory_space<vmem>>, %arg13: memref<3x1x16xf32, #tpu.memory_space<vmem>>, %arg14: memref<3x16x16xf32, #tpu.memory_space<vmem>>, %arg15: memref<3x1x16xf32, #tpu.memory_space<vmem>>, %arg16: memref<2x16x3xf32, #tpu.memory_space<vmem>>, %arg17: memref<1x3xf32, #tpu.memory_space<vmem>>, %arg18: memref<2x16x3xf32, #tpu.memory_space<vmem>>, %arg19: memref<1x3xf32, #tpu.memory_space<vmem>>, %arg20: memref<2x8x3xf32, #tpu.memory_space<vmem>>, %arg21: memref<2x8x3xf32, #tpu.memory_space<vmem>>, %arg22: memref<8x2x16xf32, #tpu.memory_space<vmem>>, %arg23: memref<8x2x16xf32, #tpu.memory_space<vmem>>, %arg24: memref<8x2x16xf32, #tpu.memory_space<vmem>>, %arg25: memref<8x2x16xf32, #tpu.memory_space<vmem>>, %arg26: memref<8x2x16xf32, #tpu.memory_space<vmem>>, %arg27: memref<8x2x16xf32, #tpu.memory_space<vmem>>, %arg28: memref<8x2x16xf32, #tpu.memory_space<vmem>>, %arg29: memref<8x2x16xf32, #tpu.memory_space<vmem>>, %arg30: memref<8x2x3xf32, #tpu.memory_space<vmem>>, %arg31: memref<8x2x3xf32, #tpu.memory_space<vmem>>) attributes {dimension_semantics = [#tpu.dimension_semantics<parallel>], iteration_bounds = array<i64: 1>, scalar_prefetch = 0 : i64, scratch_operands = 10 : i64, tpu.core_type = #tpu.core_type<tc>, window_params = [{transform_indices = @transform_0, window_bounds = array<i64: 2, 8, 6>}, {pipeline_mode = #tpu.pipeline_mode<synchronous>, transform_indices = @transform_1, window_bounds = array<i64: 6, 16>}, {pipeline_mode = #tpu.pipeline_mode<synchronous>, transform_indices = @transform_2, window_bounds = array<i64: 1, 16>}, {pipeline_mode = #tpu.pipeline_mode<synchronous>, transform_indices = @transform_3, window_bounds = array<i64: 16, 16>}, {pipeline_mode = #tpu.pipeline_mode<synchronous>, transform_indices = @transform_4, window_bounds = array<i64: 1, 16>}, {pipeline_mode = #tpu.pipeline_mode<synchronous>, transform_indices = @transform_5, window_bounds = array<i64: 16, 12>}, {pipeline_mode = #tpu.pipeline_mode<synchronous>, transform_indices = @transform_6, window_bounds = array<i64: 1, 12>}, {pipeline_mode = #tpu.pipeline_mode<synchronous>, transform_indices = @transform_7, window_bounds = array<i64: 12, 48>}, {pipeline_mode = #tpu.pipeline_mode<synchronous>, transform_indices = @transform_8, window_bounds = array<i64: 1, 48>}, {pipeline_mode = #tpu.pipeline_mode<synchronous>, transform_indices = @transform_9, window_bounds = array<i64: 12, 48>}, {pipeline_mode = #tpu.pipeline_mode<synchronous>, transform_indices = @transform_10, window_bounds = array<i64: 1, 48>}, {pipeline_mode = #tpu.pipeline_mode<synchronous>, transform_indices = @transform_11, window_bounds = array<i64: 3, 16, 16>}, {pipeline_mode = #tpu.pipeline_mode<synchronous>, transform_indices = @transform_12, window_bounds = array<i64: 3, 1, 16>}, {pipeline_mode = #tpu.pipeline_mode<synchronous>, transform_indices = @transform_13, window_bounds = array<i64: 3, 16, 16>}, {pipeline_mode = #tpu.pipeline_mode<synchronous>, transform_indices = @transform_14, window_bounds = array<i64: 3, 1, 16>}, {pipeline_mode = #tpu.pipeline_mode<synchronous>, transform_indices = @transform_15, window_bounds = array<i64: 2, 16, 3>}, {pipeline_mode = #tpu.pipeline_mode<synchronous>, transform_indices = @transform_16, window_bounds = array<i64: 1, 3>}, {pipeline_mode = #tpu.pipeline_mode<synchronous>, transform_indices = @transform_17, window_bounds = array<i64: 2, 16, 3>}, {pipeline_mode = #tpu.pipeline_mode<synchronous>, transform_indices = @transform_18, window_bounds = array<i64: 1, 3>}, {transform_indices = @transform_19, window_bounds = array<i64: 2, 8, 3>}, {transform_indices = @transform_20, window_bounds = array<i64: 2, 8, 3>}]} {
    %c0 = arith.constant 0 : index
    %c0_0 = arith.constant 0 : index
    %c0_1 = arith.constant 0 : index
    %0 = vector.load %arg1[%c0, %c0_0, %c0_1] : memref<2x8x6xf32, #tpu.memory_space<vmem>>, vector<2x8x6xf32>
    %1 = vector.shape_cast %0 : vector<2x8x6xf32> to vector<16x6xf32>
    %c0_2 = arith.constant 0 : index
    %c0_3 = arith.constant 0 : index
    %2 = vector.load %arg2[%c0_2, %c0_3] : memref<6x16xf32, #tpu.memory_space<vmem>>, vector<6x16xf32>
    %cst = arith.constant dense<0.000000e+00> : vector<16x16xf32>
    %3 = tpu.matmul %1, %2, %cst {dimension_numbers = #tpu.dot_dimension_numbers<[1], [0], [0], [1], [0, 0, 1, 1], [], []>} : vector<16x6xf32>, vector<6x16xf32>, vector<16x16xf32> -> vector<16x16xf32>
    %c0_4 = arith.constant 0 : index
    %c0_5 = arith.constant 0 : index
    %4 = vector.load %arg3[%c0_4, %c0_5] : memref<1x16xf32, #tpu.memory_space<vmem>>, vector<1x16xf32>
    %5 = vector.broadcast %4 : vector<1x16xf32> to vector<16x16xf32>
    %6 = arith.addf %3, %5 : vector<16x16xf32>
    %cst_6 = arith.constant 0.000000e+00 : f32
    %7 = vector.broadcast %cst_6 : f32 to vector<16x16xf32>
    %8 = arith.maximumf %6, %7 : vector<16x16xf32>
    %c0_7 = arith.constant 0 : index
    %c0_8 = arith.constant 0 : index
    %9 = vector.load %arg4[%c0_7, %c0_8] : memref<16x16xf32, #tpu.memory_space<vmem>>, vector<16x16xf32>
    %cst_9 = arith.constant dense<0.000000e+00> : vector<16x16xf32>
    %10 = tpu.matmul %8, %9, %cst_9 {dimension_numbers = #tpu.dot_dimension_numbers<[1], [0], [0], [1], [0, 0, 1, 1], [], []>} : vector<16x16xf32>, vector<16x16xf32>, vector<16x16xf32> -> vector<16x16xf32>
    %c0_10 = arith.constant 0 : index
    %c0_11 = arith.constant 0 : index
    %11 = vector.load %arg5[%c0_10, %c0_11] : memref<1x16xf32, #tpu.memory_space<vmem>>, vector<1x16xf32>
    %12 = vector.broadcast %11 : vector<1x16xf32> to vector<16x16xf32>
    %13 = arith.addf %10, %12 : vector<16x16xf32>
    %cst_12 = arith.constant 0.000000e+00 : f32
    %14 = vector.broadcast %cst_12 : f32 to vector<16x16xf32>
    %15 = arith.maximumf %13, %14 : vector<16x16xf32>
    %c0_13 = arith.constant 0 : index
    %c0_14 = arith.constant 0 : index
    %16 = vector.load %arg6[%c0_13, %c0_14] : memref<16x12xf32, #tpu.memory_space<vmem>>, vector<16x12xf32>
    %cst_15 = arith.constant dense<0.000000e+00> : vector<16x12xf32>
    %17 = tpu.matmul %15, %16, %cst_15 {dimension_numbers = #tpu.dot_dimension_numbers<[1], [0], [0], [1], [0, 0, 1, 1], [], []>} : vector<16x16xf32>, vector<16x12xf32>, vector<16x12xf32> -> vector<16x12xf32>
    %c0_16 = arith.constant 0 : index
    %c0_17 = arith.constant 0 : index
    %18 = vector.load %arg7[%c0_16, %c0_17] : memref<1x12xf32, #tpu.memory_space<vmem>>, vector<1x12xf32>
    %19 = vector.broadcast %18 : vector<1x12xf32> to vector<16x12xf32>
    %20 = arith.addf %17, %19 : vector<16x12xf32>
    %c0_18 = arith.constant 0 : index
    %c0_19 = arith.constant 0 : index
    %21 = vector.load %arg8[%c0_18, %c0_19] : memref<12x48xf32, #tpu.memory_space<vmem>>, vector<12x48xf32>
    %cst_20 = arith.constant dense<0.000000e+00> : vector<16x48xf32>
    %22 = tpu.matmul %20, %21, %cst_20 {dimension_numbers = #tpu.dot_dimension_numbers<[1], [0], [0], [1], [0, 0, 1, 1], [], []>} : vector<16x12xf32>, vector<12x48xf32>, vector<16x48xf32> -> vector<16x48xf32>
    %c0_21 = arith.constant 0 : index
    %c0_22 = arith.constant 0 : index
    %23 = vector.load %arg9[%c0_21, %c0_22] : memref<1x48xf32, #tpu.memory_space<vmem>>, vector<1x48xf32>
    %24 = vector.broadcast %23 : vector<1x48xf32> to vector<16x48xf32>
    %25 = arith.addf %22, %24 : vector<16x48xf32>
    %c0_23 = arith.constant 0 : index
    %c0_24 = arith.constant 0 : index
    %26 = vector.load %arg10[%c0_23, %c0_24] : memref<12x48xf32, #tpu.memory_space<vmem>>, vector<12x48xf32>
    %cst_25 = arith.constant dense<0.000000e+00> : vector<16x48xf32>
    %27 = tpu.matmul %20, %26, %cst_25 {dimension_numbers = #tpu.dot_dimension_numbers<[1], [0], [0], [1], [0, 0, 1, 1], [], []>} : vector<16x12xf32>, vector<12x48xf32>, vector<16x48xf32> -> vector<16x48xf32>
    %c0_26 = arith.constant 0 : index
    %c0_27 = arith.constant 0 : index
    %28 = vector.load %arg11[%c0_26, %c0_27] : memref<1x48xf32, #tpu.memory_space<vmem>>, vector<1x48xf32>
    %29 = vector.broadcast %28 : vector<1x48xf32> to vector<16x48xf32>
    %30 = arith.addf %27, %29 : vector<16x48xf32>
    %31 = vector.shape_cast %25 : vector<16x48xf32> to vector<2x8x48xf32>
    %32 = vector.shape_cast %30 : vector<16x48xf32> to vector<2x8x48xf32>
    %33 = vector.extract_strided_slice %31 {offsets = [0, 0, 0], sizes = [1, 8, 16], strides = [1, 1, 1]} : vector<2x8x48xf32> to vector<1x8x16xf32>
    %34 = vector.shape_cast %33 : vector<1x8x16xf32> to vector<8x16xf32>
    %c0_28 = arith.constant 0 : index
    %c0_29 = arith.constant 0 : index
    %c0_30 = arith.constant 0 : index
    %35 = vector.load %arg22[%c0_28, %c0_29, %c0_30] : memref<8x2x16xf32, #tpu.memory_space<vmem>>, vector<8x1x16xf32>
    %36 = vector.shape_cast %35 : vector<8x1x16xf32> to vector<8x16xf32>
    %37 = vector.shape_cast %34 : vector<8x16xf32> to vector<8x1x16xf32>
    tpu.vector_store %arg22[%c0_28, %c0_29, %c0_30], %37 {strides = array<i32>} : memref<8x2x16xf32, #tpu.memory_space<vmem>>, vector<8x1x16xf32>,
    %38 = vector.extract_strided_slice %31 {offsets = [0, 0, 16], sizes = [1, 8, 16], strides = [1, 1, 1]} : vector<2x8x48xf32> to vector<1x8x16xf32>
    %39 = vector.shape_cast %38 : vector<1x8x16xf32> to vector<8x16xf32>
    %c0_31 = arith.constant 0 : index
    %c0_32 = arith.constant 0 : index
    %c0_33 = arith.constant 0 : index
    %40 = vector.load %arg23[%c0_31, %c0_32, %c0_33] : memref<8x2x16xf32, #tpu.memory_space<vmem>>, vector<8x1x16xf32>
    %41 = vector.shape_cast %40 : vector<8x1x16xf32> to vector<8x16xf32>
    %42 = vector.shape_cast %39 : vector<8x16xf32> to vector<8x1x16xf32>
    tpu.vector_store %arg23[%c0_31, %c0_32, %c0_33], %42 {strides = array<i32>} : memref<8x2x16xf32, #tpu.memory_space<vmem>>, vector<8x1x16xf32>,
    %43 = vector.extract_strided_slice %31 {offsets = [0, 0, 32], sizes = [1, 8, 16], strides = [1, 1, 1]} : vector<2x8x48xf32> to vector<1x8x16xf32>
    %44 = vector.shape_cast %43 : vector<1x8x16xf32> to vector<8x16xf32>
    %c0_34 = arith.constant 0 : index
    %c0_35 = arith.constant 0 : index
    %c0_36 = arith.constant 0 : index
    %45 = vector.load %arg24[%c0_34, %c0_35, %c0_36] : memref<8x2x16xf32, #tpu.memory_space<vmem>>, vector<8x1x16xf32>
    %46 = vector.shape_cast %45 : vector<8x1x16xf32> to vector<8x16xf32>
    %47 = vector.shape_cast %44 : vector<8x16xf32> to vector<8x1x16xf32>
    tpu.vector_store %arg24[%c0_34, %c0_35, %c0_36], %47 {strides = array<i32>} : memref<8x2x16xf32, #tpu.memory_space<vmem>>, vector<8x1x16xf32>,
    %48 = vector.extract_strided_slice %32 {offsets = [0, 0, 0], sizes = [1, 8, 16], strides = [1, 1, 1]} : vector<2x8x48xf32> to vector<1x8x16xf32>
    %49 = vector.shape_cast %48 : vector<1x8x16xf32> to vector<8x16xf32>
    %c0_37 = arith.constant 0 : index
    %c0_38 = arith.constant 0 : index
    %c0_39 = arith.constant 0 : index
    %50 = vector.load %arg25[%c0_37, %c0_38, %c0_39] : memref<8x2x16xf32, #tpu.memory_space<vmem>>, vector<8x1x16xf32>
    %51 = vector.shape_cast %50 : vector<8x1x16xf32> to vector<8x16xf32>
    %52 = vector.shape_cast %49 : vector<8x16xf32> to vector<8x1x16xf32>
    tpu.vector_store %arg25[%c0_37, %c0_38, %c0_39], %52 {strides = array<i32>} : memref<8x2x16xf32, #tpu.memory_space<vmem>>, vector<8x1x16xf32>,
    %53 = vector.extract_strided_slice %32 {offsets = [0, 0, 16], sizes = [1, 8, 16], strides = [1, 1, 1]} : vector<2x8x48xf32> to vector<1x8x16xf32>
    %54 = vector.shape_cast %53 : vector<1x8x16xf32> to vector<8x16xf32>
    %c0_40 = arith.constant 0 : index
    %c0_41 = arith.constant 0 : index
    %c0_42 = arith.constant 0 : index
    %55 = vector.load %arg26[%c0_40, %c0_41, %c0_42] : memref<8x2x16xf32, #tpu.memory_space<vmem>>, vector<8x1x16xf32>
    %56 = vector.shape_cast %55 : vector<8x1x16xf32> to vector<8x16xf32>
    %57 = vector.shape_cast %54 : vector<8x16xf32> to vector<8x1x16xf32>
    tpu.vector_store %arg26[%c0_40, %c0_41, %c0_42], %57 {strides = array<i32>} : memref<8x2x16xf32, #tpu.memory_space<vmem>>, vector<8x1x16xf32>,
    %58 = vector.extract_strided_slice %32 {offsets = [0, 0, 32], sizes = [1, 8, 16], strides = [1, 1, 1]} : vector<2x8x48xf32> to vector<1x8x16xf32>
    %59 = vector.shape_cast %58 : vector<1x8x16xf32> to vector<8x16xf32>
    %c0_43 = arith.constant 0 : index
    %c0_44 = arith.constant 0 : index
    %c0_45 = arith.constant 0 : index
    %60 = vector.load %arg27[%c0_43, %c0_44, %c0_45] : memref<8x2x16xf32, #tpu.memory_space<vmem>>, vector<8x1x16xf32>
    %61 = vector.shape_cast %60 : vector<8x1x16xf32> to vector<8x16xf32>
    %62 = vector.shape_cast %59 : vector<8x16xf32> to vector<8x1x16xf32>
    tpu.vector_store %arg27[%c0_43, %c0_44, %c0_45], %62 {strides = array<i32>} : memref<8x2x16xf32, #tpu.memory_space<vmem>>, vector<8x1x16xf32>,
    %63 = vector.extract_strided_slice %31 {offsets = [1, 0, 0], sizes = [1, 8, 16], strides = [1, 1, 1]} : vector<2x8x48xf32> to vector<1x8x16xf32>
    %64 = vector.shape_cast %63 : vector<1x8x16xf32> to vector<8x16xf32>
    %c0_46 = arith.constant 0 : index
    %c1 = arith.constant 1 : index
    %c0_47 = arith.constant 0 : index
    %65 = vector.load %arg22[%c0_46, %c1, %c0_47] : memref<8x2x16xf32, #tpu.memory_space<vmem>>, vector<8x1x16xf32>
    %66 = vector.shape_cast %65 : vector<8x1x16xf32> to vector<8x16xf32>
    %67 = vector.shape_cast %64 : vector<8x16xf32> to vector<8x1x16xf32>
    tpu.vector_store %arg22[%c0_46, %c1, %c0_47], %67 {strides = array<i32>} : memref<8x2x16xf32, #tpu.memory_space<vmem>>, vector<8x1x16xf32>,
    %68 = vector.extract_strided_slice %31 {offsets = [1, 0, 16], sizes = [1, 8, 16], strides = [1, 1, 1]} : vector<2x8x48xf32> to vector<1x8x16xf32>
    %69 = vector.shape_cast %68 : vector<1x8x16xf32> to vector<8x16xf32>
    %c0_48 = arith.constant 0 : index
    %c1_49 = arith.constant 1 : index
    %c0_50 = arith.constant 0 : index
    %70 = vector.load %arg23[%c0_48, %c1_49, %c0_50] : memref<8x2x16xf32, #tpu.memory_space<vmem>>, vector<8x1x16xf32>
    %71 = vector.shape_cast %70 : vector<8x1x16xf32> to vector<8x16xf32>
    %72 = vector.shape_cast %69 : vector<8x16xf32> to vector<8x1x16xf32>
    tpu.vector_store %arg23[%c0_48, %c1_49, %c0_50], %72 {strides = array<i32>} : memref<8x2x16xf32, #tpu.memory_space<vmem>>, vector<8x1x16xf32>,
    %73 = vector.extract_strided_slice %31 {offsets = [1, 0, 32], sizes = [1, 8, 16], strides = [1, 1, 1]} : vector<2x8x48xf32> to vector<1x8x16xf32>
    %74 = vector.shape_cast %73 : vector<1x8x16xf32> to vector<8x16xf32>
    %c0_51 = arith.constant 0 : index
    %c1_52 = arith.constant 1 : index
    %c0_53 = arith.constant 0 : index
    %75 = vector.load %arg24[%c0_51, %c1_52, %c0_53] : memref<8x2x16xf32, #tpu.memory_space<vmem>>, vector<8x1x16xf32>
    %76 = vector.shape_cast %75 : vector<8x1x16xf32> to vector<8x16xf32>
    %77 = vector.shape_cast %74 : vector<8x16xf32> to vector<8x1x16xf32>
    tpu.vector_store %arg24[%c0_51, %c1_52, %c0_53], %77 {strides = array<i32>} : memref<8x2x16xf32, #tpu.memory_space<vmem>>, vector<8x1x16xf32>,
    %78 = vector.extract_strided_slice %32 {offsets = [1, 0, 0], sizes = [1, 8, 16], strides = [1, 1, 1]} : vector<2x8x48xf32> to vector<1x8x16xf32>
    %79 = vector.shape_cast %78 : vector<1x8x16xf32> to vector<8x16xf32>
    %c0_54 = arith.constant 0 : index
    %c1_55 = arith.constant 1 : index
    %c0_56 = arith.constant 0 : index
    %80 = vector.load %arg25[%c0_54, %c1_55, %c0_56] : memref<8x2x16xf32, #tpu.memory_space<vmem>>, vector<8x1x16xf32>
    %81 = vector.shape_cast %80 : vector<8x1x16xf32> to vector<8x16xf32>
    %82 = vector.shape_cast %79 : vector<8x16xf32> to vector<8x1x16xf32>
    tpu.vector_store %arg25[%c0_54, %c1_55, %c0_56], %82 {strides = array<i32>} : memref<8x2x16xf32, #tpu.memory_space<vmem>>, vector<8x1x16xf32>,
    %83 = vector.extract_strided_slice %32 {offsets = [1, 0, 16], sizes = [1, 8, 16], strides = [1, 1, 1]} : vector<2x8x48xf32> to vector<1x8x16xf32>
    %84 = vector.shape_cast %83 : vector<1x8x16xf32> to vector<8x16xf32>
    %c0_57 = arith.constant 0 : index
    %c1_58 = arith.constant 1 : index
    %c0_59 = arith.constant 0 : index
    %85 = vector.load %arg26[%c0_57, %c1_58, %c0_59] : memref<8x2x16xf32, #tpu.memory_space<vmem>>, vector<8x1x16xf32>
    %86 = vector.shape_cast %85 : vector<8x1x16xf32> to vector<8x16xf32>
    %87 = vector.shape_cast %84 : vector<8x16xf32> to vector<8x1x16xf32>
    tpu.vector_store %arg26[%c0_57, %c1_58, %c0_59], %87 {strides = array<i32>} : memref<8x2x16xf32, #tpu.memory_space<vmem>>, vector<8x1x16xf32>,
    %88 = vector.extract_strided_slice %32 {offsets = [1, 0, 32], sizes = [1, 8, 16], strides = [1, 1, 1]} : vector<2x8x48xf32> to vector<1x8x16xf32>
    %89 = vector.shape_cast %88 : vector<1x8x16xf32> to vector<8x16xf32>
    %c0_60 = arith.constant 0 : index
    %c1_61 = arith.constant 1 : index
    %c0_62 = arith.constant 0 : index
    %90 = vector.load %arg27[%c0_60, %c1_61, %c0_62] : memref<8x2x16xf32, #tpu.memory_space<vmem>>, vector<8x1x16xf32>
    %91 = vector.shape_cast %90 : vector<8x1x16xf32> to vector<8x16xf32>
    %92 = vector.shape_cast %89 : vector<8x16xf32> to vector<8x1x16xf32>
    tpu.vector_store %arg27[%c0_60, %c1_61, %c0_62], %92 {strides = array<i32>} : memref<8x2x16xf32, #tpu.memory_space<vmem>>, vector<8x1x16xf32>,
    %c0_63 = arith.constant 0 : index
    %c0_64 = arith.constant 0 : index
    %c0_65 = arith.constant 0 : index
    %93 = vector.load %arg12[%c0_63, %c0_64, %c0_65] : memref<3x16x16xf32, #tpu.memory_space<vmem>>, vector<1x16x16xf32>
    %94 = vector.shape_cast %93 : vector<1x16x16xf32> to vector<16x16xf32>
    %c1_66 = arith.constant 1 : index
    %c0_67 = arith.constant 0 : index
    %c0_68 = arith.constant 0 : index
    %95 = vector.load %arg12[%c1_66, %c0_67, %c0_68] : memref<3x16x16xf32, #tpu.memory_space<vmem>>, vector<1x16x16xf32>
    %96 = vector.shape_cast %95 : vector<1x16x16xf32> to vector<16x16xf32>
    %c2 = arith.constant 2 : index
    %c0_69 = arith.constant 0 : index
    %c0_70 = arith.constant 0 : index
    %97 = vector.load %arg12[%c2, %c0_69, %c0_70] : memref<3x16x16xf32, #tpu.memory_space<vmem>>, vector<1x16x16xf32>
    %98 = vector.shape_cast %97 : vector<1x16x16xf32> to vector<16x16xf32>
    %c0_71 = arith.constant 0 : index
    %c0_72 = arith.constant 0 : index
    %c0_73 = arith.constant 0 : index
    %99 = vector.load %arg14[%c0_71, %c0_72, %c0_73] : memref<3x16x16xf32, #tpu.memory_space<vmem>>, vector<1x16x16xf32>
    %100 = vector.shape_cast %99 : vector<1x16x16xf32> to vector<16x16xf32>
    %c1_74 = arith.constant 1 : index
    %c0_75 = arith.constant 0 : index
    %c0_76 = arith.constant 0 : index
    %101 = vector.load %arg14[%c1_74, %c0_75, %c0_76] : memref<3x16x16xf32, #tpu.memory_space<vmem>>, vector<1x16x16xf32>
    %102 = vector.shape_cast %101 : vector<1x16x16xf32> to vector<16x16xf32>
    %c2_77 = arith.constant 2 : index
    %c0_78 = arith.constant 0 : index
    %c0_79 = arith.constant 0 : index
    %103 = vector.load %arg14[%c2_77, %c0_78, %c0_79] : memref<3x16x16xf32, #tpu.memory_space<vmem>>, vector<1x16x16xf32>
    %104 = vector.shape_cast %103 : vector<1x16x16xf32> to vector<16x16xf32>
    %c0_80 = arith.constant 0 : index
    %c0_81 = arith.constant 0 : index
    %c0_82 = arith.constant 0 : index
    %105 = vector.load %arg13[%c0_80, %c0_81, %c0_82] : memref<3x1x16xf32, #tpu.memory_space<vmem>>, vector<1x1x16xf32>
    %106 = vector.shape_cast %105 : vector<1x1x16xf32> to vector<1x16xf32>
    %c1_83 = arith.constant 1 : index
    %c0_84 = arith.constant 0 : index
    %c0_85 = arith.constant 0 : index
    %107 = vector.load %arg13[%c1_83, %c0_84, %c0_85] : memref<3x1x16xf32, #tpu.memory_space<vmem>>, vector<1x1x16xf32>
    %108 = vector.shape_cast %107 : vector<1x1x16xf32> to vector<1x16xf32>
    %c2_86 = arith.constant 2 : index
    %c0_87 = arith.constant 0 : index
    %c0_88 = arith.constant 0 : index
    %109 = vector.load %arg13[%c2_86, %c0_87, %c0_88] : memref<3x1x16xf32, #tpu.memory_space<vmem>>, vector<1x1x16xf32>
    %110 = vector.shape_cast %109 : vector<1x1x16xf32> to vector<1x16xf32>
    %c0_89 = arith.constant 0 : index
    %c0_90 = arith.constant 0 : index
    %c0_91 = arith.constant 0 : index
    %111 = vector.load %arg15[%c0_89, %c0_90, %c0_91] : memref<3x1x16xf32, #tpu.memory_space<vmem>>, vector<1x1x16xf32>
    %112 = vector.shape_cast %111 : vector<1x1x16xf32> to vector<1x16xf32>
    %c1_92 = arith.constant 1 : index
    %c0_93 = arith.constant 0 : index
    %c0_94 = arith.constant 0 : index
    %113 = vector.load %arg15[%c1_92, %c0_93, %c0_94] : memref<3x1x16xf32, #tpu.memory_space<vmem>>, vector<1x1x16xf32>
    %114 = vector.shape_cast %113 : vector<1x1x16xf32> to vector<1x16xf32>
    %c2_95 = arith.constant 2 : index
    %c0_96 = arith.constant 0 : index
    %c0_97 = arith.constant 0 : index
    %115 = vector.load %arg15[%c2_95, %c0_96, %c0_97] : memref<3x1x16xf32, #tpu.memory_space<vmem>>, vector<1x1x16xf32>
    %116 = vector.shape_cast %115 : vector<1x1x16xf32> to vector<1x16xf32>
    %cst_98 = arith.constant 0.000000e+00 : f32
    %117 = vector.broadcast %cst_98 : f32 to vector<2x16xf32>
    %c0_i32 = arith.constant 0 : i32
    %c7_i32 = arith.constant 7 : i32
    %118 = arith.subi %c7_i32, %c0_i32 : i32
    %cst_99 = arith.constant dense<0.000000e+00> : vector<2x16xf32>
    %119 = tpu.matmul %117, %94, %cst_99 {dimension_numbers = #tpu.dot_dimension_numbers<[1], [0], [0], [1], [0, 0, 1, 1], [], []>} : vector<2x16xf32>, vector<16x16xf32>, vector<2x16xf32> -> vector<2x16xf32>
    %120 = vector.broadcast %106 : vector<1x16xf32> to vector<2x16xf32>
    %121 = arith.addf %119, %120 : vector<2x16xf32>
    %cst_100 = arith.constant dense<0.000000e+00> : vector<2x16xf32>
    %122 = tpu.matmul %117, %96, %cst_100 {dimension_numbers = #tpu.dot_dimension_numbers<[1], [0], [0], [1], [0, 0, 1, 1], [], []>} : vector<2x16xf32>, vector<16x16xf32>, vector<2x16xf32> -> vector<2x16xf32>
    %123 = vector.broadcast %108 : vector<1x16xf32> to vector<2x16xf32>
    %124 = arith.addf %122, %123 : vector<2x16xf32>
    %cst_101 = arith.constant dense<0.000000e+00> : vector<2x16xf32>
    %125 = tpu.matmul %117, %98, %cst_101 {dimension_numbers = #tpu.dot_dimension_numbers<[1], [0], [0], [1], [0, 0, 1, 1], [], []>} : vector<2x16xf32>, vector<16x16xf32>, vector<2x16xf32> -> vector<2x16xf32>
    %126 = vector.broadcast %110 : vector<1x16xf32> to vector<2x16xf32>
    %127 = arith.addf %125, %126 : vector<2x16xf32>
    %128 = arith.index_cast %c0_i32 : i32 to index
    %c0_102 = arith.constant 0 : index
    %c0_103 = arith.constant 0 : index
    %129 = vector.load %arg22[%128, %c0_102, %c0_103] : memref<8x2x16xf32, #tpu.memory_space<vmem>>, vector<1x2x16xf32>
    %130 = vector.shape_cast %129 : vector<1x2x16xf32> to vector<2x16xf32>
    %131 = arith.addf %130, %121 : vector<2x16xf32>
    %132 = arith.negf %131 : vector<2x16xf32>
    %133 = math.exp %132 : vector<2x16xf32>
    %cst_104 = arith.constant 1.000000e+00 : f32
    %134 = vector.broadcast %cst_104 : f32 to vector<2x16xf32>
    %135 = arith.addf %134, %133 : vector<2x16xf32>
    %136 = arith.divf %134, %135 : vector<2x16xf32>
    %137 = arith.index_cast %c0_i32 : i32 to index
    %c0_105 = arith.constant 0 : index
    %c0_106 = arith.constant 0 : index
    %138 = vector.load %arg23[%137, %c0_105, %c0_106] : memref<8x2x16xf32, #tpu.memory_space<vmem>>, vector<1x2x16xf32>
    %139 = vector.shape_cast %138 : vector<1x2x16xf32> to vector<2x16xf32>
    %140 = arith.addf %139, %124 : vector<2x16xf32>
    %141 = arith.negf %140 : vector<2x16xf32>
    %142 = math.exp %141 : vector<2x16xf32>
    %cst_107 = arith.constant 1.000000e+00 : f32
    %143 = vector.broadcast %cst_107 : f32 to vector<2x16xf32>
    %144 = arith.addf %143, %142 : vector<2x16xf32>
    %145 = arith.divf %143, %144 : vector<2x16xf32>
    %146 = arith.index_cast %c0_i32 : i32 to index
    %c0_108 = arith.constant 0 : index
    %c0_109 = arith.constant 0 : index
    %147 = vector.load %arg24[%146, %c0_108, %c0_109] : memref<8x2x16xf32, #tpu.memory_space<vmem>>, vector<1x2x16xf32>
    %148 = vector.shape_cast %147 : vector<1x2x16xf32> to vector<2x16xf32>
    %149 = arith.mulf %136, %127 : vector<2x16xf32>
    %150 = arith.addf %148, %149 : vector<2x16xf32>
    %151 = math.tanh %150 : vector<2x16xf32>
    %cst_110 = arith.constant 1.000000e+00 : f32
    %152 = vector.broadcast %cst_110 : f32 to vector<2x16xf32>
    %153 = arith.subf %152, %145 : vector<2x16xf32>
    %154 = arith.mulf %153, %151 : vector<2x16xf32>
    %155 = arith.mulf %145, %117 : vector<2x16xf32>
    %156 = arith.addf %154, %155 : vector<2x16xf32>
    %cst_111 = arith.constant dense<0.000000e+00> : vector<2x16xf32>
    %157 = tpu.matmul %117, %100, %cst_111 {dimension_numbers = #tpu.dot_dimension_numbers<[1], [0], [0], [1], [0, 0, 1, 1], [], []>} : vector<2x16xf32>, vector<16x16xf32>, vector<2x16xf32> -> vector<2x16xf32>
    %158 = vector.broadcast %112 : vector<1x16xf32> to vector<2x16xf32>
    %159 = arith.addf %157, %158 : vector<2x16xf32>
    %cst_112 = arith.constant dense<0.000000e+00> : vector<2x16xf32>
    %160 = tpu.matmul %117, %102, %cst_112 {dimension_numbers = #tpu.dot_dimension_numbers<[1], [0], [0], [1], [0, 0, 1, 1], [], []>} : vector<2x16xf32>, vector<16x16xf32>, vector<2x16xf32> -> vector<2x16xf32>
    %161 = vector.broadcast %114 : vector<1x16xf32> to vector<2x16xf32>
    %162 = arith.addf %160, %161 : vector<2x16xf32>
    %cst_113 = arith.constant dense<0.000000e+00> : vector<2x16xf32>
    %163 = tpu.matmul %117, %104, %cst_113 {dimension_numbers = #tpu.dot_dimension_numbers<[1], [0], [0], [1], [0, 0, 1, 1], [], []>} : vector<2x16xf32>, vector<16x16xf32>, vector<2x16xf32> -> vector<2x16xf32>
    %164 = vector.broadcast %116 : vector<1x16xf32> to vector<2x16xf32>
    %165 = arith.addf %163, %164 : vector<2x16xf32>
    %166 = arith.index_cast %118 : i32 to index
    %c0_114 = arith.constant 0 : index
    %c0_115 = arith.constant 0 : index
    %167 = vector.load %arg25[%166, %c0_114, %c0_115] : memref<8x2x16xf32, #tpu.memory_space<vmem>>, vector<1x2x16xf32>
    %168 = vector.shape_cast %167 : vector<1x2x16xf32> to vector<2x16xf32>
    %169 = arith.addf %168, %159 : vector<2x16xf32>
    %170 = arith.negf %169 : vector<2x16xf32>
    %171 = math.exp %170 : vector<2x16xf32>
    %cst_116 = arith.constant 1.000000e+00 : f32
    %172 = vector.broadcast %cst_116 : f32 to vector<2x16xf32>
    %173 = arith.addf %172, %171 : vector<2x16xf32>
    %174 = arith.divf %172, %173 : vector<2x16xf32>
    %175 = arith.index_cast %118 : i32 to index
    %c0_117 = arith.constant 0 : index
    %c0_118 = arith.constant 0 : index
    %176 = vector.load %arg26[%175, %c0_117, %c0_118] : memref<8x2x16xf32, #tpu.memory_space<vmem>>, vector<1x2x16xf32>
    %177 = vector.shape_cast %176 : vector<1x2x16xf32> to vector<2x16xf32>
    %178 = arith.addf %177, %162 : vector<2x16xf32>
    %179 = arith.negf %178 : vector<2x16xf32>
    %180 = math.exp %179 : vector<2x16xf32>
    %cst_119 = arith.constant 1.000000e+00 : f32
    %181 = vector.broadcast %cst_119 : f32 to vector<2x16xf32>
    %182 = arith.addf %181, %180 : vector<2x16xf32>
    %183 = arith.divf %181, %182 : vector<2x16xf32>
    %184 = arith.index_cast %118 : i32 to index
    %c0_120 = arith.constant 0 : index
    %c0_121 = arith.constant 0 : index
    %185 = vector.load %arg27[%184, %c0_120, %c0_121] : memref<8x2x16xf32, #tpu.memory_space<vmem>>, vector<1x2x16xf32>
    %186 = vector.shape_cast %185 : vector<1x2x16xf32> to vector<2x16xf32>
    %187 = arith.mulf %174, %165 : vector<2x16xf32>
    %188 = arith.addf %186, %187 : vector<2x16xf32>
    %189 = math.tanh %188 : vector<2x16xf32>
    %cst_122 = arith.constant 1.000000e+00 : f32
    %190 = vector.broadcast %cst_122 : f32 to vector<2x16xf32>
    %191 = arith.subf %190, %183 : vector<2x16xf32>
    %192 = arith.mulf %191, %189 : vector<2x16xf32>
    %193 = arith.mulf %183, %117 : vector<2x16xf32>
    %194 = arith.addf %192, %193 : vector<2x16xf32>
    %195 = arith.index_cast %c0_i32 : i32 to index
    %c0_123 = arith.constant 0 : index
    %c0_124 = arith.constant 0 : index
    %196 = vector.load %arg28[%195, %c0_123, %c0_124] : memref<8x2x16xf32, #tpu.memory_space<vmem>>, vector<1x2x16xf32>
    %197 = vector.shape_cast %196 : vector<1x2x16xf32> to vector<2x16xf32>
    %198 = vector.shape_cast %156 : vector<2x16xf32> to vector<1x2x16xf32>
    tpu.vector_store %arg28[%195, %c0_123, %c0_124], %198 {strides = array<i32>} : memref<8x2x16xf32, #tpu.memory_space<vmem>>, vector<1x2x16xf32>,
    %199 = arith.index_cast %118 : i32 to index
    %c0_125 = arith.constant 0 : index
    %c0_126 = arith.constant 0 : index
    %200 = vector.load %arg29[%199, %c0_125, %c0_126] : memref<8x2x16xf32, #tpu.memory_space<vmem>>, vector<1x2x16xf32>
    %201 = vector.shape_cast %200 : vector<1x2x16xf32> to vector<2x16xf32>
    %202 = vector.shape_cast %194 : vector<2x16xf32> to vector<1x2x16xf32>
    tpu.vector_store %arg29[%199, %c0_125, %c0_126], %202 {strides = array<i32>} : memref<8x2x16xf32, #tpu.memory_space<vmem>>, vector<1x2x16xf32>,
    %c1_i32 = arith.constant 1 : i32
    %c7_i32_127 = arith.constant 7 : i32
    %203 = arith.subi %c7_i32_127, %c1_i32 : i32
    %cst_128 = arith.constant dense<0.000000e+00> : vector<2x16xf32>
    %204 = tpu.matmul %156, %94, %cst_128 {dimension_numbers = #tpu.dot_dimension_numbers<[1], [0], [0], [1], [0, 0, 1, 1], [], []>} : vector<2x16xf32>, vector<16x16xf32>, vector<2x16xf32> -> vector<2x16xf32>
    %205 = vector.broadcast %106 : vector<1x16xf32> to vector<2x16xf32>
    %206 = arith.addf %204, %205 : vector<2x16xf32>
    %cst_129 = arith.constant dense<0.000000e+00> : vector<2x16xf32>
    %207 = tpu.matmul %156, %96, %cst_129 {dimension_numbers = #tpu.dot_dimension_numbers<[1], [0], [0], [1], [0, 0, 1, 1], [], []>} : vector<2x16xf32>, vector<16x16xf32>, vector<2x16xf32> -> vector<2x16xf32>
    %208 = vector.broadcast %108 : vector<1x16xf32> to vector<2x16xf32>
    %209 = arith.addf %207, %208 : vector<2x16xf32>
    %cst_130 = arith.constant dense<0.000000e+00> : vector<2x16xf32>
    %210 = tpu.matmul %156, %98, %cst_130 {dimension_numbers = #tpu.dot_dimension_numbers<[1], [0], [0], [1], [0, 0, 1, 1], [], []>} : vector<2x16xf32>, vector<16x16xf32>, vector<2x16xf32> -> vector<2x16xf32>
    %211 = vector.broadcast %110 : vector<1x16xf32> to vector<2x16xf32>
    %212 = arith.addf %210, %211 : vector<2x16xf32>
    %213 = arith.index_cast %c1_i32 : i32 to index
    %c0_131 = arith.constant 0 : index
    %c0_132 = arith.constant 0 : index
    %214 = vector.load %arg22[%213, %c0_131, %c0_132] : memref<8x2x16xf32, #tpu.memory_space<vmem>>, vector<1x2x16xf32>
    %215 = vector.shape_cast %214 : vector<1x2x16xf32> to vector<2x16xf32>
    %216 = arith.addf %215, %206 : vector<2x16xf32>
    %217 = arith.negf %216 : vector<2x16xf32>
    %218 = math.exp %217 : vector<2x16xf32>
    %cst_133 = arith.constant 1.000000e+00 : f32
    %219 = vector.broadcast %cst_133 : f32 to vector<2x16xf32>
    %220 = arith.addf %219, %218 : vector<2x16xf32>
    %221 = arith.divf %219, %220 : vector<2x16xf32>
    %222 = arith.index_cast %c1_i32 : i32 to index
    %c0_134 = arith.constant 0 : index
    %c0_135 = arith.constant 0 : index
    %223 = vector.load %arg23[%222, %c0_134, %c0_135] : memref<8x2x16xf32, #tpu.memory_space<vmem>>, vector<1x2x16xf32>
    %224 = vector.shape_cast %223 : vector<1x2x16xf32> to vector<2x16xf32>
    %225 = arith.addf %224, %209 : vector<2x16xf32>
    %226 = arith.negf %225 : vector<2x16xf32>
    %227 = math.exp %226 : vector<2x16xf32>
    %cst_136 = arith.constant 1.000000e+00 : f32
    %228 = vector.broadcast %cst_136 : f32 to vector<2x16xf32>
    %229 = arith.addf %228, %227 : vector<2x16xf32>
    %230 = arith.divf %228, %229 : vector<2x16xf32>
    %231 = arith.index_cast %c1_i32 : i32 to index
    %c0_137 = arith.constant 0 : index
    %c0_138 = arith.constant 0 : index
    %232 = vector.load %arg24[%231, %c0_137, %c0_138] : memref<8x2x16xf32, #tpu.memory_space<vmem>>, vector<1x2x16xf32>
    %233 = vector.shape_cast %232 : vector<1x2x16xf32> to vector<2x16xf32>
    %234 = arith.mulf %221, %212 : vector<2x16xf32>
    %235 = arith.addf %233, %234 : vector<2x16xf32>
    %236 = math.tanh %235 : vector<2x16xf32>
    %cst_139 = arith.constant 1.000000e+00 : f32
    %237 = vector.broadcast %cst_139 : f32 to vector<2x16xf32>
    %238 = arith.subf %237, %230 : vector<2x16xf32>
    %239 = arith.mulf %238, %236 : vector<2x16xf32>
    %240 = arith.mulf %230, %156 : vector<2x16xf32>
    %241 = arith.addf %239, %240 : vector<2x16xf32>
    %cst_140 = arith.constant dense<0.000000e+00> : vector<2x16xf32>
    %242 = tpu.matmul %194, %100, %cst_140 {dimension_numbers = #tpu.dot_dimension_numbers<[1], [0], [0], [1], [0, 0, 1, 1], [], []>} : vector<2x16xf32>, vector<16x16xf32>, vector<2x16xf32> -> vector<2x16xf32>
    %243 = vector.broadcast %112 : vector<1x16xf32> to vector<2x16xf32>
    %244 = arith.addf %242, %243 : vector<2x16xf32>
    %cst_141 = arith.constant dense<0.000000e+00> : vector<2x16xf32>
    %245 = tpu.matmul %194, %102, %cst_141 {dimension_numbers = #tpu.dot_dimension_numbers<[1], [0], [0], [1], [0, 0, 1, 1], [], []>} : vector<2x16xf32>, vector<16x16xf32>, vector<2x16xf32> -> vector<2x16xf32>
    %246 = vector.broadcast %114 : vector<1x16xf32> to vector<2x16xf32>
    %247 = arith.addf %245, %246 : vector<2x16xf32>
    %cst_142 = arith.constant dense<0.000000e+00> : vector<2x16xf32>
    %248 = tpu.matmul %194, %104, %cst_142 {dimension_numbers = #tpu.dot_dimension_numbers<[1], [0], [0], [1], [0, 0, 1, 1], [], []>} : vector<2x16xf32>, vector<16x16xf32>, vector<2x16xf32> -> vector<2x16xf32>
    %249 = vector.broadcast %116 : vector<1x16xf32> to vector<2x16xf32>
    %250 = arith.addf %248, %249 : vector<2x16xf32>
    %251 = arith.index_cast %203 : i32 to index
    %c0_143 = arith.constant 0 : index
    %c0_144 = arith.constant 0 : index
    %252 = vector.load %arg25[%251, %c0_143, %c0_144] : memref<8x2x16xf32, #tpu.memory_space<vmem>>, vector<1x2x16xf32>
    %253 = vector.shape_cast %252 : vector<1x2x16xf32> to vector<2x16xf32>
    %254 = arith.addf %253, %244 : vector<2x16xf32>
    %255 = arith.negf %254 : vector<2x16xf32>
    %256 = math.exp %255 : vector<2x16xf32>
    %cst_145 = arith.constant 1.000000e+00 : f32
    %257 = vector.broadcast %cst_145 : f32 to vector<2x16xf32>
    %258 = arith.addf %257, %256 : vector<2x16xf32>
    %259 = arith.divf %257, %258 : vector<2x16xf32>
    %260 = arith.index_cast %203 : i32 to index
    %c0_146 = arith.constant 0 : index
    %c0_147 = arith.constant 0 : index
    %261 = vector.load %arg26[%260, %c0_146, %c0_147] : memref<8x2x16xf32, #tpu.memory_space<vmem>>, vector<1x2x16xf32>
    %262 = vector.shape_cast %261 : vector<1x2x16xf32> to vector<2x16xf32>
    %263 = arith.addf %262, %247 : vector<2x16xf32>
    %264 = arith.negf %263 : vector<2x16xf32>
    %265 = math.exp %264 : vector<2x16xf32>
    %cst_148 = arith.constant 1.000000e+00 : f32
    %266 = vector.broadcast %cst_148 : f32 to vector<2x16xf32>
    %267 = arith.addf %266, %265 : vector<2x16xf32>
    %268 = arith.divf %266, %267 : vector<2x16xf32>
    %269 = arith.index_cast %203 : i32 to index
    %c0_149 = arith.constant 0 : index
    %c0_150 = arith.constant 0 : index
    %270 = vector.load %arg27[%269, %c0_149, %c0_150] : memref<8x2x16xf32, #tpu.memory_space<vmem>>, vector<1x2x16xf32>
    %271 = vector.shape_cast %270 : vector<1x2x16xf32> to vector<2x16xf32>
    %272 = arith.mulf %259, %250 : vector<2x16xf32>
    %273 = arith.addf %271, %272 : vector<2x16xf32>
    %274 = math.tanh %273 : vector<2x16xf32>
    %cst_151 = arith.constant 1.000000e+00 : f32
    %275 = vector.broadcast %cst_151 : f32 to vector<2x16xf32>
    %276 = arith.subf %275, %268 : vector<2x16xf32>
    %277 = arith.mulf %276, %274 : vector<2x16xf32>
    %278 = arith.mulf %268, %194 : vector<2x16xf32>
    %279 = arith.addf %277, %278 : vector<2x16xf32>
    %280 = arith.index_cast %c1_i32 : i32 to index
    %c0_152 = arith.constant 0 : index
    %c0_153 = arith.constant 0 : index
    %281 = vector.load %arg28[%280, %c0_152, %c0_153] : memref<8x2x16xf32, #tpu.memory_space<vmem>>, vector<1x2x16xf32>
    %282 = vector.shape_cast %281 : vector<1x2x16xf32> to vector<2x16xf32>
    %283 = vector.shape_cast %241 : vector<2x16xf32> to vector<1x2x16xf32>
    tpu.vector_store %arg28[%280, %c0_152, %c0_153], %283 {strides = array<i32>} : memref<8x2x16xf32, #tpu.memory_space<vmem>>, vector<1x2x16xf32>,
    %284 = arith.index_cast %203 : i32 to index
    %c0_154 = arith.constant 0 : index
    %c0_155 = arith.constant 0 : index
    %285 = vector.load %arg29[%284, %c0_154, %c0_155] : memref<8x2x16xf32, #tpu.memory_space<vmem>>, vector<1x2x16xf32>
    %286 = vector.shape_cast %285 : vector<1x2x16xf32> to vector<2x16xf32>
    %287 = vector.shape_cast %279 : vector<2x16xf32> to vector<1x2x16xf32>
    tpu.vector_store %arg29[%284, %c0_154, %c0_155], %287 {strides = array<i32>} : memref<8x2x16xf32, #tpu.memory_space<vmem>>, vector<1x2x16xf32>,
    %c2_i32 = arith.constant 2 : i32
    %c7_i32_156 = arith.constant 7 : i32
    %288 = arith.subi %c7_i32_156, %c2_i32 : i32
    %cst_157 = arith.constant dense<0.000000e+00> : vector<2x16xf32>
    %289 = tpu.matmul %241, %94, %cst_157 {dimension_numbers = #tpu.dot_dimension_numbers<[1], [0], [0], [1], [0, 0, 1, 1], [], []>} : vector<2x16xf32>, vector<16x16xf32>, vector<2x16xf32> -> vector<2x16xf32>
    %290 = vector.broadcast %106 : vector<1x16xf32> to vector<2x16xf32>
    %291 = arith.addf %289, %290 : vector<2x16xf32>
    %cst_158 = arith.constant dense<0.000000e+00> : vector<2x16xf32>
    %292 = tpu.matmul %241, %96, %cst_158 {dimension_numbers = #tpu.dot_dimension_numbers<[1], [0], [0], [1], [0, 0, 1, 1], [], []>} : vector<2x16xf32>, vector<16x16xf32>, vector<2x16xf32> -> vector<2x16xf32>
    %293 = vector.broadcast %108 : vector<1x16xf32> to vector<2x16xf32>
    %294 = arith.addf %292, %293 : vector<2x16xf32>
    %cst_159 = arith.constant dense<0.000000e+00> : vector<2x16xf32>
    %295 = tpu.matmul %241, %98, %cst_159 {dimension_numbers = #tpu.dot_dimension_numbers<[1], [0], [0], [1], [0, 0, 1, 1], [], []>} : vector<2x16xf32>, vector<16x16xf32>, vector<2x16xf32> -> vector<2x16xf32>
    %296 = vector.broadcast %110 : vector<1x16xf32> to vector<2x16xf32>
    %297 = arith.addf %295, %296 : vector<2x16xf32>
    %298 = arith.index_cast %c2_i32 : i32 to index
    %c0_160 = arith.constant 0 : index
    %c0_161 = arith.constant 0 : index
    %299 = vector.load %arg22[%298, %c0_160, %c0_161] : memref<8x2x16xf32, #tpu.memory_space<vmem>>, vector<1x2x16xf32>
    %300 = vector.shape_cast %299 : vector<1x2x16xf32> to vector<2x16xf32>
    %301 = arith.addf %300, %291 : vector<2x16xf32>
    %302 = arith.negf %301 : vector<2x16xf32>
    %303 = math.exp %302 : vector<2x16xf32>
    %cst_162 = arith.constant 1.000000e+00 : f32
    %304 = vector.broadcast %cst_162 : f32 to vector<2x16xf32>
    %305 = arith.addf %304, %303 : vector<2x16xf32>
    %306 = arith.divf %304, %305 : vector<2x16xf32>
    %307 = arith.index_cast %c2_i32 : i32 to index
    %c0_163 = arith.constant 0 : index
    %c0_164 = arith.constant 0 : index
    %308 = vector.load %arg23[%307, %c0_163, %c0_164] : memref<8x2x16xf32, #tpu.memory_space<vmem>>, vector<1x2x16xf32>
    %309 = vector.shape_cast %308 : vector<1x2x16xf32> to vector<2x16xf32>
    %310 = arith.addf %309, %294 : vector<2x16xf32>
    %311 = arith.negf %310 : vector<2x16xf32>
    %312 = math.exp %311 : vector<2x16xf32>
    %cst_165 = arith.constant 1.000000e+00 : f32
    %313 = vector.broadcast %cst_165 : f32 to vector<2x16xf32>
    %314 = arith.addf %313, %312 : vector<2x16xf32>
    %315 = arith.divf %313, %314 : vector<2x16xf32>
    %316 = arith.index_cast %c2_i32 : i32 to index
    %c0_166 = arith.constant 0 : index
    %c0_167 = arith.constant 0 : index
    %317 = vector.load %arg24[%316, %c0_166, %c0_167] : memref<8x2x16xf32, #tpu.memory_space<vmem>>, vector<1x2x16xf32>
    %318 = vector.shape_cast %317 : vector<1x2x16xf32> to vector<2x16xf32>
    %319 = arith.mulf %306, %297 : vector<2x16xf32>
    %320 = arith.addf %318, %319 : vector<2x16xf32>
    %321 = math.tanh %320 : vector<2x16xf32>
    %cst_168 = arith.constant 1.000000e+00 : f32
    %322 = vector.broadcast %cst_168 : f32 to vector<2x16xf32>
    %323 = arith.subf %322, %315 : vector<2x16xf32>
    %324 = arith.mulf %323, %321 : vector<2x16xf32>
    %325 = arith.mulf %315, %241 : vector<2x16xf32>
    %326 = arith.addf %324, %325 : vector<2x16xf32>
    %cst_169 = arith.constant dense<0.000000e+00> : vector<2x16xf32>
    %327 = tpu.matmul %279, %100, %cst_169 {dimension_numbers = #tpu.dot_dimension_numbers<[1], [0], [0], [1], [0, 0, 1, 1], [], []>} : vector<2x16xf32>, vector<16x16xf32>, vector<2x16xf32> -> vector<2x16xf32>
    %328 = vector.broadcast %112 : vector<1x16xf32> to vector<2x16xf32>
    %329 = arith.addf %327, %328 : vector<2x16xf32>
    %cst_170 = arith.constant dense<0.000000e+00> : vector<2x16xf32>
    %330 = tpu.matmul %279, %102, %cst_170 {dimension_numbers = #tpu.dot_dimension_numbers<[1], [0], [0], [1], [0, 0, 1, 1], [], []>} : vector<2x16xf32>, vector<16x16xf32>, vector<2x16xf32> -> vector<2x16xf32>
    %331 = vector.broadcast %114 : vector<1x16xf32> to vector<2x16xf32>
    %332 = arith.addf %330, %331 : vector<2x16xf32>
    %cst_171 = arith.constant dense<0.000000e+00> : vector<2x16xf32>
    %333 = tpu.matmul %279, %104, %cst_171 {dimension_numbers = #tpu.dot_dimension_numbers<[1], [0], [0], [1], [0, 0, 1, 1], [], []>} : vector<2x16xf32>, vector<16x16xf32>, vector<2x16xf32> -> vector<2x16xf32>
    %334 = vector.broadcast %116 : vector<1x16xf32> to vector<2x16xf32>
    %335 = arith.addf %333, %334 : vector<2x16xf32>
    %336 = arith.index_cast %288 : i32 to index
    %c0_172 = arith.constant 0 : index
    %c0_173 = arith.constant 0 : index
    %337 = vector.load %arg25[%336, %c0_172, %c0_173] : memref<8x2x16xf32, #tpu.memory_space<vmem>>, vector<1x2x16xf32>
    %338 = vector.shape_cast %337 : vector<1x2x16xf32> to vector<2x16xf32>
    %339 = arith.addf %338, %329 : vector<2x16xf32>
    %340 = arith.negf %339 : vector<2x16xf32>
    %341 = math.exp %340 : vector<2x16xf32>
    %cst_174 = arith.constant 1.000000e+00 : f32
    %342 = vector.broadcast %cst_174 : f32 to vector<2x16xf32>
    %343 = arith.addf %342, %341 : vector<2x16xf32>
    %344 = arith.divf %342, %343 : vector<2x16xf32>
    %345 = arith.index_cast %288 : i32 to index
    %c0_175 = arith.constant 0 : index
    %c0_176 = arith.constant 0 : index
    %346 = vector.load %arg26[%345, %c0_175, %c0_176] : memref<8x2x16xf32, #tpu.memory_space<vmem>>, vector<1x2x16xf32>
    %347 = vector.shape_cast %346 : vector<1x2x16xf32> to vector<2x16xf32>
    %348 = arith.addf %347, %332 : vector<2x16xf32>
    %349 = arith.negf %348 : vector<2x16xf32>
    %350 = math.exp %349 : vector<2x16xf32>
    %cst_177 = arith.constant 1.000000e+00 : f32
    %351 = vector.broadcast %cst_177 : f32 to vector<2x16xf32>
    %352 = arith.addf %351, %350 : vector<2x16xf32>
    %353 = arith.divf %351, %352 : vector<2x16xf32>
    %354 = arith.index_cast %288 : i32 to index
    %c0_178 = arith.constant 0 : index
    %c0_179 = arith.constant 0 : index
    %355 = vector.load %arg27[%354, %c0_178, %c0_179] : memref<8x2x16xf32, #tpu.memory_space<vmem>>, vector<1x2x16xf32>
    %356 = vector.shape_cast %355 : vector<1x2x16xf32> to vector<2x16xf32>
    %357 = arith.mulf %344, %335 : vector<2x16xf32>
    %358 = arith.addf %356, %357 : vector<2x16xf32>
    %359 = math.tanh %358 : vector<2x16xf32>
    %cst_180 = arith.constant 1.000000e+00 : f32
    %360 = vector.broadcast %cst_180 : f32 to vector<2x16xf32>
    %361 = arith.subf %360, %353 : vector<2x16xf32>
    %362 = arith.mulf %361, %359 : vector<2x16xf32>
    %363 = arith.mulf %353, %279 : vector<2x16xf32>
    %364 = arith.addf %362, %363 : vector<2x16xf32>
    %365 = arith.index_cast %c2_i32 : i32 to index
    %c0_181 = arith.constant 0 : index
    %c0_182 = arith.constant 0 : index
    %366 = vector.load %arg28[%365, %c0_181, %c0_182] : memref<8x2x16xf32, #tpu.memory_space<vmem>>, vector<1x2x16xf32>
    %367 = vector.shape_cast %366 : vector<1x2x16xf32> to vector<2x16xf32>
    %368 = vector.shape_cast %326 : vector<2x16xf32> to vector<1x2x16xf32>
    tpu.vector_store %arg28[%365, %c0_181, %c0_182], %368 {strides = array<i32>} : memref<8x2x16xf32, #tpu.memory_space<vmem>>, vector<1x2x16xf32>,
    %369 = arith.index_cast %288 : i32 to index
    %c0_183 = arith.constant 0 : index
    %c0_184 = arith.constant 0 : index
    %370 = vector.load %arg29[%369, %c0_183, %c0_184] : memref<8x2x16xf32, #tpu.memory_space<vmem>>, vector<1x2x16xf32>
    %371 = vector.shape_cast %370 : vector<1x2x16xf32> to vector<2x16xf32>
    %372 = vector.shape_cast %364 : vector<2x16xf32> to vector<1x2x16xf32>
    tpu.vector_store %arg29[%369, %c0_183, %c0_184], %372 {strides = array<i32>} : memref<8x2x16xf32, #tpu.memory_space<vmem>>, vector<1x2x16xf32>,
    %c3_i32 = arith.constant 3 : i32
    %c7_i32_185 = arith.constant 7 : i32
    %373 = arith.subi %c7_i32_185, %c3_i32 : i32
    %cst_186 = arith.constant dense<0.000000e+00> : vector<2x16xf32>
    %374 = tpu.matmul %326, %94, %cst_186 {dimension_numbers = #tpu.dot_dimension_numbers<[1], [0], [0], [1], [0, 0, 1, 1], [], []>} : vector<2x16xf32>, vector<16x16xf32>, vector<2x16xf32> -> vector<2x16xf32>
    %375 = vector.broadcast %106 : vector<1x16xf32> to vector<2x16xf32>
    %376 = arith.addf %374, %375 : vector<2x16xf32>
    %cst_187 = arith.constant dense<0.000000e+00> : vector<2x16xf32>
    %377 = tpu.matmul %326, %96, %cst_187 {dimension_numbers = #tpu.dot_dimension_numbers<[1], [0], [0], [1], [0, 0, 1, 1], [], []>} : vector<2x16xf32>, vector<16x16xf32>, vector<2x16xf32> -> vector<2x16xf32>
    %378 = vector.broadcast %108 : vector<1x16xf32> to vector<2x16xf32>
    %379 = arith.addf %377, %378 : vector<2x16xf32>
    %cst_188 = arith.constant dense<0.000000e+00> : vector<2x16xf32>
    %380 = tpu.matmul %326, %98, %cst_188 {dimension_numbers = #tpu.dot_dimension_numbers<[1], [0], [0], [1], [0, 0, 1, 1], [], []>} : vector<2x16xf32>, vector<16x16xf32>, vector<2x16xf32> -> vector<2x16xf32>
    %381 = vector.broadcast %110 : vector<1x16xf32> to vector<2x16xf32>
    %382 = arith.addf %380, %381 : vector<2x16xf32>
    %383 = arith.index_cast %c3_i32 : i32 to index
    %c0_189 = arith.constant 0 : index
    %c0_190 = arith.constant 0 : index
    %384 = vector.load %arg22[%383, %c0_189, %c0_190] : memref<8x2x16xf32, #tpu.memory_space<vmem>>, vector<1x2x16xf32>
    %385 = vector.shape_cast %384 : vector<1x2x16xf32> to vector<2x16xf32>
    %386 = arith.addf %385, %376 : vector<2x16xf32>
    %387 = arith.negf %386 : vector<2x16xf32>
    %388 = math.exp %387 : vector<2x16xf32>
    %cst_191 = arith.constant 1.000000e+00 : f32
    %389 = vector.broadcast %cst_191 : f32 to vector<2x16xf32>
    %390 = arith.addf %389, %388 : vector<2x16xf32>
    %391 = arith.divf %389, %390 : vector<2x16xf32>
    %392 = arith.index_cast %c3_i32 : i32 to index
    %c0_192 = arith.constant 0 : index
    %c0_193 = arith.constant 0 : index
    %393 = vector.load %arg23[%392, %c0_192, %c0_193] : memref<8x2x16xf32, #tpu.memory_space<vmem>>, vector<1x2x16xf32>
    %394 = vector.shape_cast %393 : vector<1x2x16xf32> to vector<2x16xf32>
    %395 = arith.addf %394, %379 : vector<2x16xf32>
    %396 = arith.negf %395 : vector<2x16xf32>
    %397 = math.exp %396 : vector<2x16xf32>
    %cst_194 = arith.constant 1.000000e+00 : f32
    %398 = vector.broadcast %cst_194 : f32 to vector<2x16xf32>
    %399 = arith.addf %398, %397 : vector<2x16xf32>
    %400 = arith.divf %398, %399 : vector<2x16xf32>
    %401 = arith.index_cast %c3_i32 : i32 to index
    %c0_195 = arith.constant 0 : index
    %c0_196 = arith.constant 0 : index
    %402 = vector.load %arg24[%401, %c0_195, %c0_196] : memref<8x2x16xf32, #tpu.memory_space<vmem>>, vector<1x2x16xf32>
    %403 = vector.shape_cast %402 : vector<1x2x16xf32> to vector<2x16xf32>
    %404 = arith.mulf %391, %382 : vector<2x16xf32>
    %405 = arith.addf %403, %404 : vector<2x16xf32>
    %406 = math.tanh %405 : vector<2x16xf32>
    %cst_197 = arith.constant 1.000000e+00 : f32
    %407 = vector.broadcast %cst_197 : f32 to vector<2x16xf32>
    %408 = arith.subf %407, %400 : vector<2x16xf32>
    %409 = arith.mulf %408, %406 : vector<2x16xf32>
    %410 = arith.mulf %400, %326 : vector<2x16xf32>
    %411 = arith.addf %409, %410 : vector<2x16xf32>
    %cst_198 = arith.constant dense<0.000000e+00> : vector<2x16xf32>
    %412 = tpu.matmul %364, %100, %cst_198 {dimension_numbers = #tpu.dot_dimension_numbers<[1], [0], [0], [1], [0, 0, 1, 1], [], []>} : vector<2x16xf32>, vector<16x16xf32>, vector<2x16xf32> -> vector<2x16xf32>
    %413 = vector.broadcast %112 : vector<1x16xf32> to vector<2x16xf32>
    %414 = arith.addf %412, %413 : vector<2x16xf32>
    %cst_199 = arith.constant dense<0.000000e+00> : vector<2x16xf32>
    %415 = tpu.matmul %364, %102, %cst_199 {dimension_numbers = #tpu.dot_dimension_numbers<[1], [0], [0], [1], [0, 0, 1, 1], [], []>} : vector<2x16xf32>, vector<16x16xf32>, vector<2x16xf32> -> vector<2x16xf32>
    %416 = vector.broadcast %114 : vector<1x16xf32> to vector<2x16xf32>
    %417 = arith.addf %415, %416 : vector<2x16xf32>
    %cst_200 = arith.constant dense<0.000000e+00> : vector<2x16xf32>
    %418 = tpu.matmul %364, %104, %cst_200 {dimension_numbers = #tpu.dot_dimension_numbers<[1], [0], [0], [1], [0, 0, 1, 1], [], []>} : vector<2x16xf32>, vector<16x16xf32>, vector<2x16xf32> -> vector<2x16xf32>
    %419 = vector.broadcast %116 : vector<1x16xf32> to vector<2x16xf32>
    %420 = arith.addf %418, %419 : vector<2x16xf32>
    %421 = arith.index_cast %373 : i32 to index
    %c0_201 = arith.constant 0 : index
    %c0_202 = arith.constant 0 : index
    %422 = vector.load %arg25[%421, %c0_201, %c0_202] : memref<8x2x16xf32, #tpu.memory_space<vmem>>, vector<1x2x16xf32>
    %423 = vector.shape_cast %422 : vector<1x2x16xf32> to vector<2x16xf32>
    %424 = arith.addf %423, %414 : vector<2x16xf32>
    %425 = arith.negf %424 : vector<2x16xf32>
    %426 = math.exp %425 : vector<2x16xf32>
    %cst_203 = arith.constant 1.000000e+00 : f32
    %427 = vector.broadcast %cst_203 : f32 to vector<2x16xf32>
    %428 = arith.addf %427, %426 : vector<2x16xf32>
    %429 = arith.divf %427, %428 : vector<2x16xf32>
    %430 = arith.index_cast %373 : i32 to index
    %c0_204 = arith.constant 0 : index
    %c0_205 = arith.constant 0 : index
    %431 = vector.load %arg26[%430, %c0_204, %c0_205] : memref<8x2x16xf32, #tpu.memory_space<vmem>>, vector<1x2x16xf32>
    %432 = vector.shape_cast %431 : vector<1x2x16xf32> to vector<2x16xf32>
    %433 = arith.addf %432, %417 : vector<2x16xf32>
    %434 = arith.negf %433 : vector<2x16xf32>
    %435 = math.exp %434 : vector<2x16xf32>
    %cst_206 = arith.constant 1.000000e+00 : f32
    %436 = vector.broadcast %cst_206 : f32 to vector<2x16xf32>
    %437 = arith.addf %436, %435 : vector<2x16xf32>
    %438 = arith.divf %436, %437 : vector<2x16xf32>
    %439 = arith.index_cast %373 : i32 to index
    %c0_207 = arith.constant 0 : index
    %c0_208 = arith.constant 0 : index
    %440 = vector.load %arg27[%439, %c0_207, %c0_208] : memref<8x2x16xf32, #tpu.memory_space<vmem>>, vector<1x2x16xf32>
    %441 = vector.shape_cast %440 : vector<1x2x16xf32> to vector<2x16xf32>
    %442 = arith.mulf %429, %420 : vector<2x16xf32>
    %443 = arith.addf %441, %442 : vector<2x16xf32>
    %444 = math.tanh %443 : vector<2x16xf32>
    %cst_209 = arith.constant 1.000000e+00 : f32
    %445 = vector.broadcast %cst_209 : f32 to vector<2x16xf32>
    %446 = arith.subf %445, %438 : vector<2x16xf32>
    %447 = arith.mulf %446, %444 : vector<2x16xf32>
    %448 = arith.mulf %438, %364 : vector<2x16xf32>
    %449 = arith.addf %447, %448 : vector<2x16xf32>
    %450 = arith.index_cast %c3_i32 : i32 to index
    %c0_210 = arith.constant 0 : index
    %c0_211 = arith.constant 0 : index
    %451 = vector.load %arg28[%450, %c0_210, %c0_211] : memref<8x2x16xf32, #tpu.memory_space<vmem>>, vector<1x2x16xf32>
    %452 = vector.shape_cast %451 : vector<1x2x16xf32> to vector<2x16xf32>
    %453 = vector.shape_cast %411 : vector<2x16xf32> to vector<1x2x16xf32>
    tpu.vector_store %arg28[%450, %c0_210, %c0_211], %453 {strides = array<i32>} : memref<8x2x16xf32, #tpu.memory_space<vmem>>, vector<1x2x16xf32>,
    %454 = arith.index_cast %373 : i32 to index
    %c0_212 = arith.constant 0 : index
    %c0_213 = arith.constant 0 : index
    %455 = vector.load %arg29[%454, %c0_212, %c0_213] : memref<8x2x16xf32, #tpu.memory_space<vmem>>, vector<1x2x16xf32>
    %456 = vector.shape_cast %455 : vector<1x2x16xf32> to vector<2x16xf32>
    %457 = vector.shape_cast %449 : vector<2x16xf32> to vector<1x2x16xf32>
    tpu.vector_store %arg29[%454, %c0_212, %c0_213], %457 {strides = array<i32>} : memref<8x2x16xf32, #tpu.memory_space<vmem>>, vector<1x2x16xf32>,
    %c4_i32 = arith.constant 4 : i32
    %c7_i32_214 = arith.constant 7 : i32
    %458 = arith.subi %c7_i32_214, %c4_i32 : i32
    %cst_215 = arith.constant dense<0.000000e+00> : vector<2x16xf32>
    %459 = tpu.matmul %411, %94, %cst_215 {dimension_numbers = #tpu.dot_dimension_numbers<[1], [0], [0], [1], [0, 0, 1, 1], [], []>} : vector<2x16xf32>, vector<16x16xf32>, vector<2x16xf32> -> vector<2x16xf32>
    %460 = vector.broadcast %106 : vector<1x16xf32> to vector<2x16xf32>
    %461 = arith.addf %459, %460 : vector<2x16xf32>
    %cst_216 = arith.constant dense<0.000000e+00> : vector<2x16xf32>
    %462 = tpu.matmul %411, %96, %cst_216 {dimension_numbers = #tpu.dot_dimension_numbers<[1], [0], [0], [1], [0, 0, 1, 1], [], []>} : vector<2x16xf32>, vector<16x16xf32>, vector<2x16xf32> -> vector<2x16xf32>
    %463 = vector.broadcast %108 : vector<1x16xf32> to vector<2x16xf32>
    %464 = arith.addf %462, %463 : vector<2x16xf32>
    %cst_217 = arith.constant dense<0.000000e+00> : vector<2x16xf32>
    %465 = tpu.matmul %411, %98, %cst_217 {dimension_numbers = #tpu.dot_dimension_numbers<[1], [0], [0], [1], [0, 0, 1, 1], [], []>} : vector<2x16xf32>, vector<16x16xf32>, vector<2x16xf32> -> vector<2x16xf32>
    %466 = vector.broadcast %110 : vector<1x16xf32> to vector<2x16xf32>
    %467 = arith.addf %465, %466 : vector<2x16xf32>
    %468 = arith.index_cast %c4_i32 : i32 to index
    %c0_218 = arith.constant 0 : index
    %c0_219 = arith.constant 0 : index
    %469 = vector.load %arg22[%468, %c0_218, %c0_219] : memref<8x2x16xf32, #tpu.memory_space<vmem>>, vector<1x2x16xf32>
    %470 = vector.shape_cast %469 : vector<1x2x16xf32> to vector<2x16xf32>
    %471 = arith.addf %470, %461 : vector<2x16xf32>
    %472 = arith.negf %471 : vector<2x16xf32>
    %473 = math.exp %472 : vector<2x16xf32>
    %cst_220 = arith.constant 1.000000e+00 : f32
    %474 = vector.broadcast %cst_220 : f32 to vector<2x16xf32>
    %475 = arith.addf %474, %473 : vector<2x16xf32>
    %476 = arith.divf %474, %475 : vector<2x16xf32>
    %477 = arith.index_cast %c4_i32 : i32 to index
    %c0_221 = arith.constant 0 : index
    %c0_222 = arith.constant 0 : index
    %478 = vector.load %arg23[%477, %c0_221, %c0_222] : memref<8x2x16xf32, #tpu.memory_space<vmem>>, vector<1x2x16xf32>
    %479 = vector.shape_cast %478 : vector<1x2x16xf32> to vector<2x16xf32>
    %480 = arith.addf %479, %464 : vector<2x16xf32>
    %481 = arith.negf %480 : vector<2x16xf32>
    %482 = math.exp %481 : vector<2x16xf32>
    %cst_223 = arith.constant 1.000000e+00 : f32
    %483 = vector.broadcast %cst_223 : f32 to vector<2x16xf32>
    %484 = arith.addf %483, %482 : vector<2x16xf32>
    %485 = arith.divf %483, %484 : vector<2x16xf32>
    %486 = arith.index_cast %c4_i32 : i32 to index
    %c0_224 = arith.constant 0 : index
    %c0_225 = arith.constant 0 : index
    %487 = vector.load %arg24[%486, %c0_224, %c0_225] : memref<8x2x16xf32, #tpu.memory_space<vmem>>, vector<1x2x16xf32>
    %488 = vector.shape_cast %487 : vector<1x2x16xf32> to vector<2x16xf32>
    %489 = arith.mulf %476, %467 : vector<2x16xf32>
    %490 = arith.addf %488, %489 : vector<2x16xf32>
    %491 = math.tanh %490 : vector<2x16xf32>
    %cst_226 = arith.constant 1.000000e+00 : f32
    %492 = vector.broadcast %cst_226 : f32 to vector<2x16xf32>
    %493 = arith.subf %492, %485 : vector<2x16xf32>
    %494 = arith.mulf %493, %491 : vector<2x16xf32>
    %495 = arith.mulf %485, %411 : vector<2x16xf32>
    %496 = arith.addf %494, %495 : vector<2x16xf32>
    %cst_227 = arith.constant dense<0.000000e+00> : vector<2x16xf32>
    %497 = tpu.matmul %449, %100, %cst_227 {dimension_numbers = #tpu.dot_dimension_numbers<[1], [0], [0], [1], [0, 0, 1, 1], [], []>} : vector<2x16xf32>, vector<16x16xf32>, vector<2x16xf32> -> vector<2x16xf32>
    %498 = vector.broadcast %112 : vector<1x16xf32> to vector<2x16xf32>
    %499 = arith.addf %497, %498 : vector<2x16xf32>
    %cst_228 = arith.constant dense<0.000000e+00> : vector<2x16xf32>
    %500 = tpu.matmul %449, %102, %cst_228 {dimension_numbers = #tpu.dot_dimension_numbers<[1], [0], [0], [1], [0, 0, 1, 1], [], []>} : vector<2x16xf32>, vector<16x16xf32>, vector<2x16xf32> -> vector<2x16xf32>
    %501 = vector.broadcast %114 : vector<1x16xf32> to vector<2x16xf32>
    %502 = arith.addf %500, %501 : vector<2x16xf32>
    %cst_229 = arith.constant dense<0.000000e+00> : vector<2x16xf32>
    %503 = tpu.matmul %449, %104, %cst_229 {dimension_numbers = #tpu.dot_dimension_numbers<[1], [0], [0], [1], [0, 0, 1, 1], [], []>} : vector<2x16xf32>, vector<16x16xf32>, vector<2x16xf32> -> vector<2x16xf32>
    %504 = vector.broadcast %116 : vector<1x16xf32> to vector<2x16xf32>
    %505 = arith.addf %503, %504 : vector<2x16xf32>
    %506 = arith.index_cast %458 : i32 to index
    %c0_230 = arith.constant 0 : index
    %c0_231 = arith.constant 0 : index
    %507 = vector.load %arg25[%506, %c0_230, %c0_231] : memref<8x2x16xf32, #tpu.memory_space<vmem>>, vector<1x2x16xf32>
    %508 = vector.shape_cast %507 : vector<1x2x16xf32> to vector<2x16xf32>
    %509 = arith.addf %508, %499 : vector<2x16xf32>
    %510 = arith.negf %509 : vector<2x16xf32>
    %511 = math.exp %510 : vector<2x16xf32>
    %cst_232 = arith.constant 1.000000e+00 : f32
    %512 = vector.broadcast %cst_232 : f32 to vector<2x16xf32>
    %513 = arith.addf %512, %511 : vector<2x16xf32>
    %514 = arith.divf %512, %513 : vector<2x16xf32>
    %515 = arith.index_cast %458 : i32 to index
    %c0_233 = arith.constant 0 : index
    %c0_234 = arith.constant 0 : index
    %516 = vector.load %arg26[%515, %c0_233, %c0_234] : memref<8x2x16xf32, #tpu.memory_space<vmem>>, vector<1x2x16xf32>
    %517 = vector.shape_cast %516 : vector<1x2x16xf32> to vector<2x16xf32>
    %518 = arith.addf %517, %502 : vector<2x16xf32>
    %519 = arith.negf %518 : vector<2x16xf32>
    %520 = math.exp %519 : vector<2x16xf32>
    %cst_235 = arith.constant 1.000000e+00 : f32
    %521 = vector.broadcast %cst_235 : f32 to vector<2x16xf32>
    %522 = arith.addf %521, %520 : vector<2x16xf32>
    %523 = arith.divf %521, %522 : vector<2x16xf32>
    %524 = arith.index_cast %458 : i32 to index
    %c0_236 = arith.constant 0 : index
    %c0_237 = arith.constant 0 : index
    %525 = vector.load %arg27[%524, %c0_236, %c0_237] : memref<8x2x16xf32, #tpu.memory_space<vmem>>, vector<1x2x16xf32>
    %526 = vector.shape_cast %525 : vector<1x2x16xf32> to vector<2x16xf32>
    %527 = arith.mulf %514, %505 : vector<2x16xf32>
    %528 = arith.addf %526, %527 : vector<2x16xf32>
    %529 = math.tanh %528 : vector<2x16xf32>
    %cst_238 = arith.constant 1.000000e+00 : f32
    %530 = vector.broadcast %cst_238 : f32 to vector<2x16xf32>
    %531 = arith.subf %530, %523 : vector<2x16xf32>
    %532 = arith.mulf %531, %529 : vector<2x16xf32>
    %533 = arith.mulf %523, %449 : vector<2x16xf32>
    %534 = arith.addf %532, %533 : vector<2x16xf32>
    %535 = arith.index_cast %c4_i32 : i32 to index
    %c0_239 = arith.constant 0 : index
    %c0_240 = arith.constant 0 : index
    %536 = vector.load %arg28[%535, %c0_239, %c0_240] : memref<8x2x16xf32, #tpu.memory_space<vmem>>, vector<1x2x16xf32>
    %537 = vector.shape_cast %536 : vector<1x2x16xf32> to vector<2x16xf32>
    %538 = vector.shape_cast %496 : vector<2x16xf32> to vector<1x2x16xf32>
    tpu.vector_store %arg28[%535, %c0_239, %c0_240], %538 {strides = array<i32>} : memref<8x2x16xf32, #tpu.memory_space<vmem>>, vector<1x2x16xf32>,
    %539 = arith.index_cast %458 : i32 to index
    %c0_241 = arith.constant 0 : index
    %c0_242 = arith.constant 0 : index
    %540 = vector.load %arg29[%539, %c0_241, %c0_242] : memref<8x2x16xf32, #tpu.memory_space<vmem>>, vector<1x2x16xf32>
    %541 = vector.shape_cast %540 : vector<1x2x16xf32> to vector<2x16xf32>
    %542 = vector.shape_cast %534 : vector<2x16xf32> to vector<1x2x16xf32>
    tpu.vector_store %arg29[%539, %c0_241, %c0_242], %542 {strides = array<i32>} : memref<8x2x16xf32, #tpu.memory_space<vmem>>, vector<1x2x16xf32>,
    %c5_i32 = arith.constant 5 : i32
    %c7_i32_243 = arith.constant 7 : i32
    %543 = arith.subi %c7_i32_243, %c5_i32 : i32
    %cst_244 = arith.constant dense<0.000000e+00> : vector<2x16xf32>
    %544 = tpu.matmul %496, %94, %cst_244 {dimension_numbers = #tpu.dot_dimension_numbers<[1], [0], [0], [1], [0, 0, 1, 1], [], []>} : vector<2x16xf32>, vector<16x16xf32>, vector<2x16xf32> -> vector<2x16xf32>
    %545 = vector.broadcast %106 : vector<1x16xf32> to vector<2x16xf32>
    %546 = arith.addf %544, %545 : vector<2x16xf32>
    %cst_245 = arith.constant dense<0.000000e+00> : vector<2x16xf32>
    %547 = tpu.matmul %496, %96, %cst_245 {dimension_numbers = #tpu.dot_dimension_numbers<[1], [0], [0], [1], [0, 0, 1, 1], [], []>} : vector<2x16xf32>, vector<16x16xf32>, vector<2x16xf32> -> vector<2x16xf32>
    %548 = vector.broadcast %108 : vector<1x16xf32> to vector<2x16xf32>
    %549 = arith.addf %547, %548 : vector<2x16xf32>
    %cst_246 = arith.constant dense<0.000000e+00> : vector<2x16xf32>
    %550 = tpu.matmul %496, %98, %cst_246 {dimension_numbers = #tpu.dot_dimension_numbers<[1], [0], [0], [1], [0, 0, 1, 1], [], []>} : vector<2x16xf32>, vector<16x16xf32>, vector<2x16xf32> -> vector<2x16xf32>
    %551 = vector.broadcast %110 : vector<1x16xf32> to vector<2x16xf32>
    %552 = arith.addf %550, %551 : vector<2x16xf32>
    %553 = arith.index_cast %c5_i32 : i32 to index
    %c0_247 = arith.constant 0 : index
    %c0_248 = arith.constant 0 : index
    %554 = vector.load %arg22[%553, %c0_247, %c0_248] : memref<8x2x16xf32, #tpu.memory_space<vmem>>, vector<1x2x16xf32>
    %555 = vector.shape_cast %554 : vector<1x2x16xf32> to vector<2x16xf32>
    %556 = arith.addf %555, %546 : vector<2x16xf32>
    %557 = arith.negf %556 : vector<2x16xf32>
    %558 = math.exp %557 : vector<2x16xf32>
    %cst_249 = arith.constant 1.000000e+00 : f32
    %559 = vector.broadcast %cst_249 : f32 to vector<2x16xf32>
    %560 = arith.addf %559, %558 : vector<2x16xf32>
    %561 = arith.divf %559, %560 : vector<2x16xf32>
    %562 = arith.index_cast %c5_i32 : i32 to index
    %c0_250 = arith.constant 0 : index
    %c0_251 = arith.constant 0 : index
    %563 = vector.load %arg23[%562, %c0_250, %c0_251] : memref<8x2x16xf32, #tpu.memory_space<vmem>>, vector<1x2x16xf32>
    %564 = vector.shape_cast %563 : vector<1x2x16xf32> to vector<2x16xf32>
    %565 = arith.addf %564, %549 : vector<2x16xf32>
    %566 = arith.negf %565 : vector<2x16xf32>
    %567 = math.exp %566 : vector<2x16xf32>
    %cst_252 = arith.constant 1.000000e+00 : f32
    %568 = vector.broadcast %cst_252 : f32 to vector<2x16xf32>
    %569 = arith.addf %568, %567 : vector<2x16xf32>
    %570 = arith.divf %568, %569 : vector<2x16xf32>
    %571 = arith.index_cast %c5_i32 : i32 to index
    %c0_253 = arith.constant 0 : index
    %c0_254 = arith.constant 0 : index
    %572 = vector.load %arg24[%571, %c0_253, %c0_254] : memref<8x2x16xf32, #tpu.memory_space<vmem>>, vector<1x2x16xf32>
    %573 = vector.shape_cast %572 : vector<1x2x16xf32> to vector<2x16xf32>
    %574 = arith.mulf %561, %552 : vector<2x16xf32>
    %575 = arith.addf %573, %574 : vector<2x16xf32>
    %576 = math.tanh %575 : vector<2x16xf32>
    %cst_255 = arith.constant 1.000000e+00 : f32
    %577 = vector.broadcast %cst_255 : f32 to vector<2x16xf32>
    %578 = arith.subf %577, %570 : vector<2x16xf32>
    %579 = arith.mulf %578, %576 : vector<2x16xf32>
    %580 = arith.mulf %570, %496 : vector<2x16xf32>
    %581 = arith.addf %579, %580 : vector<2x16xf32>
    %cst_256 = arith.constant dense<0.000000e+00> : vector<2x16xf32>
    %582 = tpu.matmul %534, %100, %cst_256 {dimension_numbers = #tpu.dot_dimension_numbers<[1], [0], [0], [1], [0, 0, 1, 1], [], []>} : vector<2x16xf32>, vector<16x16xf32>, vector<2x16xf32> -> vector<2x16xf32>
    %583 = vector.broadcast %112 : vector<1x16xf32> to vector<2x16xf32>
    %584 = arith.addf %582, %583 : vector<2x16xf32>
    %cst_257 = arith.constant dense<0.000000e+00> : vector<2x16xf32>
    %585 = tpu.matmul %534, %102, %cst_257 {dimension_numbers = #tpu.dot_dimension_numbers<[1], [0], [0], [1], [0, 0, 1, 1], [], []>} : vector<2x16xf32>, vector<16x16xf32>, vector<2x16xf32> -> vector<2x16xf32>
    %586 = vector.broadcast %114 : vector<1x16xf32> to vector<2x16xf32>
    %587 = arith.addf %585, %586 : vector<2x16xf32>
    %cst_258 = arith.constant dense<0.000000e+00> : vector<2x16xf32>
    %588 = tpu.matmul %534, %104, %cst_258 {dimension_numbers = #tpu.dot_dimension_numbers<[1], [0], [0], [1], [0, 0, 1, 1], [], []>} : vector<2x16xf32>, vector<16x16xf32>, vector<2x16xf32> -> vector<2x16xf32>
    %589 = vector.broadcast %116 : vector<1x16xf32> to vector<2x16xf32>
    %590 = arith.addf %588, %589 : vector<2x16xf32>
    %591 = arith.index_cast %543 : i32 to index
    %c0_259 = arith.constant 0 : index
    %c0_260 = arith.constant 0 : index
    %592 = vector.load %arg25[%591, %c0_259, %c0_260] : memref<8x2x16xf32, #tpu.memory_space<vmem>>, vector<1x2x16xf32>
    %593 = vector.shape_cast %592 : vector<1x2x16xf32> to vector<2x16xf32>
    %594 = arith.addf %593, %584 : vector<2x16xf32>
    %595 = arith.negf %594 : vector<2x16xf32>
    %596 = math.exp %595 : vector<2x16xf32>
    %cst_261 = arith.constant 1.000000e+00 : f32
    %597 = vector.broadcast %cst_261 : f32 to vector<2x16xf32>
    %598 = arith.addf %597, %596 : vector<2x16xf32>
    %599 = arith.divf %597, %598 : vector<2x16xf32>
    %600 = arith.index_cast %543 : i32 to index
    %c0_262 = arith.constant 0 : index
    %c0_263 = arith.constant 0 : index
    %601 = vector.load %arg26[%600, %c0_262, %c0_263] : memref<8x2x16xf32, #tpu.memory_space<vmem>>, vector<1x2x16xf32>
    %602 = vector.shape_cast %601 : vector<1x2x16xf32> to vector<2x16xf32>
    %603 = arith.addf %602, %587 : vector<2x16xf32>
    %604 = arith.negf %603 : vector<2x16xf32>
    %605 = math.exp %604 : vector<2x16xf32>
    %cst_264 = arith.constant 1.000000e+00 : f32
    %606 = vector.broadcast %cst_264 : f32 to vector<2x16xf32>
    %607 = arith.addf %606, %605 : vector<2x16xf32>
    %608 = arith.divf %606, %607 : vector<2x16xf32>
    %609 = arith.index_cast %543 : i32 to index
    %c0_265 = arith.constant 0 : index
    %c0_266 = arith.constant 0 : index
    %610 = vector.load %arg27[%609, %c0_265, %c0_266] : memref<8x2x16xf32, #tpu.memory_space<vmem>>, vector<1x2x16xf32>
    %611 = vector.shape_cast %610 : vector<1x2x16xf32> to vector<2x16xf32>
    %612 = arith.mulf %599, %590 : vector<2x16xf32>
    %613 = arith.addf %611, %612 : vector<2x16xf32>
    %614 = math.tanh %613 : vector<2x16xf32>
    %cst_267 = arith.constant 1.000000e+00 : f32
    %615 = vector.broadcast %cst_267 : f32 to vector<2x16xf32>
    %616 = arith.subf %615, %608 : vector<2x16xf32>
    %617 = arith.mulf %616, %614 : vector<2x16xf32>
    %618 = arith.mulf %608, %534 : vector<2x16xf32>
    %619 = arith.addf %617, %618 : vector<2x16xf32>
    %620 = arith.index_cast %c5_i32 : i32 to index
    %c0_268 = arith.constant 0 : index
    %c0_269 = arith.constant 0 : index
    %621 = vector.load %arg28[%620, %c0_268, %c0_269] : memref<8x2x16xf32, #tpu.memory_space<vmem>>, vector<1x2x16xf32>
    %622 = vector.shape_cast %621 : vector<1x2x16xf32> to vector<2x16xf32>
    %623 = vector.shape_cast %581 : vector<2x16xf32> to vector<1x2x16xf32>
    tpu.vector_store %arg28[%620, %c0_268, %c0_269], %623 {strides = array<i32>} : memref<8x2x16xf32, #tpu.memory_space<vmem>>, vector<1x2x16xf32>,
    %624 = arith.index_cast %543 : i32 to index
    %c0_270 = arith.constant 0 : index
    %c0_271 = arith.constant 0 : index
    %625 = vector.load %arg29[%624, %c0_270, %c0_271] : memref<8x2x16xf32, #tpu.memory_space<vmem>>, vector<1x2x16xf32>
    %626 = vector.shape_cast %625 : vector<1x2x16xf32> to vector<2x16xf32>
    %627 = vector.shape_cast %619 : vector<2x16xf32> to vector<1x2x16xf32>
    tpu.vector_store %arg29[%624, %c0_270, %c0_271], %627 {strides = array<i32>} : memref<8x2x16xf32, #tpu.memory_space<vmem>>, vector<1x2x16xf32>,
    %c6_i32 = arith.constant 6 : i32
    %c7_i32_272 = arith.constant 7 : i32
    %628 = arith.subi %c7_i32_272, %c6_i32 : i32
    %cst_273 = arith.constant dense<0.000000e+00> : vector<2x16xf32>
    %629 = tpu.matmul %581, %94, %cst_273 {dimension_numbers = #tpu.dot_dimension_numbers<[1], [0], [0], [1], [0, 0, 1, 1], [], []>} : vector<2x16xf32>, vector<16x16xf32>, vector<2x16xf32> -> vector<2x16xf32>
    %630 = vector.broadcast %106 : vector<1x16xf32> to vector<2x16xf32>
    %631 = arith.addf %629, %630 : vector<2x16xf32>
    %cst_274 = arith.constant dense<0.000000e+00> : vector<2x16xf32>
    %632 = tpu.matmul %581, %96, %cst_274 {dimension_numbers = #tpu.dot_dimension_numbers<[1], [0], [0], [1], [0, 0, 1, 1], [], []>} : vector<2x16xf32>, vector<16x16xf32>, vector<2x16xf32> -> vector<2x16xf32>
    %633 = vector.broadcast %108 : vector<1x16xf32> to vector<2x16xf32>
    %634 = arith.addf %632, %633 : vector<2x16xf32>
    %cst_275 = arith.constant dense<0.000000e+00> : vector<2x16xf32>
    %635 = tpu.matmul %581, %98, %cst_275 {dimension_numbers = #tpu.dot_dimension_numbers<[1], [0], [0], [1], [0, 0, 1, 1], [], []>} : vector<2x16xf32>, vector<16x16xf32>, vector<2x16xf32> -> vector<2x16xf32>
    %636 = vector.broadcast %110 : vector<1x16xf32> to vector<2x16xf32>
    %637 = arith.addf %635, %636 : vector<2x16xf32>
    %638 = arith.index_cast %c6_i32 : i32 to index
    %c0_276 = arith.constant 0 : index
    %c0_277 = arith.constant 0 : index
    %639 = vector.load %arg22[%638, %c0_276, %c0_277] : memref<8x2x16xf32, #tpu.memory_space<vmem>>, vector<1x2x16xf32>
    %640 = vector.shape_cast %639 : vector<1x2x16xf32> to vector<2x16xf32>
    %641 = arith.addf %640, %631 : vector<2x16xf32>
    %642 = arith.negf %641 : vector<2x16xf32>
    %643 = math.exp %642 : vector<2x16xf32>
    %cst_278 = arith.constant 1.000000e+00 : f32
    %644 = vector.broadcast %cst_278 : f32 to vector<2x16xf32>
    %645 = arith.addf %644, %643 : vector<2x16xf32>
    %646 = arith.divf %644, %645 : vector<2x16xf32>
    %647 = arith.index_cast %c6_i32 : i32 to index
    %c0_279 = arith.constant 0 : index
    %c0_280 = arith.constant 0 : index
    %648 = vector.load %arg23[%647, %c0_279, %c0_280] : memref<8x2x16xf32, #tpu.memory_space<vmem>>, vector<1x2x16xf32>
    %649 = vector.shape_cast %648 : vector<1x2x16xf32> to vector<2x16xf32>
    %650 = arith.addf %649, %634 : vector<2x16xf32>
    %651 = arith.negf %650 : vector<2x16xf32>
    %652 = math.exp %651 : vector<2x16xf32>
    %cst_281 = arith.constant 1.000000e+00 : f32
    %653 = vector.broadcast %cst_281 : f32 to vector<2x16xf32>
    %654 = arith.addf %653, %652 : vector<2x16xf32>
    %655 = arith.divf %653, %654 : vector<2x16xf32>
    %656 = arith.index_cast %c6_i32 : i32 to index
    %c0_282 = arith.constant 0 : index
    %c0_283 = arith.constant 0 : index
    %657 = vector.load %arg24[%656, %c0_282, %c0_283] : memref<8x2x16xf32, #tpu.memory_space<vmem>>, vector<1x2x16xf32>
    %658 = vector.shape_cast %657 : vector<1x2x16xf32> to vector<2x16xf32>
    %659 = arith.mulf %646, %637 : vector<2x16xf32>
    %660 = arith.addf %658, %659 : vector<2x16xf32>
    %661 = math.tanh %660 : vector<2x16xf32>
    %cst_284 = arith.constant 1.000000e+00 : f32
    %662 = vector.broadcast %cst_284 : f32 to vector<2x16xf32>
    %663 = arith.subf %662, %655 : vector<2x16xf32>
    %664 = arith.mulf %663, %661 : vector<2x16xf32>
    %665 = arith.mulf %655, %581 : vector<2x16xf32>
    %666 = arith.addf %664, %665 : vector<2x16xf32>
    %cst_285 = arith.constant dense<0.000000e+00> : vector<2x16xf32>
    %667 = tpu.matmul %619, %100, %cst_285 {dimension_numbers = #tpu.dot_dimension_numbers<[1], [0], [0], [1], [0, 0, 1, 1], [], []>} : vector<2x16xf32>, vector<16x16xf32>, vector<2x16xf32> -> vector<2x16xf32>
    %668 = vector.broadcast %112 : vector<1x16xf32> to vector<2x16xf32>
    %669 = arith.addf %667, %668 : vector<2x16xf32>
    %cst_286 = arith.constant dense<0.000000e+00> : vector<2x16xf32>
    %670 = tpu.matmul %619, %102, %cst_286 {dimension_numbers = #tpu.dot_dimension_numbers<[1], [0], [0], [1], [0, 0, 1, 1], [], []>} : vector<2x16xf32>, vector<16x16xf32>, vector<2x16xf32> -> vector<2x16xf32>
    %671 = vector.broadcast %114 : vector<1x16xf32> to vector<2x16xf32>
    %672 = arith.addf %670, %671 : vector<2x16xf32>
    %cst_287 = arith.constant dense<0.000000e+00> : vector<2x16xf32>
    %673 = tpu.matmul %619, %104, %cst_287 {dimension_numbers = #tpu.dot_dimension_numbers<[1], [0], [0], [1], [0, 0, 1, 1], [], []>} : vector<2x16xf32>, vector<16x16xf32>, vector<2x16xf32> -> vector<2x16xf32>
    %674 = vector.broadcast %116 : vector<1x16xf32> to vector<2x16xf32>
    %675 = arith.addf %673, %674 : vector<2x16xf32>
    %676 = arith.index_cast %628 : i32 to index
    %c0_288 = arith.constant 0 : index
    %c0_289 = arith.constant 0 : index
    %677 = vector.load %arg25[%676, %c0_288, %c0_289] : memref<8x2x16xf32, #tpu.memory_space<vmem>>, vector<1x2x16xf32>
    %678 = vector.shape_cast %677 : vector<1x2x16xf32> to vector<2x16xf32>
    %679 = arith.addf %678, %669 : vector<2x16xf32>
    %680 = arith.negf %679 : vector<2x16xf32>
    %681 = math.exp %680 : vector<2x16xf32>
    %cst_290 = arith.constant 1.000000e+00 : f32
    %682 = vector.broadcast %cst_290 : f32 to vector<2x16xf32>
    %683 = arith.addf %682, %681 : vector<2x16xf32>
    %684 = arith.divf %682, %683 : vector<2x16xf32>
    %685 = arith.index_cast %628 : i32 to index
    %c0_291 = arith.constant 0 : index
    %c0_292 = arith.constant 0 : index
    %686 = vector.load %arg26[%685, %c0_291, %c0_292] : memref<8x2x16xf32, #tpu.memory_space<vmem>>, vector<1x2x16xf32>
    %687 = vector.shape_cast %686 : vector<1x2x16xf32> to vector<2x16xf32>
    %688 = arith.addf %687, %672 : vector<2x16xf32>
    %689 = arith.negf %688 : vector<2x16xf32>
    %690 = math.exp %689 : vector<2x16xf32>
    %cst_293 = arith.constant 1.000000e+00 : f32
    %691 = vector.broadcast %cst_293 : f32 to vector<2x16xf32>
    %692 = arith.addf %691, %690 : vector<2x16xf32>
    %693 = arith.divf %691, %692 : vector<2x16xf32>
    %694 = arith.index_cast %628 : i32 to index
    %c0_294 = arith.constant 0 : index
    %c0_295 = arith.constant 0 : index
    %695 = vector.load %arg27[%694, %c0_294, %c0_295] : memref<8x2x16xf32, #tpu.memory_space<vmem>>, vector<1x2x16xf32>
    %696 = vector.shape_cast %695 : vector<1x2x16xf32> to vector<2x16xf32>
    %697 = arith.mulf %684, %675 : vector<2x16xf32>
    %698 = arith.addf %696, %697 : vector<2x16xf32>
    %699 = math.tanh %698 : vector<2x16xf32>
    %cst_296 = arith.constant 1.000000e+00 : f32
    %700 = vector.broadcast %cst_296 : f32 to vector<2x16xf32>
    %701 = arith.subf %700, %693 : vector<2x16xf32>
    %702 = arith.mulf %701, %699 : vector<2x16xf32>
    %703 = arith.mulf %693, %619 : vector<2x16xf32>
    %704 = arith.addf %702, %703 : vector<2x16xf32>
    %705 = arith.index_cast %c6_i32 : i32 to index
    %c0_297 = arith.constant 0 : index
    %c0_298 = arith.constant 0 : index
    %706 = vector.load %arg28[%705, %c0_297, %c0_298] : memref<8x2x16xf32, #tpu.memory_space<vmem>>, vector<1x2x16xf32>
    %707 = vector.shape_cast %706 : vector<1x2x16xf32> to vector<2x16xf32>
    %708 = vector.shape_cast %666 : vector<2x16xf32> to vector<1x2x16xf32>
    tpu.vector_store %arg28[%705, %c0_297, %c0_298], %708 {strides = array<i32>} : memref<8x2x16xf32, #tpu.memory_space<vmem>>, vector<1x2x16xf32>,
    %709 = arith.index_cast %628 : i32 to index
    %c0_299 = arith.constant 0 : index
    %c0_300 = arith.constant 0 : index
    %710 = vector.load %arg29[%709, %c0_299, %c0_300] : memref<8x2x16xf32, #tpu.memory_space<vmem>>, vector<1x2x16xf32>
    %711 = vector.shape_cast %710 : vector<1x2x16xf32> to vector<2x16xf32>
    %712 = vector.shape_cast %704 : vector<2x16xf32> to vector<1x2x16xf32>
    tpu.vector_store %arg29[%709, %c0_299, %c0_300], %712 {strides = array<i32>} : memref<8x2x16xf32, #tpu.memory_space<vmem>>, vector<1x2x16xf32>,
    %c7_i32_301 = arith.constant 7 : i32
    %c7_i32_302 = arith.constant 7 : i32
    %713 = arith.subi %c7_i32_302, %c7_i32_301 : i32
    %cst_303 = arith.constant dense<0.000000e+00> : vector<2x16xf32>
    %714 = tpu.matmul %666, %94, %cst_303 {dimension_numbers = #tpu.dot_dimension_numbers<[1], [0], [0], [1], [0, 0, 1, 1], [], []>} : vector<2x16xf32>, vector<16x16xf32>, vector<2x16xf32> -> vector<2x16xf32>
    %715 = vector.broadcast %106 : vector<1x16xf32> to vector<2x16xf32>
    %716 = arith.addf %714, %715 : vector<2x16xf32>
    %cst_304 = arith.constant dense<0.000000e+00> : vector<2x16xf32>
    %717 = tpu.matmul %666, %96, %cst_304 {dimension_numbers = #tpu.dot_dimension_numbers<[1], [0], [0], [1], [0, 0, 1, 1], [], []>} : vector<2x16xf32>, vector<16x16xf32>, vector<2x16xf32> -> vector<2x16xf32>
    %718 = vector.broadcast %108 : vector<1x16xf32> to vector<2x16xf32>
    %719 = arith.addf %717, %718 : vector<2x16xf32>
    %cst_305 = arith.constant dense<0.000000e+00> : vector<2x16xf32>
    %720 = tpu.matmul %666, %98, %cst_305 {dimension_numbers = #tpu.dot_dimension_numbers<[1], [0], [0], [1], [0, 0, 1, 1], [], []>} : vector<2x16xf32>, vector<16x16xf32>, vector<2x16xf32> -> vector<2x16xf32>
    %721 = vector.broadcast %110 : vector<1x16xf32> to vector<2x16xf32>
    %722 = arith.addf %720, %721 : vector<2x16xf32>
    %723 = arith.index_cast %c7_i32_301 : i32 to index
    %c0_306 = arith.constant 0 : index
    %c0_307 = arith.constant 0 : index
    %724 = vector.load %arg22[%723, %c0_306, %c0_307] : memref<8x2x16xf32, #tpu.memory_space<vmem>>, vector<1x2x16xf32>
    %725 = vector.shape_cast %724 : vector<1x2x16xf32> to vector<2x16xf32>
    %726 = arith.addf %725, %716 : vector<2x16xf32>
    %727 = arith.negf %726 : vector<2x16xf32>
    %728 = math.exp %727 : vector<2x16xf32>
    %cst_308 = arith.constant 1.000000e+00 : f32
    %729 = vector.broadcast %cst_308 : f32 to vector<2x16xf32>
    %730 = arith.addf %729, %728 : vector<2x16xf32>
    %731 = arith.divf %729, %730 : vector<2x16xf32>
    %732 = arith.index_cast %c7_i32_301 : i32 to index
    %c0_309 = arith.constant 0 : index
    %c0_310 = arith.constant 0 : index
    %733 = vector.load %arg23[%732, %c0_309, %c0_310] : memref<8x2x16xf32, #tpu.memory_space<vmem>>, vector<1x2x16xf32>
    %734 = vector.shape_cast %733 : vector<1x2x16xf32> to vector<2x16xf32>
    %735 = arith.addf %734, %719 : vector<2x16xf32>
    %736 = arith.negf %735 : vector<2x16xf32>
    %737 = math.exp %736 : vector<2x16xf32>
    %cst_311 = arith.constant 1.000000e+00 : f32
    %738 = vector.broadcast %cst_311 : f32 to vector<2x16xf32>
    %739 = arith.addf %738, %737 : vector<2x16xf32>
    %740 = arith.divf %738, %739 : vector<2x16xf32>
    %741 = arith.index_cast %c7_i32_301 : i32 to index
    %c0_312 = arith.constant 0 : index
    %c0_313 = arith.constant 0 : index
    %742 = vector.load %arg24[%741, %c0_312, %c0_313] : memref<8x2x16xf32, #tpu.memory_space<vmem>>, vector<1x2x16xf32>
    %743 = vector.shape_cast %742 : vector<1x2x16xf32> to vector<2x16xf32>
    %744 = arith.mulf %731, %722 : vector<2x16xf32>
    %745 = arith.addf %743, %744 : vector<2x16xf32>
    %746 = math.tanh %745 : vector<2x16xf32>
    %cst_314 = arith.constant 1.000000e+00 : f32
    %747 = vector.broadcast %cst_314 : f32 to vector<2x16xf32>
    %748 = arith.subf %747, %740 : vector<2x16xf32>
    %749 = arith.mulf %748, %746 : vector<2x16xf32>
    %750 = arith.mulf %740, %666 : vector<2x16xf32>
    %751 = arith.addf %749, %750 : vector<2x16xf32>
    %cst_315 = arith.constant dense<0.000000e+00> : vector<2x16xf32>
    %752 = tpu.matmul %704, %100, %cst_315 {dimension_numbers = #tpu.dot_dimension_numbers<[1], [0], [0], [1], [0, 0, 1, 1], [], []>} : vector<2x16xf32>, vector<16x16xf32>, vector<2x16xf32> -> vector<2x16xf32>
    %753 = vector.broadcast %112 : vector<1x16xf32> to vector<2x16xf32>
    %754 = arith.addf %752, %753 : vector<2x16xf32>
    %cst_316 = arith.constant dense<0.000000e+00> : vector<2x16xf32>
    %755 = tpu.matmul %704, %102, %cst_316 {dimension_numbers = #tpu.dot_dimension_numbers<[1], [0], [0], [1], [0, 0, 1, 1], [], []>} : vector<2x16xf32>, vector<16x16xf32>, vector<2x16xf32> -> vector<2x16xf32>
    %756 = vector.broadcast %114 : vector<1x16xf32> to vector<2x16xf32>
    %757 = arith.addf %755, %756 : vector<2x16xf32>
    %cst_317 = arith.constant dense<0.000000e+00> : vector<2x16xf32>
    %758 = tpu.matmul %704, %104, %cst_317 {dimension_numbers = #tpu.dot_dimension_numbers<[1], [0], [0], [1], [0, 0, 1, 1], [], []>} : vector<2x16xf32>, vector<16x16xf32>, vector<2x16xf32> -> vector<2x16xf32>
    %759 = vector.broadcast %116 : vector<1x16xf32> to vector<2x16xf32>
    %760 = arith.addf %758, %759 : vector<2x16xf32>
    %761 = arith.index_cast %713 : i32 to index
    %c0_318 = arith.constant 0 : index
    %c0_319 = arith.constant 0 : index
    %762 = vector.load %arg25[%761, %c0_318, %c0_319] : memref<8x2x16xf32, #tpu.memory_space<vmem>>, vector<1x2x16xf32>
    %763 = vector.shape_cast %762 : vector<1x2x16xf32> to vector<2x16xf32>
    %764 = arith.addf %763, %754 : vector<2x16xf32>
    %765 = arith.negf %764 : vector<2x16xf32>
    %766 = math.exp %765 : vector<2x16xf32>
    %cst_320 = arith.constant 1.000000e+00 : f32
    %767 = vector.broadcast %cst_320 : f32 to vector<2x16xf32>
    %768 = arith.addf %767, %766 : vector<2x16xf32>
    %769 = arith.divf %767, %768 : vector<2x16xf32>
    %770 = arith.index_cast %713 : i32 to index
    %c0_321 = arith.constant 0 : index
    %c0_322 = arith.constant 0 : index
    %771 = vector.load %arg26[%770, %c0_321, %c0_322] : memref<8x2x16xf32, #tpu.memory_space<vmem>>, vector<1x2x16xf32>
    %772 = vector.shape_cast %771 : vector<1x2x16xf32> to vector<2x16xf32>
    %773 = arith.addf %772, %757 : vector<2x16xf32>
    %774 = arith.negf %773 : vector<2x16xf32>
    %775 = math.exp %774 : vector<2x16xf32>
    %cst_323 = arith.constant 1.000000e+00 : f32
    %776 = vector.broadcast %cst_323 : f32 to vector<2x16xf32>
    %777 = arith.addf %776, %775 : vector<2x16xf32>
    %778 = arith.divf %776, %777 : vector<2x16xf32>
    %779 = arith.index_cast %713 : i32 to index
    %c0_324 = arith.constant 0 : index
    %c0_325 = arith.constant 0 : index
    %780 = vector.load %arg27[%779, %c0_324, %c0_325] : memref<8x2x16xf32, #tpu.memory_space<vmem>>, vector<1x2x16xf32>
    %781 = vector.shape_cast %780 : vector<1x2x16xf32> to vector<2x16xf32>
    %782 = arith.mulf %769, %760 : vector<2x16xf32>
    %783 = arith.addf %781, %782 : vector<2x16xf32>
    %784 = math.tanh %783 : vector<2x16xf32>
    %cst_326 = arith.constant 1.000000e+00 : f32
    %785 = vector.broadcast %cst_326 : f32 to vector<2x16xf32>
    %786 = arith.subf %785, %778 : vector<2x16xf32>
    %787 = arith.mulf %786, %784 : vector<2x16xf32>
    %788 = arith.mulf %778, %704 : vector<2x16xf32>
    %789 = arith.addf %787, %788 : vector<2x16xf32>
    %790 = arith.index_cast %c7_i32_301 : i32 to index
    %c0_327 = arith.constant 0 : index
    %c0_328 = arith.constant 0 : index
    %791 = vector.load %arg28[%790, %c0_327, %c0_328] : memref<8x2x16xf32, #tpu.memory_space<vmem>>, vector<1x2x16xf32>
    %792 = vector.shape_cast %791 : vector<1x2x16xf32> to vector<2x16xf32>
    %793 = vector.shape_cast %751 : vector<2x16xf32> to vector<1x2x16xf32>
    tpu.vector_store %arg28[%790, %c0_327, %c0_328], %793 {strides = array<i32>} : memref<8x2x16xf32, #tpu.memory_space<vmem>>, vector<1x2x16xf32>,
    %794 = arith.index_cast %713 : i32 to index
    %c0_329 = arith.constant 0 : index
    %c0_330 = arith.constant 0 : index
    %795 = vector.load %arg29[%794, %c0_329, %c0_330] : memref<8x2x16xf32, #tpu.memory_space<vmem>>, vector<1x2x16xf32>
    %796 = vector.shape_cast %795 : vector<1x2x16xf32> to vector<2x16xf32>
    %797 = vector.shape_cast %789 : vector<2x16xf32> to vector<1x2x16xf32>
    tpu.vector_store %arg29[%794, %c0_329, %c0_330], %797 {strides = array<i32>} : memref<8x2x16xf32, #tpu.memory_space<vmem>>, vector<1x2x16xf32>,
    %c8_i32 = arith.constant 8 : i32
    %c0_331 = arith.constant 0 : index
    %c0_332 = arith.constant 0 : index
    %c0_333 = arith.constant 0 : index
    %798 = vector.load %arg28[%c0_331, %c0_332, %c0_333] : memref<8x2x16xf32, #tpu.memory_space<vmem>>, vector<8x2x16xf32>
    %799 = vector.shape_cast %798 : vector<8x2x16xf32> to vector<16x16xf32>
    %c0_334 = arith.constant 0 : index
    %c0_335 = arith.constant 0 : index
    %c0_336 = arith.constant 0 : index
    %800 = vector.load %arg29[%c0_334, %c0_335, %c0_336] : memref<8x2x16xf32, #tpu.memory_space<vmem>>, vector<8x2x16xf32>
    %801 = vector.shape_cast %800 : vector<8x2x16xf32> to vector<16x16xf32>
    %c0_337 = arith.constant 0 : index
    %c0_338 = arith.constant 0 : index
    %c0_339 = arith.constant 0 : index
    %802 = vector.load %arg16[%c0_337, %c0_338, %c0_339] : memref<2x16x3xf32, #tpu.memory_space<vmem>>, vector<1x16x3xf32>
    %803 = vector.shape_cast %802 : vector<1x16x3xf32> to vector<16x3xf32>
    %cst_340 = arith.constant dense<0.000000e+00> : vector<16x3xf32>
    %804 = tpu.matmul %799, %803, %cst_340 {dimension_numbers = #tpu.dot_dimension_numbers<[1], [0], [0], [1], [0, 0, 1, 1], [], []>} : vector<16x16xf32>, vector<16x3xf32>, vector<16x3xf32> -> vector<16x3xf32>
    %c1_341 = arith.constant 1 : index
    %c0_342 = arith.constant 0 : index
    %c0_343 = arith.constant 0 : index
    %805 = vector.load %arg16[%c1_341, %c0_342, %c0_343] : memref<2x16x3xf32, #tpu.memory_space<vmem>>, vector<1x16x3xf32>
    %806 = vector.shape_cast %805 : vector<1x16x3xf32> to vector<16x3xf32>
    %cst_344 = arith.constant dense<0.000000e+00> : vector<16x3xf32>
    %807 = tpu.matmul %801, %806, %cst_344 {dimension_numbers = #tpu.dot_dimension_numbers<[1], [0], [0], [1], [0, 0, 1, 1], [], []>} : vector<16x16xf32>, vector<16x3xf32>, vector<16x3xf32> -> vector<16x3xf32>
    %808 = arith.addf %804, %807 : vector<16x3xf32>
    %c0_345 = arith.constant 0 : index
    %c0_346 = arith.constant 0 : index
    %809 = vector.load %arg17[%c0_345, %c0_346] : memref<1x3xf32, #tpu.memory_space<vmem>>, vector<1x3xf32>
    %810 = vector.broadcast %809 : vector<1x3xf32> to vector<16x3xf32>
    %811 = arith.addf %808, %810 : vector<16x3xf32>
    %c0_347 = arith.constant 0 : index
    %c0_348 = arith.constant 0 : index
    %c0_349 = arith.constant 0 : index
    %812 = vector.load %arg18[%c0_347, %c0_348, %c0_349] : memref<2x16x3xf32, #tpu.memory_space<vmem>>, vector<1x16x3xf32>
    %813 = vector.shape_cast %812 : vector<1x16x3xf32> to vector<16x3xf32>
    %cst_350 = arith.constant dense<0.000000e+00> : vector<16x3xf32>
    %814 = tpu.matmul %799, %813, %cst_350 {dimension_numbers = #tpu.dot_dimension_numbers<[1], [0], [0], [1], [0, 0, 1, 1], [], []>} : vector<16x16xf32>, vector<16x3xf32>, vector<16x3xf32> -> vector<16x3xf32>
    %c1_351 = arith.constant 1 : index
    %c0_352 = arith.constant 0 : index
    %c0_353 = arith.constant 0 : index
    %815 = vector.load %arg18[%c1_351, %c0_352, %c0_353] : memref<2x16x3xf32, #tpu.memory_space<vmem>>, vector<1x16x3xf32>
    %816 = vector.shape_cast %815 : vector<1x16x3xf32> to vector<16x3xf32>
    %cst_354 = arith.constant dense<0.000000e+00> : vector<16x3xf32>
    %817 = tpu.matmul %801, %816, %cst_354 {dimension_numbers = #tpu.dot_dimension_numbers<[1], [0], [0], [1], [0, 0, 1, 1], [], []>} : vector<16x16xf32>, vector<16x3xf32>, vector<16x3xf32> -> vector<16x3xf32>
    %818 = arith.addf %814, %817 : vector<16x3xf32>
    %c0_355 = arith.constant 0 : index
    %c0_356 = arith.constant 0 : index
    %819 = vector.load %arg19[%c0_355, %c0_356] : memref<1x3xf32, #tpu.memory_space<vmem>>, vector<1x3xf32>
    %820 = vector.broadcast %819 : vector<1x3xf32> to vector<16x3xf32>
    %821 = arith.addf %818, %820 : vector<16x3xf32>
    %cst_357 = arith.constant 0.000000e+00 : f32
    %822 = vector.broadcast %cst_357 : f32 to vector<16x3xf32>
    %823 = arith.maximumf %821, %822 : vector<16x3xf32>
    %824 = vector.broadcast %cst_357 : f32 to vector<16x3xf32>
    %825 = arith.subf %821, %824 : vector<16x3xf32>
    %826 = arith.cmpf one, %825, %825 : vector<16x3xf32>
    %827 = vector.broadcast %cst_357 : f32 to vector<16x3xf32>
    %828 = arith.addf %821, %827 : vector<16x3xf32>
    %829 = math.absf %825 : vector<16x3xf32>
    %cst_358 = arith.constant 0.000000e+00 : f32
    %830 = vector.broadcast %cst_358 : f32 to vector<16x3xf32>
    %831 = arith.subf %830, %829 : vector<16x3xf32>
    %832 = math.exp %831 : vector<16x3xf32>
    %833 = math.log1p %832 : vector<16x3xf32>
    %834 = arith.addf %823, %833 : vector<16x3xf32>
    %835 = arith.select %826, %828, %834 : vector<16x3xi1>, vector<16x3xf32>
    %cst_359 = arith.constant 9.99999997E-7 : f32
    %836 = vector.broadcast %cst_359 : f32 to vector<16x3xf32>
    %837 = arith.addf %835, %836 : vector<16x3xf32>
    %838 = vector.shape_cast %811 : vector<16x3xf32> to vector<8x2x3xf32>
    %c0_360 = arith.constant 0 : index
    %c0_361 = arith.constant 0 : index
    %c0_362 = arith.constant 0 : index
    %839 = vector.load %arg30[%c0_360, %c0_361, %c0_362] : memref<8x2x3xf32, #tpu.memory_space<vmem>>, vector<8x2x3xf32>
    tpu.vector_store %arg30[%c0_360, %c0_361, %c0_362], %838 {strides = array<i32>} : memref<8x2x3xf32, #tpu.memory_space<vmem>>, vector<8x2x3xf32>,
    %840 = vector.shape_cast %837 : vector<16x3xf32> to vector<8x2x3xf32>
    %c0_363 = arith.constant 0 : index
    %c0_364 = arith.constant 0 : index
    %c0_365 = arith.constant 0 : index
    %841 = vector.load %arg31[%c0_363, %c0_364, %c0_365] : memref<8x2x3xf32, #tpu.memory_space<vmem>>, vector<8x2x3xf32>
    tpu.vector_store %arg31[%c0_363, %c0_364, %c0_365], %840 {strides = array<i32>} : memref<8x2x3xf32, #tpu.memory_space<vmem>>, vector<8x2x3xf32>,
    %c0_366 = arith.constant 0 : index
    %c0_367 = arith.constant 0 : index
    %c0_368 = arith.constant 0 : index
    %842 = vector.load %arg30[%c0_366, %c0_367, %c0_368] : memref<8x2x3xf32, #tpu.memory_space<vmem>>, vector<8x1x3xf32>
    %843 = vector.shape_cast %842 : vector<8x1x3xf32> to vector<8x3xf32>
    %c0_369 = arith.constant 0 : index
    %c0_370 = arith.constant 0 : index
    %c0_371 = arith.constant 0 : index
    %844 = vector.load %arg20[%c0_369, %c0_370, %c0_371] : memref<2x8x3xf32, #tpu.memory_space<vmem>>, vector<1x8x3xf32>
    %845 = vector.shape_cast %844 : vector<1x8x3xf32> to vector<8x3xf32>
    %846 = vector.shape_cast %843 : vector<8x3xf32> to vector<1x8x3xf32>
    tpu.vector_store %arg20[%c0_369, %c0_370, %c0_371], %846 {strides = array<i32>} : memref<2x8x3xf32, #tpu.memory_space<vmem>>, vector<1x8x3xf32>,
    %c0_372 = arith.constant 0 : index
    %c0_373 = arith.constant 0 : index
    %c0_374 = arith.constant 0 : index
    %847 = vector.load %arg31[%c0_372, %c0_373, %c0_374] : memref<8x2x3xf32, #tpu.memory_space<vmem>>, vector<8x1x3xf32>
    %848 = vector.shape_cast %847 : vector<8x1x3xf32> to vector<8x3xf32>
    %c0_375 = arith.constant 0 : index
    %c0_376 = arith.constant 0 : index
    %c0_377 = arith.constant 0 : index
    %849 = vector.load %arg21[%c0_375, %c0_376, %c0_377] : memref<2x8x3xf32, #tpu.memory_space<vmem>>, vector<1x8x3xf32>
    %850 = vector.shape_cast %849 : vector<1x8x3xf32> to vector<8x3xf32>
    %851 = vector.shape_cast %848 : vector<8x3xf32> to vector<1x8x3xf32>
    tpu.vector_store %arg21[%c0_375, %c0_376, %c0_377], %851 {strides = array<i32>} : memref<2x8x3xf32, #tpu.memory_space<vmem>>, vector<1x8x3xf32>,
    %c0_378 = arith.constant 0 : index
    %c1_379 = arith.constant 1 : index
    %c0_380 = arith.constant 0 : index
    %852 = vector.load %arg30[%c0_378, %c1_379, %c0_380] : memref<8x2x3xf32, #tpu.memory_space<vmem>>, vector<8x1x3xf32>
    %853 = vector.shape_cast %852 : vector<8x1x3xf32> to vector<8x3xf32>
    %c1_381 = arith.constant 1 : index
    %c0_382 = arith.constant 0 : index
    %c0_383 = arith.constant 0 : index
    %854 = vector.load %arg20[%c1_381, %c0_382, %c0_383] : memref<2x8x3xf32, #tpu.memory_space<vmem>>, vector<1x8x3xf32>
    %855 = vector.shape_cast %854 : vector<1x8x3xf32> to vector<8x3xf32>
    %856 = vector.shape_cast %853 : vector<8x3xf32> to vector<1x8x3xf32>
    tpu.vector_store %arg20[%c1_381, %c0_382, %c0_383], %856 {strides = array<i32>} : memref<2x8x3xf32, #tpu.memory_space<vmem>>, vector<1x8x3xf32>,
    %c0_384 = arith.constant 0 : index
    %c1_385 = arith.constant 1 : index
    %c0_386 = arith.constant 0 : index
    %857 = vector.load %arg31[%c0_384, %c1_385, %c0_386] : memref<8x2x3xf32, #tpu.memory_space<vmem>>, vector<8x1x3xf32>
    %858 = vector.shape_cast %857 : vector<8x1x3xf32> to vector<8x3xf32>
    %c1_387 = arith.constant 1 : index
    %c0_388 = arith.constant 0 : index
    %c0_389 = arith.constant 0 : index
    %859 = vector.load %arg21[%c1_387, %c0_388, %c0_389] : memref<2x8x3xf32, #tpu.memory_space<vmem>>, vector<1x8x3xf32>
    %860 = vector.shape_cast %859 : vector<1x8x3xf32> to vector<8x3xf32>
    %861 = vector.shape_cast %858 : vector<8x3xf32> to vector<1x8x3xf32>
    tpu.vector_store %arg21[%c1_387, %c0_388, %c0_389], %861 {strides = array<i32>} : memref<2x8x3xf32, #tpu.memory_space<vmem>>, vector<1x8x3xf32>,
    return
  }
  func.func @transform_0(%arg0: i32) -> (i32, i32, i32) {
    %c0_i32 = arith.constant 0 : i32
    %c0_i32_0 = arith.constant 0 : i32
    %c0_i32_1 = arith.constant 0 : i32
    return %arg0, %c0_i32, %c0_i32_0 : i32, i32, i32
  }
  func.func @transform_1(%arg0: i32) -> (i32, i32) {
    %c0_i32 = arith.constant 0 : i32
    %c0_i32_0 = arith.constant 0 : i32
    %c0_i32_1 = arith.constant 0 : i32
    return %c0_i32, %c0_i32_0 : i32, i32
  }
  func.func @transform_2(%arg0: i32) -> (i32, i32) {
    %c0_i32 = arith.constant 0 : i32
    %c0_i32_0 = arith.constant 0 : i32
    %c0_i32_1 = arith.constant 0 : i32
    return %c0_i32, %c0_i32_0 : i32, i32
  }
  func.func @transform_3(%arg0: i32) -> (i32, i32) {
    %c0_i32 = arith.constant 0 : i32
    %c0_i32_0 = arith.constant 0 : i32
    %c0_i32_1 = arith.constant 0 : i32
    return %c0_i32, %c0_i32_0 : i32, i32
  }
  func.func @transform_4(%arg0: i32) -> (i32, i32) {
    %c0_i32 = arith.constant 0 : i32
    %c0_i32_0 = arith.constant 0 : i32
    %c0_i32_1 = arith.constant 0 : i32
    return %c0_i32, %c0_i32_0 : i32, i32
  }
  func.func @transform_5(%arg0: i32) -> (i32, i32) {
    %c0_i32 = arith.constant 0 : i32
    %c0_i32_0 = arith.constant 0 : i32
    %c0_i32_1 = arith.constant 0 : i32
    return %c0_i32, %c0_i32_0 : i32, i32
  }
  func.func @transform_6(%arg0: i32) -> (i32, i32) {
    %c0_i32 = arith.constant 0 : i32
    %c0_i32_0 = arith.constant 0 : i32
    %c0_i32_1 = arith.constant 0 : i32
    return %c0_i32, %c0_i32_0 : i32, i32
  }
  func.func @transform_7(%arg0: i32) -> (i32, i32) {
    %c0_i32 = arith.constant 0 : i32
    %c0_i32_0 = arith.constant 0 : i32
    %c0_i32_1 = arith.constant 0 : i32
    return %c0_i32, %c0_i32_0 : i32, i32
  }
  func.func @transform_8(%arg0: i32) -> (i32, i32) {
    %c0_i32 = arith.constant 0 : i32
    %c0_i32_0 = arith.constant 0 : i32
    %c0_i32_1 = arith.constant 0 : i32
    return %c0_i32, %c0_i32_0 : i32, i32
  }
  func.func @transform_9(%arg0: i32) -> (i32, i32) {
    %c0_i32 = arith.constant 0 : i32
    %c0_i32_0 = arith.constant 0 : i32
    %c0_i32_1 = arith.constant 0 : i32
    return %c0_i32, %c0_i32_0 : i32, i32
  }
  func.func @transform_10(%arg0: i32) -> (i32, i32) {
    %c0_i32 = arith.constant 0 : i32
    %c0_i32_0 = arith.constant 0 : i32
    %c0_i32_1 = arith.constant 0 : i32
    return %c0_i32, %c0_i32_0 : i32, i32
  }
  func.func @transform_11(%arg0: i32) -> (i32, i32, i32) {
    %c0_i32 = arith.constant 0 : i32
    %c0_i32_0 = arith.constant 0 : i32
    %c0_i32_1 = arith.constant 0 : i32
    %c0_i32_2 = arith.constant 0 : i32
    return %c0_i32, %c0_i32_0, %c0_i32_1 : i32, i32, i32
  }
  func.func @transform_12(%arg0: i32) -> (i32, i32, i32) {
    %c0_i32 = arith.constant 0 : i32
    %c0_i32_0 = arith.constant 0 : i32
    %c0_i32_1 = arith.constant 0 : i32
    %c0_i32_2 = arith.constant 0 : i32
    return %c0_i32, %c0_i32_0, %c0_i32_1 : i32, i32, i32
  }
  func.func @transform_13(%arg0: i32) -> (i32, i32, i32) {
    %c0_i32 = arith.constant 0 : i32
    %c0_i32_0 = arith.constant 0 : i32
    %c0_i32_1 = arith.constant 0 : i32
    %c0_i32_2 = arith.constant 0 : i32
    return %c0_i32, %c0_i32_0, %c0_i32_1 : i32, i32, i32
  }
  func.func @transform_14(%arg0: i32) -> (i32, i32, i32) {
    %c0_i32 = arith.constant 0 : i32
    %c0_i32_0 = arith.constant 0 : i32
    %c0_i32_1 = arith.constant 0 : i32
    %c0_i32_2 = arith.constant 0 : i32
    return %c0_i32, %c0_i32_0, %c0_i32_1 : i32, i32, i32
  }
  func.func @transform_15(%arg0: i32) -> (i32, i32, i32) {
    %c0_i32 = arith.constant 0 : i32
    %c0_i32_0 = arith.constant 0 : i32
    %c0_i32_1 = arith.constant 0 : i32
    %c0_i32_2 = arith.constant 0 : i32
    return %c0_i32, %c0_i32_0, %c0_i32_1 : i32, i32, i32
  }
  func.func @transform_16(%arg0: i32) -> (i32, i32) {
    %c0_i32 = arith.constant 0 : i32
    %c0_i32_0 = arith.constant 0 : i32
    %c0_i32_1 = arith.constant 0 : i32
    return %c0_i32, %c0_i32_0 : i32, i32
  }
  func.func @transform_17(%arg0: i32) -> (i32, i32, i32) {
    %c0_i32 = arith.constant 0 : i32
    %c0_i32_0 = arith.constant 0 : i32
    %c0_i32_1 = arith.constant 0 : i32
    %c0_i32_2 = arith.constant 0 : i32
    return %c0_i32, %c0_i32_0, %c0_i32_1 : i32, i32, i32
  }
  func.func @transform_18(%arg0: i32) -> (i32, i32) {
    %c0_i32 = arith.constant 0 : i32
    %c0_i32_0 = arith.constant 0 : i32
    %c0_i32_1 = arith.constant 0 : i32
    return %c0_i32, %c0_i32_0 : i32, i32
  }
  func.func @transform_19(%arg0: i32) -> (i32, i32, i32) {
    %c0_i32 = arith.constant 0 : i32
    %c0_i32_0 = arith.constant 0 : i32
    %c0_i32_1 = arith.constant 0 : i32
    return %arg0, %c0_i32, %c0_i32_0 : i32, i32, i32
  }
  func.func @transform_20(%arg0: i32) -> (i32, i32, i32) {
    %c0_i32 = arith.constant 0 : i32
    %c0_i32_0 = arith.constant 0 : i32
    %c0_i32_1 = arith.constant 0 : i32
    return %arg0, %c0_i32, %c0_i32_0 : i32, i32, i32
  }
}

</mosaic_0001>

<bundles_post_ra>
// kernel: tpu_custom_call.1
= control target key start
LH: loop header
LB: loop body
LE: loop exit
PB: predicated region body
PF: predicated region fallthrough
CT: control target
= control target key end

     0   :  { %s8490_s0 = inlined_call_operand.vmem [shape: f32[2,8,6], index: 0, kind: input, shape index: {}]   ;;  %s8491_s1 = inlined_call_operand.hbm [shape: f32[6,16], index: 1, kind: input, shape index: {}]   ;;  %s8492_s2 = inlined_call_operand.hbm [shape: f32[1,16], index: 2, kind: input, shape index: {}]   ;;  %s8493_s3 = inlined_call_operand.hbm [shape: f32[16,16], index: 3, kind: input, shape index: {}]   ;;  %s8494_s4 = inlined_call_operand.hbm [shape: f32[1,16], index: 4, kind: input, shape index: {}]   ;;  %s8495_s5 = inlined_call_operand.vmem [shape: f32[16,12], index: 5, kind: input, shape index: {}]   ;;  %s8496_s6 = inlined_call_operand.hbm [shape: f32[1,12], index: 6, kind: input, shape index: {}]   ;;  %s8497_s7 = inlined_call_operand.hbm [shape: f32[12,48], index: 7, kind: input, shape index: {}]   ;;  %s8498_s8 = inlined_call_operand.hbm [shape: f32[1,48], index: 8, kind: input, shape index: {}]   ;;  %s8499_s9 = inlined_call_operand.hbm [shape: f32[12,48], index: 9, kind: input, shape index: {}]   ;;  %s8500_s10 = inlined_call_operand.hbm [shape: f32[1,48], index: 10, kind: input, shape index: {}]   ;;  %s8501_s11 = inlined_call_operand.vmem [shape: f32[3,16,16], index: 11, kind: input, shape index: {}]   ;;  %s8502_s12 = inlined_call_operand.hbm [shape: f32[3,1,16], index: 12, kind: input, shape index: {}]   ;;  %s8503_s13 = inlined_call_operand.vmem [shape: f32[3,16,16], index: 13, kind: input, shape index: {}]   ;;  %s8504_s14 = inlined_call_operand.vmem [shape: f32[3,1,16], index: 14, kind: input, shape index: {}]   ;;  %s8505_s15 = inlined_call_operand.vmem [shape: f32[2,16,3], index: 15, kind: input, shape index: {}]   ;;  %s8506_s16 = inlined_call_operand.vmem [shape: f32[1,3], index: 16, kind: input, shape index: {}]   ;;  %s8507_s17 = inlined_call_operand.vmem [shape: f32[2,16,3], index: 17, kind: input, shape index: {}]   ;;  %s8508_s18 = inlined_call_operand.vmem [shape: f32[1,3], index: 18, kind: input, shape index: {}]   ;;  %s8509_s19 = inlined_call_operand.vmem [shape: f32[2,8,3], index: 19, kind: output, shape index: {0}]   ;;  %s8510_s20 = inlined_call_operand.vmem [shape: f32[2,8,3], index: 20, kind: output, shape index: {1}]  }
   0x1   :  { %8512 = sst [smem:[#allocation34_spill]] %s8490_s0 }
   0x2   :  { %8513 = sst [smem:[#allocation35_spill]] %s8491_s1 }
   0x3   :  { %8514 = sst [smem:[#allocation36_spill]] %s8492_s2 }
   0x4   :  { %8515 = sst [smem:[#allocation37_spill]] %s8493_s3 }
   0x5   :  { %8516 = sst [smem:[#allocation38_spill]] %s8494_s4 }
   0x6   :  { %26 = vsyncpa [#allocation13], 0 }
   0x7   :  { %27 = vsyncpa [#allocation15], 0 }
   0x8   :  { %28 = vsyncpa [#allocation18], 0 }
   0x9   :  { %29 = vsyncpa [#allocation21], 0 }
   0xa   :  { %30 = vsyncpa [#allocation24], 0 }
   0xb   :  { %31 = vsyncpa [#allocation27], 0  ;;  %s7081_s1 = smov [#allocation14]   ;;  %s7082_s23 = smov [#allocation17]  }
   0xc   :  { %s50_s22 = sshll.u32 %s7081_s1, 4  ;;  %s72_s24 = sshll.u32 %s7082_s23, 4  ;;  %s51_s22 = int_to_ptr.vmem [resolvable:$true] %s50_s22  ;;  %s73_s24 = int_to_ptr.vmem [resolvable:$true] %s72_s24 }
   0xd   :  { %s6877_s2 = scalar_lea.vmem %s51_s22, 16  ;;  %s6881_s25 = scalar_lea.vmem %s51_s22, 32 }
   0xe   :  { %p6878_p0 = scmp.ne.s32.totalorder %s51_s22, %s6877_s2  ;;  %p6882_p1 = scmp.lt.s32.totalorder %s51_s22, %s51_s22 }
   0xf   :  { %p6883_p2 = scmp.lt.s32.totalorder %s6881_s25, %s6877_s2 }
  0x11   :  { %p6884_p3 = por %p6883_p2, %p6882_p1 }
  0x13   :  { %p6885_p4 = pnand %p6884_p3, %p6878_p0 }
  0x15   :  { %6888 = shalt.err (!%p6885_p4)
}
  0x16   :  { %s8517_s27 = sld [smem:[#allocation36_spill]]  ;;  %s6897_s28 = scalar_lea.vmem %s73_s24, 16 }
  0x17   :  { %p6898_p5 = scmp.ne.s32.totalorder %s73_s24, %s6897_s28  ;;  %s6901_s4 = scalar_lea.vmem %s73_s24, 32 }
  0x18   :  { %p6902_p6 = scmp.lt.s32.totalorder %s73_s24, %s73_s24  ;;  %p6903_p7 = scmp.lt.s32.totalorder %s6901_s4, %s6897_s28 }
  0x1a   :  { %p6904_p8 = por %p6903_p7, %p6902_p6 }
  0x1c   :  { %53 = dma.hbm_to_vmem [thread:$0]  %s8517_s27, 16, %s51_s22, [#allocation15]  }
  0x1d   :  { %p6905_p9 = pnand %p6904_p8, %p6898_p5 }
  0x1f   :  { %6908 = shalt.err (!%p6905_p9)
}
  0x20   :  { %s8518_s0 = sld [smem:[#allocation38_spill]]  ;;  %s7083_s21 = smov [#allocation20]  }
  0x21   :  { %s93_s1 = sshll.u32 %s7083_s21, 4  ;;  %s7084_s23 = smov [#allocation23]   ;;  %s94_s1 = int_to_ptr.vmem [resolvable:$true] %s93_s1 }
  0x22   :  { %s115_s2 = sshll.u32 %s7084_s23, 4  ;;  %s6917_s25 = scalar_lea.vmem %s94_s1, 256  ;;  %s116_s2 = int_to_ptr.vmem [resolvable:$true] %s115_s2 }
  0x23   :  { %p6918_p10 = scmp.ne.s32.totalorder %s94_s1, %s6917_s25  ;;  %p6922_p11 = scmp.lt.s32.totalorder %s94_s1, %s94_s1 }
  0x24   :  { %p6923_p12 = scmp.lt.s32.totalorder %s6917_s25, %s6917_s25 }
  0x26   :  { %75 = dma.hbm_to_vmem [thread:$0]  %s8518_s0, 16, %s73_s24, [#allocation18]  }
  0x27   :  { %p6924_p13 = por %p6923_p12, %p6922_p11 }
  0x29   :  { %p6925_p0 = pnand %p6924_p13, %p6918_p10 }
  0x2b   :  { %6928 = shalt.err (!%p6925_p0)
}
  0x2c   :  { %s7085_s22 = smov 128   ;;  %s7086_s3 = smov 8  }
  0x2d   :  { %99 = dma.hbm_to_vmem [thread:$0]  %s8497_s7, 256, %s94_s1, [#allocation21], %s7085_s22, %s7085_s22, %s7086_s3  }
  0x2e   :  { %s6937_s27 = scalar_lea.vmem %s116_s2, 256  ;;  %p6942_p2 = scmp.lt.s32.totalorder %s116_s2, %s116_s2 }
  0x2f   :  { %p6938_p1 = scmp.ne.s32.totalorder %s116_s2, %s6937_s27  ;;  %p6943_p3 = scmp.lt.s32.totalorder %s6937_s27, %s6937_s27 }
  0x31   :  { %p6944_p4 = por %p6943_p3, %p6942_p2 }
  0x33   :  { %p6945_p5 = pnand %p6944_p4, %p6938_p1 }
  0x35   :  { %6948 = shalt.err (!%p6945_p5)
}
  0x36   :  { %121 = dma.hbm_to_vmem [thread:$0]  %s8499_s9, 256, %s116_s2, [#allocation24], %s7085_s22, %s7085_s22, %s7086_s3  }
  0x37   :  { %s7087_s29 = smov [#allocation12]   ;;  %s7088_s0 = smov [#allocation16]  }
  0x38   :  { %s40_s30 = sshll.u32 %s7087_s29, 4  ;;  %s59_s21 = sshll.u32 %s7088_s0, 4  ;;  %s41_s30 = int_to_ptr.vmem [resolvable:$true] %s40_s30  ;;  %s60_s21 = int_to_ptr.vmem [resolvable:$true] %s59_s21 }
  0x39   :  { %s6957_s7 = scalar_lea.vmem %s41_s30, 128  ;;  %p6962_p7 = scmp.lt.s32.totalorder %s41_s30, %s41_s30 }
  0x3a   :  { %p6958_p6 = scmp.ne.s32.totalorder %s41_s30, %s6957_s7  ;;  %p6963_p8 = scmp.lt.s32.totalorder %s6957_s7, %s6957_s7 }
  0x3c   :  { %p6964_p9 = por %p6963_p8, %p6962_p7 }
  0x3e   :  { %p6965_p10 = pnand %p6964_p9, %p6958_p6 }
  0x40   :  { %6968 = shalt.err (!%p6965_p10)
}
  0x41   :  { %s8519_s25 = sld [smem:[#allocation35_spill]]  ;;  %s6977_s26 = scalar_lea.vmem %s60_s21, 256 }
  0x42   :  { %p6978_p11 = scmp.ne.s32.totalorder %s60_s21, %s6977_s26  ;;  %p6982_p12 = scmp.lt.s32.totalorder %s60_s21, %s60_s21 }
  0x43   :  { %p6983_p13 = scmp.lt.s32.totalorder %s6977_s26, %s6977_s26 }
  0x45   :  { %p6984_p0 = por %p6983_p13, %p6982_p12 }
  0x47   :  { %43 = dma.hbm_to_vmem [thread:$0]  %s8519_s25, 128, %s41_s30, [#allocation13]  }
  0x48   :  { %p6985_p1 = pnand %p6984_p0, %p6978_p11 }
  0x4a   :  { %6988 = shalt.err (!%p6985_p1)
}
  0x4b   :  { %s8520_s24 = sld [smem:[#allocation37_spill]]  ;;  %s7089_s27 = smov [#allocation19]  }
  0x4c   :  { %s84_s28 = sshll.u32 %s7089_s27, 4  ;;  %s7090_s4 = smov [#allocation22]   ;;  %s85_s28 = int_to_ptr.vmem [resolvable:$true] %s84_s28 }
  0x4d   :  { %s106_s29 = sshll.u32 %s7090_s4, 4  ;;  %s6997_s30 = scalar_lea.vmem %s85_s28, 16  ;;  %s107_s29 = int_to_ptr.vmem [resolvable:$true] %s106_s29 }
  0x4e   :  { %p6998_p2 = scmp.ne.s32.totalorder %s85_s28, %s6997_s30  ;;  %s7001_s0 = scalar_lea.vmem %s85_s28, 32 }
  0x4f   :  { %p7002_p3 = scmp.lt.s32.totalorder %s85_s28, %s85_s28  ;;  %p7003_p4 = scmp.lt.s32.totalorder %s7001_s0, %s6997_s30 }
  0x51   :  { %65 = dma.hbm_to_vmem [thread:$0]  %s8520_s24, 256, %s60_s21, [#allocation15], %s7085_s22, %s7085_s22, %s7086_s3  }
  0x52   :  { %p7004_p5 = por %p7003_p4, %p7002_p3 }
  0x54   :  { %p7005_p6 = pnand %p7004_p5, %p6998_p2 }
  0x56   :  { %7008 = shalt.err (!%p7005_p6)
}
  0x57   :  { %87 = dma.hbm_to_vmem [thread:$0]  %s8496_s6, 16, %s85_s28, [#allocation18]  }
  0x58   :  { %s7017_s23 = scalar_lea.vmem %s107_s29, 16  ;;  %s7021_s22 = scalar_lea.vmem %s107_s29, 32 }
  0x59   :  { %p7018_p7 = scmp.ne.s32.totalorder %s107_s29, %s7017_s23  ;;  %p7022_p8 = scmp.lt.s32.totalorder %s107_s29, %s107_s29 }
  0x5a   :  { %p7023_p9 = scmp.lt.s32.totalorder %s7021_s22, %s7017_s23 }
  0x5c   :  { %p7024_p10 = por %p7023_p9, %p7022_p8 }
  0x5e   :  { %p7025_p11 = pnand %p7024_p10, %p7018_p7 }
  0x60   :  { %7028 = shalt.err (!%p7025_p11)
}
  0x61   :  { %109 = dma.hbm_to_vmem [thread:$0]  %s8498_s8, 16, %s107_s29, [#allocation21]  }
  0x62   :  { %s7091_s25 = smov [#allocation25]   ;;  %s7092_s9 = smov [#allocation26]  }
  0x63   :  { %s128_s26 = sshll.u32 %s7091_s25, 4  ;;  %s139_s2 = sshll.u32 %s7092_s9, 4  ;;  %s129_s26 = int_to_ptr.vmem [resolvable:$true] %s128_s26  ;;  %s140_s2 = int_to_ptr.vmem [resolvable:$true] %s139_s2 }
  0x64   :  { %s7037_s24 = scalar_lea.vmem %s129_s26, 16  ;;  %s7041_s6 = scalar_lea.vmem %s129_s26, 32 }
  0x65   :  { %p7038_p12 = scmp.ne.s32.totalorder %s129_s26, %s7037_s24  ;;  %p7042_p13 = scmp.lt.s32.totalorder %s129_s26, %s129_s26 }
  0x66   :  { %p7043_p0 = scmp.lt.s32.totalorder %s7041_s6, %s7037_s24 }
  0x68   :  { %p7044_p1 = por %p7043_p0, %p7042_p13 }
  0x6a   :  { %p7045_p2 = pnand %p7044_p1, %p7038_p12 }
  0x6c   :  { %7048 = shalt.err (!%p7045_p2)
}
  0x6d   :  { %131 = dma.hbm_to_vmem [thread:$0]  %s8500_s10, 16, %s129_s26, [#allocation24]  }
  0x6e   :  { %s7057_s4 = scalar_lea.vmem %s140_s2, 48  ;;  %s7061_s8 = scalar_lea.vmem %s140_s2, 64 }
  0x6f   :  { %p7058_p3 = scmp.ne.s32.totalorder %s140_s2, %s7057_s4  ;;  %p7062_p4 = scmp.lt.s32.totalorder %s140_s2, %s140_s2 }
  0x70   :  { %p7063_p5 = scmp.lt.s32.totalorder %s7061_s8, %s7057_s4 }
  0x72   :  { %p7064_p6 = por %p7063_p5, %p7062_p4 }
  0x74   :  { %p7065_p7 = pnand %p7064_p6, %p7058_p3 }
  0x76   :  { %7068 = shalt.err (!%p7065_p7)
}
  0x77   :  { %s7093_s29 = smov 16   ;;  %s7094_s30 = smov 1  }
  0x78   :  { %145 = dma.hbm_to_vmem [thread:$0]  %s8502_s12, 48, %s140_s2, [#allocation27], %s7093_s29, %s7093_s29, %s7094_s30  }
  0x79   :  { %7069 = dma.done.wait [#allocation13], 128  }
  0x7a   :  { %7070 = vsyncadd [#allocation13], 4294967168 }
  0x7b   :  { %7071 = dma.done.wait [#allocation15], 272  }
  0x7c   :  { %7072 = vsyncadd [#allocation15], 4294967024 }
  0x7d   :  { %7073 = dma.done.wait [#allocation18], 32  }
  0x7e   :  { %7074 = vsyncadd [#allocation18], 4294967264 }
  0x7f   :  { %7075 = dma.done.wait [#allocation21], 272  }
  0x80   :  { %7076 = vsyncadd [#allocation21], 4294967024 }
  0x81   :  { %7077 = dma.done.wait [#allocation24], 272  }
  0x82   :  { %7078 = vsyncadd [#allocation24], 4294967024 }
  0x83   :  { %7079 = dma.done.wait [#allocation27], 48  }
  0x84   :  { %7080 = vsyncadd [#allocation27], 4294967248  ;;  %vm205_vm0 = vcmask 1045504   ;;  %vm198_vm1 = vcmask 48128   ;;  %v190_v0 = vld [vmem:[#allocation12] sm:$0x3f]  ;;  %v656_v45 = vlaneseq }
  0x85   :  { %s8521_s23 = sld [smem:[#allocation34_spill]]  ;;  %6258 = vmatprep.subr.msk.mxu0 %vm205_vm0, %v190_v0  ;;  %v287_v3 = vld [vmem:[#allocation16 + $0x8] sm:$0xff]  ;;  %v286_v4 = vld [vmem:[#allocation16] sm:$0xff]  ;;  %v5955_v5 = vld [vmem:[#allocation14] ss:$0 sm:$0xff]  ;;  %vm295_vm2 = vcmask 130048  }
  0x86   :  { %6259 = vmatpush3.msk.msra.mxu0 %vm205_vm0, %v190_v0  ;;  %6263 = vmatprep.subr.mxu1 %v287_v3  ;;  %v380_v12 = vld [vmem:[%s8495_s5 + $0x8] sm:$0xff]  ;;  %v379_v13 = vld [vmem:[%s8495_s5] sm:$0xff]  ;;  %v5959_v14 = vld [vmem:[#allocation17] ss:$0 sm:$0xff]  ;;  %vm485_vm3 = vcmask 1043456   ;;  %v7095_v25 = vmov 0.0  }
  0x87   :  { %6264 = vmatpush3.msra.mxu1 %v287_v3  ;;  %6270 = vmatprep.subr.mxu0 %v380_v12  ;;  %v565_v21 = vld [vmem:[#allocation23 + $0x8] sm:$0xf]  ;;  %v470_v22 = vld [vmem:[#allocation20 + $0x8] sm:$0xf]  ;;  %v564_v23 = vld [vmem:[#allocation23] sm:$0xff]  ;;  %vm478_vm4 = vcmask 97280  }
  0x88   :  { %6265 = vmatprep.subr.mxu1 %v286_v4  ;;  %v469_v24 = vld [vmem:[#allocation20] sm:$0xff]  ;;  %v5962_v27 = vld [vmem:[#allocation19] ss:$0 sm:$0xff]  ;;  %v7266_v31 = vld [vmem:[%s8501_s11 + $0x8] sm:$0xff]  ;;  %vm7096_vm5 = vmmov 0   ;;  %v7377_v47 = vshrl.u32 %v656_v45, 7 }
  0x89   :  { %6266 = vmatpush3.msra.mxu1 %v286_v4  ;;  %v7271_v32 = vld [vmem:[%s8501_s11 + $0x18] sm:$0xff]  ;;  %v7276_v33 = vld [vmem:[%s8501_s11] sm:$0xff]  ;;  %v7284_v34 = vld [vmem:[%s8501_s11 + $0x10] sm:$0xff]  ;;  %v7097_v43 = vmov 1966171168   ;;  %vm709_vm6 = vcmask 122880  }
  0x8a   :  { %6277 = vmatprep.subr.msk.mxu1 %vm485_vm3, %v470_v22  ;;  %v7295_v35 = vld [vmem:[%s8503_s13 + $0x8] sm:$0xff]  ;;  %v7309_v37 = vld [vmem:[%s8503_s13] sm:$0xff]  ;;  %v7344_v41 = vld [vmem:[%s8503_s13 + $0x18] sm:$0xff]  ;;  %v654_v44 = vunpack.c.l.s4 %v7097_v43  ;;  %s7098_s2 = smov 112   ;;  %s7099_s27 = smov 96   ;;  %vm1836_vm7 = vcmask 123904  }
  0x8b   :  { %v188_v1 = vld [vmem:[%s8521_s23] sm:$0xff]  ;;  %v189_v2 = vld [vmem:[%s8521_s23 + $0x8] sm:$0xff]  ;;  %v7354_v42 = vld [vmem:[%s8503_s13 + $0x10] sm:$0xff]  ;;  %vm5742_vm8 = vcmask 17408   ;;  %vm5820_vm9 = vcmask 1041409   ;;  %vm5823_vm10 = vcmask 1042434  }
  0x8c   :  { %6260 = vmatprep.mubr.msk.f32.mxu0 %vm198_vm1, %v188_v1  ;;  %v7303_v36 = vld [vmem:[%s8501_s11 + $0x28] sm:$0xff]  ;;  %v7318_v38 = vld [vmem:[%s8501_s11 + $0x20] sm:$0xff]  ;;  %v655_v46 = vunpack.c.0.s8 %v654_v44  ;;  %vm5826_vm11 = vcmask 1043459   ;;  %vm5829_vm12 = vcmask 1044484   ;;  %vm5832_vm13 = vcmask 1045509  }
  0x8d   :  { %6261 = vmatmul.mubr.msk.f32.vlgmr.msra.gmra.mxu0 %vm198_vm1, %v189_v2  ;;  %v7327_v39 = vld [vmem:[%s8503_s13 + $0x28] sm:$0xff]  ;;  %v7337_v40 = vld [vmem:[%s8503_s13 + $0x20] sm:$0xff]  ;;  %vm5835_vm14 = vcmask 1046534   ;;  %vm5838_vm15 = vcmask 1047559   ;;  %vm5841_vm0 = vcmask 23552  }
  0x8e   :  { %6271 = vmatpush3.msra.mxu0 %v380_v12  ;;  %v5965_v48 = vld [vmem:[#allocation22] ss:$0 sm:$0xff]  ;;  %v5969_v49 = vld [vmem:[#allocation25] ss:$0 sm:$0xff]  ;;  %v7380_v50 = vsub.s32 %v655_v46, %v7377_v47  ;;  %v7451_v44 = vld [vmem:[#allocation26] ss:$0 sm:$0xff] }
  0x8f   :  { %6272 = vmatprep.subr.mxu0 %v379_v13 }
  0x90   :  { %6273 = vmatpush3.msra.mxu0 %v379_v13 }
  0x91   :  { %6284 = vmatprep.subr.msk.mxu0 %vm485_vm3, %v565_v21 }
 0x14d   :  { %v6262_v6 = vpop.f32.mrf.mxu0 }
 0x14e   :  { %v281_v7 = vadd.f32 %v6262_v6, %v5955_v5 }
 0x14f   :  { %v275_v8 = vpop.f32.mrf.mxu0 }
 0x150   :  { %v276_v9 = vadd.f32 %v5955_v5, %v275_v8  ;;  %v285_v11 = vmax.f32 %v281_v7, 0.0 }
 0x152   :  { %v284_v10 = vmax.f32 %v276_v9, 0.0 }
 0x154   :  { %6267 = vmatprep.mubr.msk.f32.mxu1 %vm295_vm2, %v284_v10 }
 0x155   :  { %6268 = vmatmul.mubr.msk.f32.vlgmr.msra.gmra.mxu1 %vm295_vm2, %v285_v11 }
 0x156   :  { %6278 = vmatpush3.msk.msra.mxu1 %vm485_vm3, %v470_v22  ;;  %v7424_v22 = vsub.s32 0, %v7377_v47 }
 0x157   :  { %6279 = vmatprep.subr.mxu1 %v469_v24 }
 0x158   :  { %6280 = vmatpush3.msra.mxu1 %v469_v24 }
 0x159   :  { %6291 = vmatprep.subr.mxu1 %v7095_v25 }
 0x215   :  { %v6269_v15 = vpop.f32.mrf.mxu1 }
 0x216   :  { %v374_v16 = vadd.f32 %v6269_v15, %v5959_v14 }
 0x217   :  { %v368_v17 = vpop.f32.mrf.mxu1 }
 0x218   :  { %v369_v18 = vadd.f32 %v5959_v14, %v368_v17  ;;  %v378_v20 = vmax.f32 %v374_v16, 0.0 }
 0x21a   :  { %v377_v19 = vmax.f32 %v369_v18, 0.0 }
 0x21c   :  { %6274 = vmatprep.mubr.msk.f32.mxu0 %vm295_vm2, %v377_v19 }
 0x21d   :  { %6275 = vmatmul.mubr.msk.f32.vlgmr.msra.gmra.mxu0 %vm295_vm2, %v378_v20 }
 0x21e   :  { %6285 = vmatpush3.msk.msra.mxu0 %vm485_vm3, %v565_v21 }
 0x21f   :  { %6286 = vmatprep.subr.mxu0 %v564_v23 }
 0x220   :  { %6287 = vmatpush3.msra.mxu0 %v564_v23 }
 0x221   :  { %6298 = vmatprep.subr.mxu0 %v7095_v25 }
 0x2dd   :  { %v6276_v26 = vpop.f32.mrf.mxu0 }
 0x2de   :  { %v466_v30 = vadd.f32 %v6276_v26, %v5962_v27 }
 0x2df   :  { %v460_v28 = vpop.f32.mrf.mxu0 }
 0x2e0   :  { %v461_v29 = vadd.f32 %v5962_v27, %v460_v28 }
 0x2e2   :  { %6281 = vmatprep.mubr.msk.f32.mxu1 %vm478_vm4, %v461_v29  ;;  %6288 = vmatprep.mubr.msk.f32.mxu0 %vm478_vm4, %v461_v29 }
 0x2e3   :  { %6282 = vmatmul.mubr.msk.f32.vlgmr.msra.gmra.mxu1 %vm478_vm4, %v466_v30  ;;  %6289 = vmatmul.mubr.msk.f32.vlgmr.msra.gmra.mxu0 %vm478_vm4, %v466_v30 }
 0x2e4   :  { %6292 = vmatpush3.msra.mxu1 %v7266_v31  ;;  %6295 = vmatprep.mubr.msk.f32.mxu1 %vm7096_vm5, %v7095_v25 }
 0x2e5   :  { %6293 = vmatprep.subr.mxu1 %v7095_v25  ;;  %6299 = vmatpush3.msra.mxu0 %v7271_v32 }
 0x2e6   :  { %6294 = vmatpush3.msra.mxu1 %v7276_v33  ;;  %6300 = vmatprep.subr.mxu0 %v7095_v25 }
 0x2e7   :  { %6296 = vmatmul.mubr.f32.vlgmr.msra.gmra.mxu1 %v7095_v25  ;;  %6301 = vmatpush3.msra.mxu0 %v7284_v34 }
 0x2e8   :  { %6302 = vmatprep.mubr.msk.f32.mxu0 %vm7096_vm5, %v7095_v25  ;;  %6312 = vmatprep.subr.mxu0 %v7095_v25 }
 0x2e9   :  { %6303 = vmatmul.mubr.f32.vlgmr.msra.gmra.mxu0 %v7095_v25  ;;  %6305 = vmatprep.subr.mxu1 %v7095_v25 }
 0x2ea   :  { %6313 = vmatpush3.msra.mxu0 %v7295_v35  ;;  %6316 = vmatprep.mubr.msk.f32.mxu0 %vm7096_vm5, %v7095_v25 }
 0x2eb   :  { %6314 = vmatprep.subr.mxu0 %v7095_v25  ;;  %6306 = vmatpush3.msra.mxu1 %v7303_v36 }
 0x2ec   :  { %6315 = vmatpush3.msra.mxu0 %v7309_v37  ;;  %6307 = vmatprep.subr.mxu1 %v7095_v25 }
 0x2ed   :  { %6317 = vmatmul.mubr.f32.vlgmr.msra.gmra.mxu0 %v7095_v25  ;;  %6308 = vmatpush3.msra.mxu1 %v7318_v38 }
 0x2ee   :  { %6309 = vmatprep.mubr.msk.f32.mxu1 %vm7096_vm5, %v7095_v25  ;;  %6326 = vmatprep.subr.mxu0 %v7095_v25 }
 0x2ef   :  { %6310 = vmatmul.mubr.f32.vlgmr.msra.gmra.mxu1 %v7095_v25  ;;  %6327 = vmatpush3.msra.mxu0 %v7327_v39 }
 0x2f0   :  { %6328 = vmatprep.subr.mxu0 %v7095_v25  ;;  %6330 = vmatprep.mubr.msk.f32.mxu0 %vm7096_vm5, %v7095_v25 }
 0x2f1   :  { %6329 = vmatpush3.msra.mxu0 %v7337_v40  ;;  %6319 = vmatprep.subr.mxu1 %v7095_v25 }
 0x2f2   :  { %6331 = vmatmul.mubr.f32.vlgmr.msra.gmra.mxu0 %v7095_v25  ;;  %6320 = vmatpush3.msra.mxu1 %v7344_v41 }
 0x2f3   :  { %6321 = vmatprep.subr.mxu1 %v7095_v25  ;;  %6323 = vmatprep.mubr.msk.f32.mxu1 %vm7096_vm5, %v7095_v25 }
 0x2f4   :  { %6322 = vmatpush3.msra.mxu1 %v7354_v42  ;;  %6340 = vmatprep.subr.mxu0 %v7095_v25 }
 0x2f5   :  { %6324 = vmatmul.mubr.f32.vlgmr.msra.gmra.mxu1 %v7095_v25  ;;  %6333 = vmatprep.subr.mxu1 %v7095_v25 }
 0x2f6   :  { %6334 = vmatpush3.msra.mxu1 %v7266_v31  ;;  %6341 = vmatpush3.msra.mxu0 %v7271_v32 }
 0x2f7   :  { %6335 = vmatprep.subr.mxu1 %v7095_v25  ;;  %6342 = vmatprep.subr.mxu0 %v7095_v25 }
 0x2f8   :  { %6336 = vmatpush3.msra.mxu1 %v7276_v33  ;;  %6337 = vmatprep.mubr.msk.f32.mxu1 %vm7096_vm5, %v7095_v25 }
 0x2f9   :  { %6343 = vmatpush3.msra.mxu0 %v7284_v34  ;;  %6344 = vmatprep.mubr.msk.f32.mxu0 %vm7096_vm5, %v7095_v25 }
 0x2fa   :  { %6347 = vmatprep.subr.mxu1 %v7095_v25  ;;  %6354 = vmatprep.subr.mxu0 %v7095_v25 }
 0x3a3   :  { %v6283_v51 = vpop.f32.mrf.mxu1  ;;  %v6290_v52 = vpop.f32.mrf.mxu0 }
 0x3a4   :  { %v561_v53 = vadd.f32 %v6283_v51, %v5965_v48  ;;  %v648_v54 = vadd.f32 %v6290_v52, %v5969_v49 }
 0x3a5   :  { %v555_v55 = vpop.f32.mrf.mxu1  ;;  %v642_v56 = vpop.f32.mrf.mxu0 }
 0x3a6   :  { %v977_v57 = vcombine.high %v561_v53, %v561_v53  ;;  %v984_v58 = vrot.slane %v561_v53, %v7380_v50  ;;  %v1139_v59 = vcombine.high %v648_v54, %v648_v54  ;;  %v1146_v60 = vrot.slane %v648_v54, %v7380_v50 }
 0x3a7   :  { %v556_v61 = vadd.f32 %v5965_v48, %v555_v55  ;;  %v643_v62 = vadd.f32 %v5969_v49, %v642_v56  ;;  %v1401_v63 = vpop.f32.mrf.mxu1 }
 0x3a8   :  { %v7385_v0 = vrot.slane %v977_v57, %v7380_v50  ;;  %v992_v1 = vcombine.high %v984_v58, %v984_v58  ;;  %v1000_v2 = vrot.slane %v984_v58, %v7380_v50  ;;  %v1153_v3 = vrot.slane %v1139_v59, %v7380_v50 }
 0x3a9   :  { %v1154_v4 = vcombine.high %v1146_v60, %v1146_v60  ;;  %v7390_v5 = vrot.slane %v1146_v60, %v7380_v50  ;;  %v652_v6 = vcombine.high %v556_v61, %v556_v61  ;;  %v659_v7 = vrot.slane %v556_v61, %v7380_v50  ;;  %v7393_v8 = vpop.f32.mrf.mxu0  ;;  %v6297_v9 = vpop.f32.mrf.mxu1 }
 0x3aa   :  { %v7397_v10 = vrot.slane %v7385_v0, %v7380_v50  ;;  %v7400_v11 = vrot.slane %v992_v1, %v7380_v50  ;;  %1034 = vst.msk [vmem:[#allocation2 + $0x1] sm:$0x1] %vm709_vm6, %v1000_v2  ;;  %v1155_v12 = vcombine.high %v1153_v3, %v1153_v3  ;;  %v7404_v13 = vrot.slane %v1153_v3, %v7380_v50 }
 0x3ab   :  { %v7407_v14 = vrot.slane %v1154_v4, %v7380_v50  ;;  %1196 = vst.msk [vmem:[#allocation5 + $0x1] sm:$0x1] %vm709_vm6, %v7390_v5  ;;  %v7412_v15 = vrot.slane %v652_v6, %v7380_v50  ;;  %v667_v16 = vcombine.high %v659_v7, %v659_v7  ;;  %v6304_v17 = vpop.f32.mrf.mxu0  ;;  %v675_v19 = vrot.slane %v659_v7, %v7380_v50 }
 0x3ac   :  { %1035 = vst.msk [vmem:[#allocation2 + $0x3] sm:$0x1] %vm709_vm6, %v7400_v11  ;;  %1038 = vst.msk [vmem:[#allocation2 + $0x9] sm:$0x1] %vm709_vm6, %v7397_v10  ;;  %v7419_v18 = vrot.slane %v1155_v12, %v7380_v50  ;;  %v815_v20 = vcombine.high %v643_v62, %v643_v62  ;;  %v822_v21 = vrot.slane %v643_v62, %v7380_v50 }
 0x3ad   :  { %1197 = vst.msk [vmem:[#allocation5 + $0x3] sm:$0x1] %vm709_vm6, %v7407_v14  ;;  %1200 = vst.msk [vmem:[#allocation5 + $0x9] sm:$0x1] %vm709_vm6, %v7404_v13  ;;  %v7432_v23 = vrot.slane %v7412_v15, %v7380_v50  ;;  %v7435_v24 = vrot.slane %v667_v16, %v7380_v50  ;;  %v1653_v26 = vpop.f32.mrf.mxu0  ;;  %v721_v43 = vrot.slane %v675_v19, %v7424_v22 }
 0x3ae   :  { %v1187_v27 = vcombine.high %v7419_v18, %v7419_v18  ;;  %1201 = vst.msk [vmem:[#allocation5 + $0xb] sm:$0x1] %vm709_vm6, %v7419_v18  ;;  %710 = vst.msk [vmem:[#allocation2] sm:$0x1] %vm709_vm6, %v675_v19  ;;  %v829_v28 = vrot.slane %v815_v20, %v7380_v50  ;;  %v830_v29 = vcombine.high %v822_v21, %v822_v21 }
 0x3af   :  { %v7444_v30 = vrot.slane %v822_v21, %v7380_v50  ;;  %711 = vst.msk [vmem:[#allocation2 + $0x2] sm:$0x1] %vm709_vm6, %v7435_v24  ;;  %714 = vst.msk [vmem:[#allocation2 + $0x8] sm:$0x1] %vm709_vm6, %v7432_v23  ;;  %v7453_v45 = vpop.f32.mrf.mxu1  ;;  %v6318_v46 = vpop.f32.mrf.mxu0  ;;  %750 = vrot.lane.b32.xlu0 %v721_v43, %s7098_s2  ;;  %v7465_v52 = vcombine.high %v7404_v13, %v7404_v13  ;;  %v7467_v53 = vcombine.high %v675_v19, %v675_v19 }
 0x3b0   :  { %1203 = vst.msk [vmem:[#allocation5 + $0xf] sm:$0x1] %vm709_vm6, %v1187_v27  ;;  %v831_v48 = vcombine.high %v829_v28, %v829_v28  ;;  %v7457_v49 = vrot.slane %v829_v28, %v7380_v50  ;;  %v852_v51 = vrot.slane %v830_v29, %v7380_v50  ;;  %v1402_v55 = vadd.f32 %v7451_v44, %v1401_v63  ;;  %v7500_v63 = vld [vmem:[%s8504_s14] ss:$0 sm:$0xff] }
 0x3b1   :  { %872 = vst.msk [vmem:[#allocation5] sm:$0x1] %vm709_vm6, %v7444_v30  ;;  %v6311_v54 = vpop.f32.mrf.mxu1  ;;  %v7480_v58 = vcombine.high %v1000_v2, %v1000_v2  ;;  %v7485_v60 = vrot.slane %v1000_v2, %v7424_v22  ;;  %1202 = vst.msk [vmem:[#allocation5 + $0xd] sm:$0x1] %vm709_vm6, %v7465_v52  ;;  %v668_v61 = vcombine.high %v7412_v15, %v7412_v15 }
 0x3b2   :  { %873 = vst.msk [vmem:[#allocation5 + $0x2] sm:$0x1] %vm709_vm6, %v852_v51  ;;  %876 = vst.msk [vmem:[#allocation5 + $0x8] sm:$0x1] %vm709_vm6, %v7457_v49  ;;  %v7474_v56 = vrot.slane %v831_v48, %v7380_v50  ;;  %v7478_v57 = vcombine.high %v7457_v49, %v7457_v49  ;;  %v7482_v59 = vpop.f32.mrf.mxu0  ;;  %v993_v2 = vcombine.high %v7385_v0, %v7385_v0 }
 0x3b3   :  { %712 = vst.msk [vmem:[#allocation2 + $0x4] sm:$0x1] %vm709_vm6, %v7467_v53  ;;  %1036 = vst.msk [vmem:[#allocation2 + $0x5] sm:$0x1] %vm709_vm6, %v7480_v58  ;;  %1074 = vrot.lane.b32.xlu0 %v7485_v60, %s7098_s2  ;;  %v7512_v4 = vcombine.high %v7435_v24, %v7435_v24  ;;  %v7516_v6 = vcombine.high %v7400_v11, %v7400_v11  ;;  %v7524_v0 = vrot.slane %v7432_v23, %v7424_v22 }
 0x3b4   :  { %v863_v62 = vcombine.high %v7474_v56, %v7474_v56  ;;  %877 = vst.msk [vmem:[#allocation5 + $0xa] sm:$0x1] %vm709_vm6, %v7474_v56  ;;  %878 = vst.msk [vmem:[#allocation5 + $0xc] sm:$0x1] %vm709_vm6, %v7478_v57  ;;  %v6332_v1 = vpop.f32.mrf.mxu0  ;;  %v7526_v15 = vcombine.high %v852_v51, %v852_v51  ;;  %v1654_v16 = vadd.f32 %v7500_v63, %v1653_v26 }
 0x3b5   :  { %v1557_v3 = vld [vmem:[#allocation2] sm:$0x3]  ;;  %v7518_v7 = vpop.f32.mrf.mxu1  ;;  %713 = vst.msk [vmem:[#allocation2 + $0x6] sm:$0x1] %vm709_vm6, %v7512_v4  ;;  %1037 = vst.msk [vmem:[#allocation2 + $0x7] sm:$0x1] %vm709_vm6, %v7516_v6  ;;  %v7535_v17 = vrot.slane %v7397_v10, %v7424_v22  ;;  %v1186_v19 = vcombine.high %v7407_v14, %v7407_v14  ;;  %v1235_v28 = vrot.slane %v1187_v27, %v7424_v22 }
 0x3b6   :  { %v1558_v9 = vadd.f32 %v1557_v3, %v1402_v55  ;;  %v911_v12 = vrot.slane %v863_v62, %v7424_v22  ;;  %879 = vst.msk [vmem:[#allocation5 + $0xe] sm:$0x1] %vm709_vm6, %v863_v62  ;;  %875 = vst.msk [vmem:[#allocation5 + $0x6] sm:$0x1] %vm709_vm6, %v7526_v15  ;;  %v696_v26 = vrot.slane %v668_v61, %v7380_v50 }
 0x3b7   :  { %v6325_v20 = vpop.f32.mrf.mxu1  ;;  %v860_v29 = vcombine.high %v7444_v30, %v7444_v30  ;;  %782 = vrot.lane.b32.xlu0 %v721_v43, %s7099_s27  ;;  %1199 = vst.msk [vmem:[#allocation5 + $0x7] sm:$0x1] %vm709_vm6, %v1186_v19  ;;  %v7549_v46 = vrot.slane %v1186_v19, %v7424_v22  ;;  %v1021_v48 = vrot.slane %v993_v2, %v7380_v50 }
 0x3b8   :  { %v5986_v21 = vmul.f32 -1.442695, %v1558_v9  ;;  %926 = vrot.lane.b32.xlu1 %v911_v12, %s7098_s2  ;;  %v1184_v27 = vcombine.high %v7390_v5, %v7390_v5  ;;  %v698_v54 = vcombine.high %v7432_v23, %v7432_v23  ;;  %v7557_v55 = vrot.slane %v696_v26, %v7424_v22  ;;  %715 = vst.msk [vmem:[#allocation2 + $0xa] sm:$0x1] %vm709_vm6, %v696_v26 }
 0x3b9   :  { %874 = vst.msk [vmem:[#allocation5 + $0x4] sm:$0x1] %vm709_vm6, %v860_v29  ;;  %v7562_v43 = vrot.slane %v860_v29, %v7424_v22  ;;  %v7565_v61 = vrot.slane %v852_v51, %v7424_v22  ;;  %v7568_v50 = vrot.slane %v1021_v48, %v7424_v22  ;;  %1039 = vst.msk [vmem:[#allocation2 + $0xb] sm:$0x1] %vm709_vm6, %v1021_v48 }
 0x3ba   :  { %6675 = vpow2.f32 %v5986_v21  ;;  %1198 = vst.msk [vmem:[#allocation5 + $0x5] sm:$0x1] %vm709_vm6, %v1184_v27  ;;  %v7573_v23 = vrot.slane %v1184_v27, %v7424_v22  ;;  %716 = vst.msk [vmem:[#allocation2 + $0xc] sm:$0x1] %vm709_vm6, %v698_v54  ;;  %v7577_v62 = vrot.slane %v698_v54, %v7424_v22  ;;  %v1023_v1 = vcombine.high %v7397_v10, %v7397_v10 }
 0x3bb   :  { %v7584_v51 = vrot.slane %v7407_v14, %v7424_v22  ;;  %v7588_v2 = vrot.slane %v7444_v30, %v7424_v22  ;;  %v700_v3 = vcombine.high %v696_v26, %v696_v26  ;;  %v7592_v9 = vrot.slane %v7390_v5, %v7424_v22  ;;  %958 = vrot.lane.b32.xlu0 %v911_v12, %s7099_s27 }
 0x3bc   :  { %1250 = vrot.lane.b32.xlu1 %v1235_v28, %s7098_s2  ;;  %1040 = vst.msk [vmem:[#allocation2 + $0xd] sm:$0x1] %vm709_vm6, %v1023_v1  ;;  %v7597_v10 = vrot.slane %v1023_v1, %v7424_v22  ;;  %v1025_v20 = vcombine.high %v1021_v48, %v1021_v48  ;;  %v725_v30 = vrot.slane %v7435_v24, %v7424_v22 }
 0x3bd   :  { %v1810_v19 = vld [vmem:[#allocation5 + $0xe] sm:$0x3]  ;;  %v7600_v21 = vrot.slane %v700_v3, %v7424_v22  ;;  %717 = vst.msk [vmem:[#allocation2 + $0xe] sm:$0x1] %vm709_vm6, %v700_v3  ;;  %v1049_v24 = vrot.slane %v7400_v11, %v7424_v22  ;;  %v7628_v11 = vld [vmem:[#allocation26 + $0x2] ss:$0 sm:$0xff]  ;;  %v903_v27 = vrot.slane %v7474_v56, %v7424_v22 }
 0x3be   :  { %v1811_v14 = vadd.f32 %v1810_v19, %v1654_v16  ;;  %v7606_v5 = vrot.slane %v1025_v20, %v7424_v22  ;;  %1041 = vst.msk [vmem:[#allocation2 + $0xf] sm:$0x1] %vm709_vm6, %v1025_v20  ;;  %v907_v16 = vrot.slane %v7478_v57, %v7424_v22  ;;  %v7645_v56 = vld [vmem:[%s8504_s14 + $0x2] ss:$0 sm:$0xff]  ;;  %v733_v19 = vrot.slane %v7512_v4, %v7424_v22 }
 0x3bf   :  { %752 = vrot.lane.b32.xlu0 %v725_v30, %s7098_s2  ;;  %v1223_v4 = vrot.slane %v7404_v13, %v7424_v22 }
 0x3c0   :  { %v5991_v12 = vmul.f32 -1.442695, %v1811_v14  ;;  %1106 = vrot.lane.b32.xlu1 %v7485_v60, %s7099_s27  ;;  %v1231_v60 = vrot.slane %v7465_v52, %v7424_v22  ;;  %v1554_v52 = vadd.f32 %v7628_v11, %v7453_v45  ;;  %v1227_v45 = vrot.slane %v7419_v18, %v7424_v22 }
 0x3c1   :  { %v899_v18 = vrot.slane %v7457_v49, %v7424_v22  ;;  %v895_v49 = vrot.slane %v7526_v15, %v7424_v22 }
 0x3c2   :  { %6677 = vpow2.f32 %v5991_v12 }
 0x3c3   :  { %924 = vrot.lane.b32.xlu0 %v907_v16, %s7098_s2 }
 0x3c4   :  { %1282 = vrot.lane.b32.xlu1 %v1235_v28, %s7099_s27  ;;  %v729_v28 = vrot.slane %v7467_v53, %v7424_v22  ;;  %v1053_v53 = vrot.slane %v7480_v58, %v7424_v22  ;;  %v1806_v58 = vadd.f32 %v7645_v56, %v7482_v59  ;;  %v1057_v59 = vrot.slane %v7516_v6, %v7424_v22 }
 0x3c7   :  { %v6676_v26 = vpop.eup %6675  ;;  %784 = vrot.lane.b32.xlu0 %v725_v30, %s7099_s27 }
 0x3c8   :  { %v1562_v29 = vadd.f32 1.0, %v6676_v26  ;;  %1076 = vrot.lane.b32.xlu1 %v1049_v24, %s7098_s2 }
 0x3ca   :  { %6679 = vrcp.f32 %v1562_v29 }
 0x3cb   :  { %956 = vrot.lane.b32.xlu0 %v907_v16, %s7099_s27 }
 0x3cc   :  { %1248 = vrot.lane.b32.xlu1 %v1231_v60, %s7098_s2 }
 0x3cf   :  { %v6678_v57 = vpop.eup %6677  ;;  %754 = vrot.lane.b32.xlu0 %v729_v28, %s7098_s2 }
 0x3d0   :  { %v1815_v48 = vadd.f32 1.0, %v6678_v57  ;;  %1108 = vrot.lane.b32.xlu1 %v1049_v24, %s7099_s27 }
 0x3d2   :  { %6681 = vrcp.f32 %v1815_v48 }
 0x3d3   :  { %922 = vrot.lane.b32.xlu0 %v903_v27, %s7098_s2 }
 0x3d4   :  { %1280 = vrot.lane.b32.xlu1 %v1231_v60, %s7099_s27 }
 0x3d7   :  { %v6680_v54 = vpop.eup %6679  ;;  %786 = vrot.lane.b32.xlu0 %v729_v28, %s7099_s27 }
 0x3d8   :  { %v7638_v1 = vmul.f32 %v6680_v54, %v1554_v52  ;;  %1078 = vrot.lane.b32.xlu1 %v1053_v53, %s7098_s2 }
 0x3db   :  { %954 = vrot.lane.b32.xlu0 %v903_v27, %s7099_s27 }
 0x3dc   :  { %1246 = vrot.lane.b32.xlu1 %v1227_v45, %s7098_s2 }
 0x3df   :  { %v6682_v3 = vpop.eup %6681  ;;  %756 = vrot.lane.b32.xlu0 %v733_v19, %s7098_s2 }
 0x3e0   :  { %v7655_v20 = vmul.f32 %v6682_v3, %v1806_v58  ;;  %1110 = vrot.lane.b32.xlu1 %v1053_v53, %s7099_s27 }
 0x3e3   :  { %920 = vrot.lane.b32.xlu0 %v899_v18, %s7098_s2 }
 0x3e4   :  { %1278 = vrot.lane.b32.xlu1 %v1227_v45, %s7099_s27 }
 0x3e7   :  { %788 = vrot.lane.b32.xlu0 %v733_v19, %s7099_s27 }
 0x3e8   :  { %1080 = vrot.lane.b32.xlu1 %v1057_v59, %s7098_s2 }
 0x3eb   :  { %952 = vrot.lane.b32.xlu0 %v899_v18, %s7099_s27 }
 0x3ec   :  { %1244 = vrot.lane.b32.xlu1 %v1223_v4, %s7098_s2 }
 0x3ef   :  { %758 = vrot.lane.b32.xlu0 %v7524_v0, %s7098_s2 }
 0x3f0   :  { %1112 = vrot.lane.b32.xlu1 %v1057_v59, %s7099_s27 }
 0x3f3   :  { %918 = vrot.lane.b32.xlu0 %v895_v49, %s7098_s2 }
 0x3f4   :  { %1276 = vrot.lane.b32.xlu1 %v1223_v4, %s7099_s27 }
 0x3f7   :  { %790 = vrot.lane.b32.xlu0 %v7524_v0, %s7099_s27  ;;  %v7731_v0 = vld [vmem:[#allocation26 + $0x1] ss:$0 sm:$0xff] }
 0x3f8   :  { %1082 = vrot.lane.b32.xlu1 %v7535_v17, %s7098_s2 }
 0x3fb   :  { %950 = vrot.lane.b32.xlu0 %v895_v49, %s7099_s27 }
 0x3fc   :  { %1242 = vrot.lane.b32.xlu1 %v7549_v46, %s7098_s2 }
 0x3ff   :  { %760 = vrot.lane.b32.xlu0 %v7557_v55, %s7098_s2 }
 0x400   :  { %1114 = vrot.lane.b32.xlu1 %v7535_v17, %s7099_s27  ;;  %v1478_v17 = vadd.f32 %v7731_v0, %v7393_v8 }
 0x403   :  { %916 = vrot.lane.b32.xlu0 %v7562_v43, %s7098_s2 }
 0x404   :  { %1274 = vrot.lane.b32.xlu1 %v7549_v46, %s7099_s27 }
 0x407   :  { %792 = vrot.lane.b32.xlu0 %v7557_v55, %s7099_s27 }
 0x408   :  { %1084 = vrot.lane.b32.xlu1 %v7568_v50, %s7098_s2 }
 0x40b   :  { %948 = vrot.lane.b32.xlu0 %v7562_v43, %s7099_s27 }
 0x40c   :  { %1240 = vrot.lane.b32.xlu1 %v7573_v23, %s7098_s2 }
 0x40f   :  { %762 = vrot.lane.b32.xlu0 %v7577_v62, %s7098_s2 }
 0x410   :  { %1116 = vrot.lane.b32.xlu1 %v7568_v50, %s7099_s27 }
 0x413   :  { %914 = vrot.lane.b32.xlu0 %v7565_v61, %s7098_s2 }
 0x414   :  { %1272 = vrot.lane.b32.xlu1 %v7573_v23, %s7099_s27 }
 0x417   :  { %794 = vrot.lane.b32.xlu0 %v7577_v62, %s7099_s27 }
 0x418   :  { %1086 = vrot.lane.b32.xlu1 %v7597_v10, %s7098_s2 }
 0x41b   :  { %946 = vrot.lane.b32.xlu0 %v7565_v61, %s7099_s27  ;;  %v7748_v61 = vld [vmem:[%s8504_s14 + $0x1] ss:$0 sm:$0xff] }
 0x41c   :  { %1238 = vrot.lane.b32.xlu1 %v7584_v51, %s7098_s2  ;;  %v1730_v8 = vadd.f32 %v7748_v61, %v7518_v7 }
 0x41f   :  { %912 = vrot.lane.b32.xlu0 %v7588_v2, %s7098_s2 }
 0x420   :  { %1118 = vrot.lane.b32.xlu1 %v7597_v10, %s7099_s27 }
 0x421   :  { %v751_v13 = vpop.permute.xlu0 %750 }
 0x422   :  { %774 = vst.msk [vmem:[#allocation3] sm:$0x1] %vm709_vm6, %v751_v13 }
 0x423   :  { %764 = vrot.lane.b32.xlu0 %v7600_v21, %s7098_s2 }
 0x424   :  { %1270 = vrot.lane.b32.xlu1 %v7584_v51, %s7099_s27 }
 0x425   :  { %v1075_v22 = vpop.permute.xlu0 %1074 }
 0x426   :  { %1098 = vst.msk [vmem:[#allocation3 + $0x1] sm:$0x1] %vm709_vm6, %v1075_v22 }
 0x427   :  { %944 = vrot.lane.b32.xlu0 %v7588_v2, %s7099_s27 }
 0x428   :  { %1236 = vrot.lane.b32.xlu1 %v7592_v9, %s7098_s2 }
 0x429   :  { %v783_v15 = vpop.permute.xlu0 %782 }
 0x42a   :  { %v927_v6 = vpop.permute.xlu1 %926  ;;  %806 = vst.msk [vmem:[#allocation4] sm:$0x1] %vm709_vm6, %v783_v15 }
 0x42b   :  { %943 = vst.msk [vmem:[#allocation6 + $0xe] sm:$0x1] %vm709_vm6, %v927_v6  ;;  %796 = vrot.lane.b32.xlu0 %v7600_v21, %s7099_s27 }
 0x42c   :  { %1088 = vrot.lane.b32.xlu1 %v7606_v5, %s7098_s2 }
 0x42d   :  { %v1565_v55 = vld [vmem:[#allocation3] sm:$0x3]  ;;  %v959_v43 = vpop.permute.xlu0 %958 }
 0x42e   :  { %v1251_v46 = vpop.permute.xlu1 %1250  ;;  %975 = vst.msk [vmem:[#allocation7 + $0xe] sm:$0x1] %vm709_vm6, %v959_v43  ;;  %v1566_v50 = vadd.f32 %v1565_v55, %v1478_v17 }
 0x42f   :  { %1267 = vst.msk [vmem:[#allocation6 + $0xf] sm:$0x1] %vm709_vm6, %v1251_v46 }
 0x430   :  { %1268 = vrot.lane.b32.xlu1 %v7592_v9, %s7099_s27  ;;  %v5987_v62 = vmul.f32 -1.442695, %v1566_v50 }
 0x431   :  { %v753_v51 = vpop.permute.xlu0 %752 }
 0x432   :  { %v1107_v23 = vpop.permute.xlu1 %1106  ;;  %775 = vst.msk [vmem:[#allocation3 + $0x2] sm:$0x1] %vm709_vm6, %v753_v51  ;;  %6683 = vpow2.f32 %v5987_v62 }
 0x433   :  { %1130 = vst.msk [vmem:[#allocation4 + $0x1] sm:$0x1] %vm709_vm6, %v1107_v23 }
 0x434   :  { %1120 = vrot.lane.b32.xlu1 %v7606_v5, %s7099_s27 }
 0x435   :  { %v925_v14 = vpop.permute.xlu0 %924 }
 0x436   :  { %v1819_v2 = vld [vmem:[#allocation6 + $0xe] sm:$0x3]  ;;  %v1283_v9 = vpop.permute.xlu1 %1282  ;;  %942 = vst.msk [vmem:[#allocation6 + $0xc] sm:$0x1] %vm709_vm6, %v925_v14 }
 0x437   :  { %v1820_v10 = vadd.f32 %v1819_v2, %v1730_v8  ;;  %1299 = vst.msk [vmem:[#allocation7 + $0xf] sm:$0x1] %vm709_vm6, %v1283_v9 }
 0x439   :  { %v5992_v21 = vmul.f32 -1.442695, %v1820_v10  ;;  %v785_v7 = vpop.permute.xlu0 %784 }
 0x43a   :  { %v1077_v30 = vpop.permute.xlu1 %1076  ;;  %807 = vst.msk [vmem:[#allocation4 + $0x2] sm:$0x1] %vm709_vm6, %v785_v7  ;;  %v1573_v16 = vld [vmem:[#allocation4] sm:$0x3] }
 0x43b   :  { %6685 = vpow2.f32 %v5992_v21  ;;  %1099 = vst.msk [vmem:[#allocation3 + $0x3] sm:$0x1] %vm709_vm6, %v1077_v30  ;;  %v1575_v60 = vadd.f32 %v7638_v1, %v1573_v16 }
 0x43d   :  { %v957_v12 = vpop.permute.xlu0 %956 }
 0x43e   :  { %v1249_v5 = vpop.permute.xlu1 %1248  ;;  %974 = vst.msk [vmem:[#allocation7 + $0xc] sm:$0x1] %vm709_vm6, %v957_v12  ;;  %v1828_v48 = vld [vmem:[#allocation7 + $0xe] sm:$0x3] }
 0x43f   :  { %1266 = vst.msk [vmem:[#allocation6 + $0xd] sm:$0x1] %vm709_vm6, %v1249_v5  ;;  %v6684_v24 = vpop.eup %6683  ;;  %v1830_v54 = vadd.f32 %v7655_v20, %v1828_v48 }
 0x440   :  { %v1570_v29 = vadd.f32 1.0, %v6684_v24 }
 0x441   :  { %v755_v57 = vpop.permute.xlu0 %754 }
 0x442   :  { %v1109_v26 = vpop.permute.xlu1 %1108  ;;  %776 = vst.msk [vmem:[#allocation3 + $0x4] sm:$0x1] %vm709_vm6, %v755_v57  ;;  %6687 = vrcp.f32 %v1570_v29 }
 0x443   :  { %1131 = vst.msk [vmem:[#allocation4 + $0x3] sm:$0x1] %vm709_vm6, %v1109_v26  ;;  %6689 = vtanh.f32 %v1575_v60 }
 0x445   :  { %v923_v27 = vpop.permute.xlu0 %922 }
 0x446   :  { %v1281_v28 = vpop.permute.xlu1 %1280  ;;  %941 = vst.msk [vmem:[#allocation6 + $0xa] sm:$0x1] %vm709_vm6, %v923_v27 }
 0x447   :  { %1298 = vst.msk [vmem:[#allocation7 + $0xd] sm:$0x1] %vm709_vm6, %v1281_v28 }
 0x448   :  { %v6686_v52 = vpop.eup %6685 }
 0x449   :  { %v1824_v53 = vadd.f32 1.0, %v6686_v52  ;;  %v787_v1 = vpop.permute.xlu0 %786 }
 0x44a   :  { %v1079_v45 = vpop.permute.xlu1 %1078  ;;  %808 = vst.msk [vmem:[#allocation4 + $0x4] sm:$0x1] %vm709_vm6, %v787_v1 }
 0x44b   :  { %6691 = vrcp.f32 %v1824_v53  ;;  %1100 = vst.msk [vmem:[#allocation3 + $0x5] sm:$0x1] %vm709_vm6, %v1079_v45 }
 0x44c   :  { %6693 = vtanh.f32 %v1830_v54 }
 0x44d   :  { %v955_v3 = vpop.permute.xlu0 %954 }
 0x44e   :  { %v1247_v58 = vpop.permute.xlu1 %1246  ;;  %973 = vst.msk [vmem:[#allocation7 + $0xa] sm:$0x1] %vm709_vm6, %v955_v3 }
 0x44f   :  { %1265 = vst.msk [vmem:[#allocation6 + $0xb] sm:$0x1] %vm709_vm6, %v1247_v58  ;;  %v6688_v19 = vpop.eup %6687 }
 0x450   :  { %v1577_v59 = vsub.f32 1.0, %v6688_v19  ;;  %v6690_v4 = vpop.eup %6689  ;;  %v1579_v13 = vmul.f32 0.0, %v6688_v19 }
 0x451   :  { %v757_v20 = vpop.permute.xlu0 %756 }
 0x452   :  { %v1111_v18 = vpop.permute.xlu1 %1110  ;;  %777 = vst.msk [vmem:[#allocation3 + $0x6] sm:$0x1] %vm709_vm6, %v757_v20  ;;  %v1578_v49 = vmul.f32 %v6690_v4, %v1577_v59 }
 0x453   :  { %1132 = vst.msk [vmem:[#allocation4 + $0x5] sm:$0x1] %vm709_vm6, %v1111_v18  ;;  %v2054_v18 = vld [vmem:[#allocation2 + $0x2] sm:$0x3] }
 0x454   :  { %v7774_v6 = vadd.f32 %v1579_v13, %v1578_v49 }
 0x455   :  { %v921_v15 = vpop.permute.xlu0 %920 }
 0x456   :  { %v1279_v22 = vpop.permute.xlu1 %1278  ;;  %940 = vst.msk [vmem:[#allocation6 + $0x8] sm:$0x1] %vm709_vm6, %v921_v15  ;;  %6338 = vmatmul.mubr.msk.f32.vlgmr.msra.gmra.mxu1 %vm295_vm2, %v7774_v6  ;;  %6345 = vmatmul.mubr.msk.f32.vlgmr.msra.gmra.mxu0 %vm295_vm2, %v7774_v6 }
 0x457   :  { %1297 = vst.msk [vmem:[#allocation7 + $0xb] sm:$0x1] %vm709_vm6, %v1279_v22  ;;  %6348 = vmatpush3.msra.mxu1 %v7303_v36  ;;  %6355 = vmatpush3.msra.mxu0 %v7295_v35 }
 0x458   :  { %v6692_v17 = vpop.eup %6691  ;;  %1837 = vst.msk [vmem:[#allocation8] sm:$0x3] %vm1836_vm7, %v7774_v6  ;;  %6349 = vmatprep.subr.mxu1 %v7095_v25  ;;  %6351 = vmatprep.mubr.msk.f32.mxu1 %vm7096_vm5, %v7095_v25 }
 0x459   :  { %v1832_v46 = vsub.f32 1.0, %v6692_v17  ;;  %v6694_v55 = vpop.eup %6693  ;;  %6350 = vmatpush3.msra.mxu1 %v7318_v38  ;;  %6356 = vmatprep.subr.mxu0 %v7095_v25  ;;  %v789_v50 = vpop.permute.xlu0 %788  ;;  %v1834_v62 = vmul.f32 0.0, %v6692_v17 }
 0x45a   :  { %v1081_v43 = vpop.permute.xlu1 %1080  ;;  %809 = vst.msk [vmem:[#allocation4 + $0x6] sm:$0x1] %vm709_vm6, %v789_v50  ;;  %6352 = vmatmul.mubr.msk.f32.vlgmr.msra.gmra.mxu1 %vm295_vm2, %v7774_v6  ;;  %6357 = vmatpush3.msra.mxu0 %v7309_v37  ;;  %v2294_v50 = vld [vmem:[#allocation5 + $0xc] sm:$0x3] }
 0x45b   :  { %1101 = vst.msk [vmem:[#allocation3 + $0x7] sm:$0x1] %vm709_vm6, %v1081_v43  ;;  %v1833_v23 = vmul.f32 %v6694_v55, %v1832_v46  ;;  %6361 = vmatprep.subr.mxu1 %v7095_v25  ;;  %6358 = vmatprep.mubr.msk.f32.mxu0 %vm7096_vm5, %v7095_v25  ;;  %v2063_v46 = vld [vmem:[#allocation3 + $0x2] sm:$0x3] }
 0x45c   :  { %6362 = vmatpush3.msra.mxu1 %v7344_v41  ;;  %6368 = vmatprep.subr.mxu0 %v7095_v25 }
 0x45d   :  { %v7799_v35 = vadd.f32 %v1834_v62, %v1833_v23  ;;  %6363 = vmatprep.subr.mxu1 %v7095_v25  ;;  %v953_v37 = vpop.permute.xlu0 %952  ;;  %6365 = vmatprep.mubr.msk.f32.mxu1 %vm7096_vm5, %v7095_v25 }
 0x45e   :  { %v1245_v36 = vpop.permute.xlu1 %1244  ;;  %6364 = vmatpush3.msra.mxu1 %v7354_v42  ;;  %972 = vst.msk [vmem:[#allocation7 + $0x8] sm:$0x1] %vm709_vm6, %v953_v37 }
 0x45f   :  { %1264 = vst.msk [vmem:[#allocation6 + $0x9] sm:$0x1] %vm709_vm6, %v1245_v36  ;;  %6359 = vmatmul.mubr.msk.f32.vlgmr.msra.gmra.mxu0 %vm295_vm2, %v7799_v35  ;;  %6366 = vmatmul.mubr.msk.f32.vlgmr.msra.gmra.mxu1 %vm295_vm2, %v7799_v35 }
 0x460   :  { %1839 = vst.msk [vmem:[#allocation9 + $0xe] sm:$0x3] %vm1836_vm7, %v7799_v35  ;;  %6369 = vmatpush3.msra.mxu0 %v7327_v39  ;;  %6372 = vmatprep.mubr.msk.f32.mxu0 %vm7096_vm5, %v7095_v25 }
 0x461   :  { %6370 = vmatprep.subr.mxu0 %v7095_v25  ;;  %v759_v41 = vpop.permute.xlu0 %758  ;;  %6375 = vmatprep.subr.mxu1 %v7095_v25 }
 0x462   :  { %v1113_v38 = vpop.permute.xlu1 %1112  ;;  %6371 = vmatpush3.msra.mxu0 %v7337_v40  ;;  %778 = vst.msk [vmem:[#allocation3 + $0x8] sm:$0x1] %vm709_vm6, %v759_v41  ;;  %6376 = vmatpush3.msra.mxu1 %v7266_v31 }
 0x463   :  { %1133 = vst.msk [vmem:[#allocation4 + $0x7] sm:$0x1] %vm709_vm6, %v1113_v38  ;;  %6373 = vmatmul.mubr.msk.f32.vlgmr.msra.gmra.mxu0 %vm295_vm2, %v7799_v35  ;;  %6382 = vmatprep.subr.mxu0 %v7095_v25 }
 0x464   :  { %6383 = vmatpush3.msra.mxu0 %v7271_v32  ;;  %6377 = vmatprep.subr.mxu1 %v7095_v25 }
 0x465   :  { %6384 = vmatprep.subr.mxu0 %v7095_v25  ;;  %v919_v40 = vpop.permute.xlu0 %918  ;;  %6378 = vmatpush3.msra.mxu1 %v7276_v33 }
 0x466   :  { %v1277_v39 = vpop.permute.xlu1 %1276  ;;  %6379 = vmatprep.mubr.msk.f32.mxu1 %vm7096_vm5, %v7095_v25  ;;  %939 = vst.msk [vmem:[#allocation6 + $0x6] sm:$0x1] %vm709_vm6, %v919_v40  ;;  %6385 = vmatpush3.msra.mxu0 %v7284_v34 }
 0x467   :  { %1296 = vst.msk [vmem:[#allocation7 + $0x9] sm:$0x1] %vm709_vm6, %v1277_v39  ;;  %6386 = vmatprep.mubr.msk.f32.mxu0 %vm7096_vm5, %v7095_v25  ;;  %6389 = vmatprep.subr.mxu1 %v7095_v25 }
 0x468   :  { %6396 = vmatprep.subr.mxu0 %v7095_v25 }
 0x469   :  { %v791_v32 = vpop.permute.xlu0 %790 }
 0x46a   :  { %v1083_v31 = vpop.permute.xlu1 %1082  ;;  %810 = vst.msk [vmem:[#allocation4 + $0x8] sm:$0x1] %vm709_vm6, %v791_v32  ;;  %v2303_v32 = vld [vmem:[#allocation6 + $0xc] sm:$0x3] }
 0x46b   :  { %1102 = vst.msk [vmem:[#allocation3 + $0x9] sm:$0x1] %vm709_vm6, %v1083_v31 }
 0x46d   :  { %v951_v42 = vpop.permute.xlu0 %950 }
 0x46e   :  { %v1243_v33 = vpop.permute.xlu1 %1242  ;;  %971 = vst.msk [vmem:[#allocation7 + $0x6] sm:$0x1] %vm709_vm6, %v951_v42 }
 0x46f   :  { %1263 = vst.msk [vmem:[#allocation6 + $0x7] sm:$0x1] %vm709_vm6, %v1243_v33 }
 0x471   :  { %v761_v8 = vpop.permute.xlu0 %760 }
 0x472   :  { %v1115_v34 = vpop.permute.xlu1 %1114  ;;  %779 = vst.msk [vmem:[#allocation3 + $0xa] sm:$0x1] %vm709_vm6, %v761_v8 }
 0x473   :  { %1134 = vst.msk [vmem:[#allocation4 + $0x9] sm:$0x1] %vm709_vm6, %v1115_v34 }
 0x475   :  { %v917_v2 = vpop.permute.xlu0 %916 }
 0x476   :  { %v1275_v51 = vpop.permute.xlu1 %1274  ;;  %938 = vst.msk [vmem:[#allocation6 + $0x4] sm:$0x1] %vm709_vm6, %v917_v2 }
 0x477   :  { %1295 = vst.msk [vmem:[#allocation7 + $0x7] sm:$0x1] %vm709_vm6, %v1275_v51 }
 0x479   :  { %v793_v10 = vpop.permute.xlu0 %792 }
 0x47a   :  { %v1085_v9 = vpop.permute.xlu1 %1084  ;;  %811 = vst.msk [vmem:[#allocation4 + $0xa] sm:$0x1] %vm709_vm6, %v793_v10 }
 0x47b   :  { %1103 = vst.msk [vmem:[#allocation3 + $0xb] sm:$0x1] %vm709_vm6, %v1085_v9 }
 0x47d   :  { %v949_v21 = vpop.permute.xlu0 %948 }
 0x47e   :  { %v1241_v14 = vpop.permute.xlu1 %1240  ;;  %970 = vst.msk [vmem:[#allocation7 + $0x4] sm:$0x1] %vm709_vm6, %v949_v21 }
 0x47f   :  { %1262 = vst.msk [vmem:[#allocation6 + $0x5] sm:$0x1] %vm709_vm6, %v1241_v14 }
 0x481   :  { %v763_v7 = vpop.permute.xlu0 %762 }
 0x482   :  { %v1117_v30 = vpop.permute.xlu1 %1116  ;;  %780 = vst.msk [vmem:[#allocation3 + $0xc] sm:$0x1] %vm709_vm6, %v763_v7 }
 0x483   :  { %1135 = vst.msk [vmem:[#allocation4 + $0xb] sm:$0x1] %vm709_vm6, %v1117_v30 }
 0x485   :  { %v915_v12 = vpop.permute.xlu0 %914 }
 0x486   :  { %v1273_v5 = vpop.permute.xlu1 %1272  ;;  %937 = vst.msk [vmem:[#allocation6 + $0x2] sm:$0x1] %vm709_vm6, %v915_v12 }
 0x487   :  { %1294 = vst.msk [vmem:[#allocation7 + $0x5] sm:$0x1] %vm709_vm6, %v1273_v5  ;;  %v2072_v5 = vld [vmem:[#allocation4 + $0x2] sm:$0x3] }
 0x489   :  { %v795_v24 = vpop.permute.xlu0 %794 }
 0x48a   :  { %v1087_v16 = vpop.permute.xlu1 %1086  ;;  %812 = vst.msk [vmem:[#allocation4 + $0xc] sm:$0x1] %vm709_vm6, %v795_v24 }
 0x48b   :  { %1104 = vst.msk [vmem:[#allocation3 + $0xd] sm:$0x1] %vm709_vm6, %v1087_v16 }
 0x48d   :  { %v947_v29 = vpop.permute.xlu0 %946 }
 0x48e   :  { %v1239_v26 = vpop.permute.xlu1 %1238  ;;  %969 = vst.msk [vmem:[#allocation7 + $0x2] sm:$0x1] %vm709_vm6, %v947_v29 }
 0x48f   :  { %1261 = vst.msk [vmem:[#allocation6 + $0x3] sm:$0x1] %vm709_vm6, %v1239_v26 }
 0x491   :  { %v913_v57 = vpop.permute.xlu0 %912 }
 0x492   :  { %v1119_v60 = vpop.permute.xlu1 %1118  ;;  %936 = vst.msk [vmem:[#allocation6] sm:$0x1] %vm709_vm6, %v913_v57 }
 0x493   :  { %1136 = vst.msk [vmem:[#allocation4 + $0xd] sm:$0x1] %vm709_vm6, %v1119_v60  ;;  %v2312_v60 = vld [vmem:[#allocation7 + $0xc] sm:$0x3] }
 0x495   :  { %v765_v48 = vpop.permute.xlu0 %764 }
 0x496   :  { %v1271_v28 = vpop.permute.xlu1 %1270  ;;  %781 = vst.msk [vmem:[#allocation3 + $0xe] sm:$0x1] %vm709_vm6, %v765_v48 }
 0x497   :  { %1293 = vst.msk [vmem:[#allocation7 + $0x3] sm:$0x1] %vm709_vm6, %v1271_v28 }
 0x499   :  { %v945_v52 = vpop.permute.xlu0 %944 }
 0x49a   :  { %v1237_v27 = vpop.permute.xlu1 %1236  ;;  %968 = vst.msk [vmem:[#allocation7] sm:$0x1] %vm709_vm6, %v945_v52 }
 0x49b   :  { %1260 = vst.msk [vmem:[#allocation6 + $0x1] sm:$0x1] %vm709_vm6, %v1237_v27 }
 0x49d   :  { %v797_v54 = vpop.permute.xlu0 %796 }
 0x49e   :  { %v1089_v53 = vpop.permute.xlu1 %1088  ;;  %813 = vst.msk [vmem:[#allocation4 + $0xe] sm:$0x1] %vm709_vm6, %v797_v54 }
 0x49f   :  { %1105 = vst.msk [vmem:[#allocation3 + $0xf] sm:$0x1] %vm709_vm6, %v1089_v53 }
 0x4a2   :  { %v1269_v45 = vpop.permute.xlu1 %1268 }
 0x4a3   :  { %1292 = vst.msk [vmem:[#allocation7 + $0x1] sm:$0x1] %vm709_vm6, %v1269_v45 }
 0x4a6   :  { %v1121_v1 = vpop.permute.xlu1 %1120 }
 0x4a7   :  { %1137 = vst.msk [vmem:[#allocation4 + $0xf] sm:$0x1] %vm709_vm6, %v1121_v1  ;;  %v7888_v1 = vld [vmem:[%s8501_s11 + $0x28] sm:$0xff] }
 0x516   :  { %v1909_v58 = vpop.f32.mrf.mxu1  ;;  %v1979_v3 = vpop.f32.mrf.mxu0 }
 0x517   :  { %v1910_v19 = vadd.f32 %v7451_v44, %v1909_v58  ;;  %v1980_v22 = vadd.f32 %v7731_v0, %v1979_v3 }
 0x518   :  { %v6339_v59 = vpop.f32.mrf.mxu1  ;;  %v6346_v4 = vpop.f32.mrf.mxu0 }
 0x519   :  { %v2055_v20 = vadd.f32 %v2054_v18, %v1910_v19  ;;  %v2064_v43 = vadd.f32 %v2063_v46, %v1980_v22  ;;  %v7903_v19 = vld [vmem:[%s8501_s11 + $0x20] sm:$0xff] }
 0x51a   :  { %v2049_v49 = vpop.f32.mrf.mxu1  ;;  %v7913_v4 = vld [vmem:[%s8503_s13] sm:$0xff] }
 0x51b   :  { %v5996_v13 = vmul.f32 -1.442695, %v2055_v20  ;;  %v5997_v40 = vmul.f32 -1.442695, %v2064_v43  ;;  %v2050_v14 = vadd.f32 %v7628_v11, %v2049_v49  ;;  %v7936_v49 = vld [vmem:[%s8503_s13 + $0x10] sm:$0xff]  ;;  %v7955_v22 = vld [vmem:[%s8503_s13 + $0x20] sm:$0xff] }
 0x51c   :  { %v6353_v15 = vpop.f32.mrf.mxu1  ;;  %v7979_v46 = vld [vmem:[%s8501_s11] sm:$0xff] }
 0x51d   :  { %6695 = vpow2.f32 %v5996_v13  ;;  %v7944_v13 = vld [vmem:[%s8503_s13 + $0x28] sm:$0xff] }
 0x51e   :  { %v7965_v15 = vld [vmem:[%s8501_s11 + $0x8] sm:$0xff] }
 0x51f   :  { %v2149_v17 = vpop.f32.mrf.mxu0  ;;  %v2219_v62 = vpop.f32.mrf.mxu1 }
 0x520   :  { %v2150_v55 = vadd.f32 %v7500_v63, %v2149_v17  ;;  %v2220_v41 = vadd.f32 %v7748_v61, %v2219_v62  ;;  %v7971_v17 = vld [vmem:[%s8501_s11 + $0x18] sm:$0xff]  ;;  %v2538_v62 = vld [vmem:[#allocation2 + $0x4] sm:$0x3] }
 0x521   :  { %v6360_v23 = vpop.f32.mrf.mxu0  ;;  %v6367_v37 = vpop.f32.mrf.mxu1 }
 0x522   :  { %v2295_v36 = vadd.f32 %v2294_v50, %v2150_v55  ;;  %v2304_v33 = vadd.f32 %v2303_v32, %v2220_v41  ;;  %v7987_v55 = vld [vmem:[%s8501_s11 + $0x10] sm:$0xff] }
 0x523   :  { %v2289_v39 = vpop.f32.mrf.mxu0 }
 0x524   :  { %v6001_v38 = vmul.f32 -1.442695, %v2295_v36  ;;  %v6002_v34 = vmul.f32 -1.442695, %v2304_v33  ;;  %v2290_v24 = vadd.f32 %v7645_v56, %v2289_v39  ;;  %v2547_v33 = vld [vmem:[#allocation3 + $0x4] sm:$0x3] }
 0x525   :  { %v6374_v31 = vpop.f32.mrf.mxu0 }
 0x526   :  { %6697 = vpow2.f32 %v6001_v38 }
 0x527   :  { %6699 = vpow2.f32 %v5997_v40 }
 0x52a   :  { %v6696_v42 = vpop.eup %6695 }
 0x52b   :  { %v2059_v8 = vadd.f32 1.0, %v6696_v42 }
 0x52d   :  { %6701 = vrcp.f32 %v2059_v8  ;;  %v2778_v8 = vld [vmem:[#allocation5 + $0xa] sm:$0x3] }
 0x52e   :  { %6703 = vpow2.f32 %v6002_v34 }
 0x533   :  { %v6698_v51 = vpop.eup %6697 }
 0x534   :  { %v2299_v2 = vadd.f32 1.0, %v6698_v51  ;;  %v6700_v9 = vpop.eup %6699 }
 0x535   :  { %v2068_v10 = vadd.f32 1.0, %v6700_v9 }
 0x536   :  { %6705 = vrcp.f32 %v2299_v2 }
 0x537   :  { %6707 = vrcp.f32 %v2068_v10 }
 0x53a   :  { %v6702_v21 = vpop.eup %6701 }
 0x53b   :  { %v6704_v30 = vpop.eup %6703  ;;  %v2073_v7 = vmul.f32 %v6702_v21, %v2050_v14 }
 0x53c   :  { %v2308_v16 = vadd.f32 1.0, %v6704_v30 }
 0x53d   :  { %v2074_v12 = vadd.f32 %v2073_v7, %v2072_v5  ;;  %v2787_v5 = vld [vmem:[#allocation6 + $0xa] sm:$0x3] }
 0x53f   :  { %6709 = vtanh.f32 %v2074_v12 }
 0x540   :  { %6711 = vrcp.f32 %v2308_v16 }
 0x543   :  { %v6706_v26 = vpop.eup %6705 }
 0x544   :  { %v2313_v29 = vmul.f32 %v6706_v26, %v2290_v24  ;;  %v6708_v28 = vpop.eup %6707 }
 0x545   :  { %v2076_v48 = vsub.f32 1.0, %v6708_v28  ;;  %v2078_v53 = vmul.f32 %v6708_v28, %v7774_v6  ;;  %v7894_v6 = vld [vmem:[%s8503_s13 + $0x8] sm:$0xff] }
 0x546   :  { %v2314_v57 = vadd.f32 %v2313_v29, %v2312_v60 }
 0x548   :  { %6713 = vtanh.f32 %v2314_v57 }
 0x54c   :  { %v6710_v27 = vpop.eup %6709 }
 0x54d   :  { %v2077_v52 = vmul.f32 %v6710_v27, %v2076_v48  ;;  %v6712_v54 = vpop.eup %6711 }
 0x54e   :  { %v2316_v58 = vsub.f32 1.0, %v6712_v54  ;;  %v2318_v59 = vmul.f32 %v6712_v54, %v7799_v35  ;;  %v7924_v35 = vld [vmem:[%s8503_s13 + $0x18] sm:$0xff] }
 0x54f   :  { %v7877_v45 = vadd.f32 %v2078_v53, %v2077_v52  ;;  %v2556_v53 = vld [vmem:[#allocation4 + $0x4] sm:$0x3] }
 0x551   :  { %2321 = vst.msk [vmem:[#allocation8 + $0x2] sm:$0x3] %vm1836_vm7, %v7877_v45  ;;  %6380 = vmatmul.mubr.msk.f32.vlgmr.msra.gmra.mxu1 %vm295_vm2, %v7877_v45  ;;  %6387 = vmatmul.mubr.msk.f32.vlgmr.msra.gmra.mxu0 %vm295_vm2, %v7877_v45 }
 0x552   :  { %6390 = vmatpush3.msra.mxu1 %v7888_v1  ;;  %6397 = vmatpush3.msra.mxu0 %v7894_v6 }
 0x553   :  { %6391 = vmatprep.subr.mxu1 %v7095_v25  ;;  %6393 = vmatprep.mubr.msk.f32.mxu1 %vm7096_vm5, %v7095_v25 }
 0x554   :  { %6392 = vmatpush3.msra.mxu1 %v7903_v19  ;;  %6398 = vmatprep.subr.mxu0 %v7095_v25 }
 0x555   :  { %v6714_v3 = vpop.eup %6713  ;;  %6394 = vmatmul.mubr.msk.f32.vlgmr.msra.gmra.mxu1 %vm295_vm2, %v7877_v45  ;;  %6399 = vmatpush3.msra.mxu0 %v7913_v4 }
 0x556   :  { %v2317_v18 = vmul.f32 %v6714_v3, %v2316_v58  ;;  %6403 = vmatprep.subr.mxu1 %v7095_v25  ;;  %6400 = vmatprep.mubr.msk.f32.mxu0 %vm7096_vm5, %v7095_v25 }
 0x557   :  { %6404 = vmatpush3.msra.mxu1 %v7924_v35  ;;  %6410 = vmatprep.subr.mxu0 %v7095_v25 }
 0x558   :  { %v7919_v20 = vadd.f32 %v2318_v59, %v2317_v18  ;;  %6405 = vmatprep.subr.mxu1 %v7095_v25  ;;  %6407 = vmatprep.mubr.msk.f32.mxu1 %vm7096_vm5, %v7095_v25 }
 0x559   :  { %6406 = vmatpush3.msra.mxu1 %v7936_v49 }
 0x55a   :  { %2323 = vst.msk [vmem:[#allocation9 + $0xc] sm:$0x3] %vm1836_vm7, %v7919_v20  ;;  %6401 = vmatmul.mubr.msk.f32.vlgmr.msra.gmra.mxu0 %vm295_vm2, %v7919_v20  ;;  %6408 = vmatmul.mubr.msk.f32.vlgmr.msra.gmra.mxu1 %vm295_vm2, %v7919_v20 }
 0x55b   :  { %6411 = vmatpush3.msra.mxu0 %v7944_v13  ;;  %6414 = vmatprep.mubr.msk.f32.mxu0 %vm7096_vm5, %v7095_v25 }
 0x55c   :  { %6412 = vmatprep.subr.mxu0 %v7095_v25  ;;  %6417 = vmatprep.subr.mxu1 %v7095_v25 }
 0x55d   :  { %6413 = vmatpush3.msra.mxu0 %v7955_v22  ;;  %6418 = vmatpush3.msra.mxu1 %v7965_v15 }
 0x55e   :  { %6415 = vmatmul.mubr.msk.f32.vlgmr.msra.gmra.mxu0 %vm295_vm2, %v7919_v20  ;;  %6424 = vmatprep.subr.mxu0 %v7095_v25 }
 0x55f   :  { %6425 = vmatpush3.msra.mxu0 %v7971_v17  ;;  %6419 = vmatprep.subr.mxu1 %v7095_v25 }
 0x560   :  { %6426 = vmatprep.subr.mxu0 %v7095_v25  ;;  %6420 = vmatpush3.msra.mxu1 %v7979_v46 }
 0x561   :  { %6421 = vmatprep.mubr.msk.f32.mxu1 %vm7096_vm5, %v7095_v25  ;;  %6427 = vmatpush3.msra.mxu0 %v7987_v55 }
 0x562   :  { %6428 = vmatprep.mubr.msk.f32.mxu0 %vm7096_vm5, %v7095_v25  ;;  %6431 = vmatprep.subr.mxu1 %v7095_v25 }
 0x563   :  { %6438 = vmatprep.subr.mxu0 %v7095_v25 }
 0x611   :  { %v2393_v43 = vpop.f32.mrf.mxu1  ;;  %v2463_v50 = vpop.f32.mrf.mxu0 }
 0x612   :  { %v2394_v23 = vadd.f32 %v7451_v44, %v2393_v43  ;;  %v2464_v40 = vadd.f32 %v7731_v0, %v2463_v50  ;;  %v2796_v43 = vld [vmem:[#allocation7 + $0xa] sm:$0x3] }
 0x613   :  { %v6381_v36 = vpop.f32.mrf.mxu1  ;;  %v6388_v37 = vpop.f32.mrf.mxu0 }
 0x614   :  { %v2539_v38 = vadd.f32 %v2538_v62, %v2394_v23  ;;  %v2548_v34 = vadd.f32 %v2547_v33, %v2464_v40  ;;  %v8058_v33 = vld [vmem:[#allocation26] ss:$0 sm:$0xff] }
 0x615   :  { %v2533_v41 = vpop.f32.mrf.mxu1 }
 0x616   :  { %v6006_v39 = vmul.f32 -1.442695, %v2539_v38  ;;  %v6007_v30 = vmul.f32 -1.442695, %v2548_v34  ;;  %v2534_v28 = vadd.f32 %v7628_v11, %v2533_v41  ;;  %v3022_v34 = vld [vmem:[#allocation2 + $0x6] sm:$0x3] }
 0x617   :  { %v6395_v31 = vpop.f32.mrf.mxu1 }
 0x618   :  { %6715 = vpow2.f32 %v6006_v39 }
 0x61a   :  { %v2633_v32 = vpop.f32.mrf.mxu0  ;;  %v2703_v2 = vpop.f32.mrf.mxu1 }
 0x61b   :  { %v2634_v42 = vadd.f32 %v7500_v63, %v2633_v32  ;;  %v2704_v14 = vadd.f32 %v7748_v61, %v2703_v2 }
 0x61c   :  { %v6402_v51 = vpop.f32.mrf.mxu0  ;;  %v6409_v44 = vpop.f32.mrf.mxu1 }
 0x61d   :  { %v2779_v9 = vadd.f32 %v2778_v8, %v2634_v42  ;;  %v2788_v12 = vadd.f32 %v2787_v5, %v2704_v14 }
 0x61e   :  { %v2773_v21 = vpop.f32.mrf.mxu0 }
 0x61f   :  { %v6011_v10 = vmul.f32 -1.442695, %v2779_v9  ;;  %v6012_v24 = vmul.f32 -1.442695, %v2788_v12  ;;  %v2774_v3 = vadd.f32 %v7645_v56, %v2773_v21 }
 0x620   :  { %v6416_v7 = vpop.f32.mrf.mxu0 }
 0x621   :  { %6717 = vpow2.f32 %v6011_v10  ;;  %v8065_v7 = vld [vmem:[%s8504_s14] ss:$0 sm:$0xff] }
 0x622   :  { %6719 = vpow2.f32 %v6007_v30  ;;  %v3031_v30 = vld [vmem:[#allocation3 + $0x6] sm:$0x3] }
 0x625   :  { %v6716_v16 = vpop.eup %6715 }
 0x626   :  { %v2543_v26 = vadd.f32 1.0, %v6716_v16  ;;  %v3262_v16 = vld [vmem:[#allocation5 + $0x8] sm:$0x3] }
 0x628   :  { %6721 = vrcp.f32 %v2543_v26 }
 0x629   :  { %6723 = vpow2.f32 %v6012_v24 }
 0x62e   :  { %v6718_v63 = vpop.eup %6717 }
 0x62f   :  { %v2783_v29 = vadd.f32 1.0, %v6718_v63  ;;  %v6720_v60 = vpop.eup %6719 }
 0x630   :  { %v2552_v57 = vadd.f32 1.0, %v6720_v60 }
 0x631   :  { %6725 = vrcp.f32 %v2783_v29 }
 0x632   :  { %6727 = vrcp.f32 %v2552_v57 }
 0x635   :  { %v6722_v48 = vpop.eup %6721 }
 0x636   :  { %v6724_v27 = vpop.eup %6723  ;;  %v2557_v52 = vmul.f32 %v6722_v48, %v2534_v28 }
 0x637   :  { %v2792_v58 = vadd.f32 1.0, %v6724_v27  ;;  %v3271_v27 = vld [vmem:[#allocation6 + $0x8] sm:$0x3] }
 0x638   :  { %v2558_v54 = vadd.f32 %v2557_v52, %v2556_v53 }
 0x63a   :  { %6729 = vtanh.f32 %v2558_v54 }
 0x63b   :  { %6731 = vrcp.f32 %v2792_v58 }
 0x63e   :  { %v6726_v18 = vpop.eup %6725 }
 0x63f   :  { %v2797_v59 = vmul.f32 %v6726_v18, %v2774_v3  ;;  %v6728_v23 = vpop.eup %6727 }
 0x640   :  { %v2560_v62 = vsub.f32 1.0, %v6728_v23  ;;  %v2562_v37 = vmul.f32 %v6728_v23, %v7877_v45 }
 0x641   :  { %v2798_v50 = vadd.f32 %v2797_v59, %v2796_v43 }
 0x643   :  { %6733 = vtanh.f32 %v2798_v50  ;;  %v8069_v50 = vld [vmem:[#allocation26 + $0x2] ss:$0 sm:$0xff] }
 0x647   :  { %v6730_v36 = vpop.eup %6729 }
 0x648   :  { %v2561_v11 = vmul.f32 %v6730_v36, %v2560_v62  ;;  %v6732_v38 = vpop.eup %6731 }
 0x649   :  { %v2800_v56 = vsub.f32 1.0, %v6732_v38  ;;  %v2802_v40 = vmul.f32 %v6732_v38, %v7919_v20 }
 0x64a   :  { %v8001_v41 = vadd.f32 %v2562_v37, %v2561_v11  ;;  %v3040_v11 = vld [vmem:[#allocation4 + $0x6] sm:$0x3] }
 0x64c   :  { %2805 = vst.msk [vmem:[#allocation8 + $0x4] sm:$0x3] %vm1836_vm7, %v8001_v41  ;;  %6422 = vmatmul.mubr.msk.f32.vlgmr.msra.gmra.mxu1 %vm295_vm2, %v8001_v41  ;;  %6429 = vmatmul.mubr.msk.f32.vlgmr.msra.gmra.mxu0 %vm295_vm2, %v8001_v41 }
 0x64d   :  { %6432 = vmatpush3.msra.mxu1 %v7888_v1  ;;  %6439 = vmatpush3.msra.mxu0 %v7894_v6 }
 0x64e   :  { %6433 = vmatprep.subr.mxu1 %v7095_v25  ;;  %6435 = vmatprep.mubr.msk.f32.mxu1 %vm7096_vm5, %v7095_v25 }
 0x64f   :  { %6434 = vmatpush3.msra.mxu1 %v7903_v19  ;;  %6440 = vmatprep.subr.mxu0 %v7095_v25 }
 0x650   :  { %v6734_v39 = vpop.eup %6733  ;;  %6436 = vmatmul.mubr.msk.f32.vlgmr.msra.gmra.mxu1 %vm295_vm2, %v8001_v41  ;;  %6441 = vmatpush3.msra.mxu0 %v7913_v4 }
 0x651   :  { %v2801_v45 = vmul.f32 %v6734_v39, %v2800_v56  ;;  %6445 = vmatprep.subr.mxu1 %v7095_v25  ;;  %6442 = vmatprep.mubr.msk.f32.mxu0 %vm7096_vm5, %v7095_v25  ;;  %v8075_v56 = vld [vmem:[%s8504_s14 + $0x2] ss:$0 sm:$0xff] }
 0x652   :  { %6446 = vmatpush3.msra.mxu1 %v7924_v35  ;;  %6452 = vmatprep.subr.mxu0 %v7095_v25 }
 0x653   :  { %v8023_v31 = vadd.f32 %v2802_v40, %v2801_v45  ;;  %6447 = vmatprep.subr.mxu1 %v7095_v25  ;;  %6449 = vmatprep.mubr.msk.f32.mxu1 %vm7096_vm5, %v7095_v25 }
 0x654   :  { %6448 = vmatpush3.msra.mxu1 %v7936_v49 }
 0x655   :  { %2807 = vst.msk [vmem:[#allocation9 + $0xa] sm:$0x3] %vm1836_vm7, %v8023_v31  ;;  %6443 = vmatmul.mubr.msk.f32.vlgmr.msra.gmra.mxu0 %vm295_vm2, %v8023_v31  ;;  %6450 = vmatmul.mubr.msk.f32.vlgmr.msra.gmra.mxu1 %vm295_vm2, %v8023_v31 }
 0x656   :  { %6453 = vmatpush3.msra.mxu0 %v7944_v13  ;;  %6456 = vmatprep.mubr.msk.f32.mxu0 %vm7096_vm5, %v7095_v25 }
 0x657   :  { %6454 = vmatprep.subr.mxu0 %v7095_v25  ;;  %6459 = vmatprep.subr.mxu1 %v7095_v25 }
 0x658   :  { %6455 = vmatpush3.msra.mxu0 %v7955_v22  ;;  %6460 = vmatpush3.msra.mxu1 %v7965_v15 }
 0x659   :  { %6457 = vmatmul.mubr.msk.f32.vlgmr.msra.gmra.mxu0 %vm295_vm2, %v8023_v31  ;;  %6466 = vmatprep.subr.mxu0 %v7095_v25 }
 0x65a   :  { %6467 = vmatpush3.msra.mxu0 %v7971_v17  ;;  %6461 = vmatprep.subr.mxu1 %v7095_v25 }
 0x65b   :  { %6468 = vmatprep.subr.mxu0 %v7095_v25  ;;  %6462 = vmatpush3.msra.mxu1 %v7979_v46 }
 0x65c   :  { %6463 = vmatprep.mubr.msk.f32.mxu1 %vm7096_vm5, %v7095_v25  ;;  %6469 = vmatpush3.msra.mxu0 %v7987_v55 }
 0x65d   :  { %6470 = vmatprep.mubr.msk.f32.mxu0 %vm7096_vm5, %v7095_v25  ;;  %6473 = vmatprep.subr.mxu1 %v7095_v25 }
 0x65e   :  { %6480 = vmatprep.subr.mxu0 %v7095_v25 }
 0x70c   :  { %v2877_v20 = vpop.f32.mrf.mxu1  ;;  %v2947_v32 = vpop.f32.mrf.mxu0 }
 0x70d   :  { %v2878_v42 = vadd.f32 %v8058_v33, %v2877_v20  ;;  %v2948_v10 = vadd.f32 %v7731_v0, %v2947_v32  ;;  %v3280_v20 = vld [vmem:[#allocation7 + $0x8] sm:$0x3] }
 0x70e   :  { %v6423_v8 = vpop.f32.mrf.mxu1  ;;  %v6430_v51 = vpop.f32.mrf.mxu0 }
 0x70f   :  { %v3023_v2 = vadd.f32 %v3022_v34, %v2878_v42  ;;  %v3032_v12 = vadd.f32 %v3031_v30, %v2948_v10 }
 0x710   :  { %v3017_v9 = vpop.f32.mrf.mxu1 }
 0x711   :  { %v6016_v44 = vmul.f32 -1.442695, %v3023_v2  ;;  %v6017_v28 = vmul.f32 -1.442695, %v3032_v12 }
 0x712   :  { %v6437_v14 = vpop.f32.mrf.mxu1 }
 0x713   :  { %6735 = vpow2.f32 %v6016_v44 }
 0x715   :  { %v3117_v21 = vpop.f32.mrf.mxu0  ;;  %v3187_v26 = vpop.f32.mrf.mxu1 }
 0x716   :  { %v3118_v5 = vadd.f32 %v8065_v7, %v3117_v21  ;;  %v3188_v0 = vadd.f32 %v7748_v61, %v3187_v26  ;;  %v3018_v61 = vadd.f32 %v8069_v50, %v3017_v9 }
 0x717   :  { %v6444_v24 = vpop.f32.mrf.mxu0  ;;  %v6451_v29 = vpop.f32.mrf.mxu1 }
 0x718   :  { %v3263_v63 = vadd.f32 %v3262_v16, %v3118_v5  ;;  %v3272_v52 = vadd.f32 %v3271_v27, %v3188_v0  ;;  %v3506_v16 = vld [vmem:[#allocation2 + $0x8] sm:$0x3]  ;;  %v8137_v0 = vld [vmem:[#allocation26 + $0x1] ss:$0 sm:$0xff]  ;;  %v3515_v27 = vld [vmem:[#allocation3 + $0x8] sm:$0x3] }
 0x719   :  { %v3257_v57 = vpop.f32.mrf.mxu0 }
 0x71a   :  { %v6021_v60 = vmul.f32 -1.442695, %v3263_v63  ;;  %v6022_v54 = vmul.f32 -1.442695, %v3272_v52  ;;  %v3258_v39 = vadd.f32 %v8075_v56, %v3257_v57 }
 0x71b   :  { %v6458_v48 = vpop.f32.mrf.mxu0 }
 0x71c   :  { %6737 = vpow2.f32 %v6021_v60 }
 0x71d   :  { %6739 = vpow2.f32 %v6017_v28 }
 0x720   :  { %v6736_v53 = vpop.eup %6735 }
 0x721   :  { %v3027_v58 = vadd.f32 1.0, %v6736_v53 }
 0x723   :  { %6741 = vrcp.f32 %v3027_v58 }
 0x724   :  { %6743 = vpow2.f32 %v6022_v54  ;;  %v3746_v54 = vld [vmem:[#allocation5 + $0x6] sm:$0x3] }
 0x729   :  { %v6738_v3 = vpop.eup %6737 }
 0x72a   :  { %v3267_v18 = vadd.f32 1.0, %v6738_v3  ;;  %v6740_v59 = vpop.eup %6739 }
 0x72b   :  { %v3036_v43 = vadd.f32 1.0, %v6740_v59 }
 0x72c   :  { %6745 = vrcp.f32 %v3267_v18 }
 0x72d   :  { %6747 = vrcp.f32 %v3036_v43 }
 0x730   :  { %v6742_v23 = vpop.eup %6741 }
 0x731   :  { %v6744_v62 = vpop.eup %6743  ;;  %v3041_v36 = vmul.f32 %v6742_v23, %v3018_v61  ;;  %v8144_v61 = vld [vmem:[%s8504_s14 + $0x1] ss:$0 sm:$0xff] }
 0x732   :  { %v3276_v38 = vadd.f32 1.0, %v6744_v62 }
 0x733   :  { %v3042_v37 = vadd.f32 %v3041_v36, %v3040_v11 }
 0x735   :  { %6749 = vtanh.f32 %v3042_v37  ;;  %v3755_v37 = vld [vmem:[#allocation6 + $0x6] sm:$0x3] }
 0x736   :  { %6751 = vrcp.f32 %v3276_v38 }
 0x739   :  { %v6746_v45 = vpop.eup %6745 }
 0x73a   :  { %v3281_v40 = vmul.f32 %v6746_v45, %v3258_v39  ;;  %v6748_v42 = vpop.eup %6747 }
 0x73b   :  { %v3044_v34 = vsub.f32 1.0, %v6748_v42  ;;  %v3046_v2 = vmul.f32 %v6748_v42, %v8001_v41 }
 0x73c   :  { %v3282_v32 = vadd.f32 %v3281_v40, %v3280_v20 }
 0x73e   :  { %6753 = vtanh.f32 %v3282_v32 }
 0x742   :  { %v6750_v8 = vpop.eup %6749 }
 0x743   :  { %v3045_v51 = vmul.f32 %v6750_v8, %v3044_v34  ;;  %v6752_v9 = vpop.eup %6751 }
 0x744   :  { %v3284_v10 = vsub.f32 1.0, %v6752_v9  ;;  %v3286_v21 = vmul.f32 %v6752_v9, %v8023_v31 }
 0x745   :  { %v8079_v44 = vadd.f32 %v3046_v2, %v3045_v51 }
 0x747   :  { %3289 = vst.msk [vmem:[#allocation8 + $0x6] sm:$0x3] %vm1836_vm7, %v8079_v44  ;;  %6464 = vmatmul.mubr.msk.f32.vlgmr.msra.gmra.mxu1 %vm295_vm2, %v8079_v44  ;;  %6471 = vmatmul.mubr.msk.f32.vlgmr.msra.gmra.mxu0 %vm295_vm2, %v8079_v44 }
 0x748   :  { %6474 = vmatpush3.msra.mxu1 %v7888_v1  ;;  %6481 = vmatpush3.msra.mxu0 %v7894_v6 }
 0x749   :  { %6475 = vmatprep.subr.mxu1 %v7095_v25  ;;  %6477 = vmatprep.mubr.msk.f32.mxu1 %vm7096_vm5, %v7095_v25 }
 0x74a   :  { %6476 = vmatpush3.msra.mxu1 %v7903_v19  ;;  %6482 = vmatprep.subr.mxu0 %v7095_v25 }
 0x74b   :  { %v6754_v14 = vpop.eup %6753  ;;  %6478 = vmatmul.mubr.msk.f32.vlgmr.msra.gmra.mxu1 %vm295_vm2, %v8079_v44  ;;  %6483 = vmatpush3.msra.mxu0 %v7913_v4 }
 0x74c   :  { %v3285_v41 = vmul.f32 %v6754_v14, %v3284_v10  ;;  %6487 = vmatprep.subr.mxu1 %v7095_v25  ;;  %6484 = vmatprep.mubr.msk.f32.mxu0 %vm7096_vm5, %v7095_v25  ;;  %v3524_v10 = vld [vmem:[#allocation4 + $0x8] sm:$0x3] }
 0x74d   :  { %6488 = vmatpush3.msra.mxu1 %v7924_v35  ;;  %6494 = vmatprep.subr.mxu0 %v7095_v25 }
 0x74e   :  { %v8101_v30 = vadd.f32 %v3286_v21, %v3285_v41  ;;  %6489 = vmatprep.subr.mxu1 %v7095_v25  ;;  %6491 = vmatprep.mubr.msk.f32.mxu1 %vm7096_vm5, %v7095_v25 }
 0x74f   :  { %6490 = vmatpush3.msra.mxu1 %v7936_v49 }
 0x750   :  { %3291 = vst.msk [vmem:[#allocation9 + $0x8] sm:$0x3] %vm1836_vm7, %v8101_v30  ;;  %6485 = vmatmul.mubr.msk.f32.vlgmr.msra.gmra.mxu0 %vm295_vm2, %v8101_v30  ;;  %6492 = vmatmul.mubr.msk.f32.vlgmr.msra.gmra.mxu1 %vm295_vm2, %v8101_v30 }
 0x751   :  { %6495 = vmatpush3.msra.mxu0 %v7944_v13  ;;  %6498 = vmatprep.mubr.msk.f32.mxu0 %vm7096_vm5, %v7095_v25 }
 0x752   :  { %6496 = vmatprep.subr.mxu0 %v7095_v25  ;;  %6501 = vmatprep.subr.mxu1 %v7095_v25 }
 0x753   :  { %6497 = vmatpush3.msra.mxu0 %v7955_v22  ;;  %6502 = vmatpush3.msra.mxu1 %v7965_v15 }
 0x754   :  { %6499 = vmatmul.mubr.msk.f32.vlgmr.msra.gmra.mxu0 %vm295_vm2, %v8101_v30  ;;  %6508 = vmatprep.subr.mxu0 %v7095_v25 }
 0x755   :  { %6509 = vmatpush3.msra.mxu0 %v7971_v17  ;;  %6503 = vmatprep.subr.mxu1 %v7095_v25 }
 0x756   :  { %6510 = vmatprep.subr.mxu0 %v7095_v25  ;;  %6504 = vmatpush3.msra.mxu1 %v7979_v46 }
 0x757   :  { %6505 = vmatprep.mubr.msk.f32.mxu1 %vm7096_vm5, %v7095_v25  ;;  %6511 = vmatpush3.msra.mxu0 %v7987_v55 }
 0x758   :  { %6512 = vmatprep.mubr.msk.f32.mxu0 %vm7096_vm5, %v7095_v25  ;;  %6515 = vmatprep.subr.mxu1 %v7095_v25 }
 0x759   :  { %6522 = vmatprep.subr.mxu0 %v7095_v25 }
 0x807   :  { %v3361_v31 = vpop.f32.mrf.mxu1  ;;  %v3431_v5 = vpop.f32.mrf.mxu0 }
 0x808   :  { %v3362_v12 = vadd.f32 %v8058_v33, %v3361_v31  ;;  %v3432_v57 = vadd.f32 %v8137_v0, %v3431_v5 }
 0x809   :  { %v6465_v24 = vpop.f32.mrf.mxu1  ;;  %v6472_v26 = vpop.f32.mrf.mxu0 }
 0x80a   :  { %v3507_v63 = vadd.f32 %v3506_v16, %v3362_v12  ;;  %v3516_v53 = vadd.f32 %v3515_v27, %v3432_v57  ;;  %v3764_v12 = vld [vmem:[#allocation7 + $0x6] sm:$0x3] }
 0x80b   :  { %v3501_v29 = vpop.f32.mrf.mxu1 }
 0x80c   :  { %v6026_v60 = vmul.f32 -1.442695, %v3507_v63  ;;  %v6027_v36 = vmul.f32 -1.442695, %v3516_v53  ;;  %v3502_v8 = vadd.f32 %v8069_v50, %v3501_v29 }
 0x80d   :  { %v6479_v28 = vpop.f32.mrf.mxu1 }
 0x80e   :  { %6755 = vpow2.f32 %v6026_v60 }
 0x810   :  { %v3601_v48 = vpop.f32.mrf.mxu0  ;;  %v3671_v3 = vpop.f32.mrf.mxu1 }
 0x811   :  { %v3602_v52 = vadd.f32 %v8065_v7, %v3601_v48  ;;  %v3672_v23 = vadd.f32 %v8144_v61, %v3671_v3  ;;  %v3990_v3 = vld [vmem:[#allocation2 + $0xa] sm:$0x3] }
 0x812   :  { %v6486_v58 = vpop.f32.mrf.mxu0  ;;  %v6493_v59 = vpop.f32.mrf.mxu1 }
 0x813   :  { %v3747_v18 = vadd.f32 %v3746_v54, %v3602_v52  ;;  %v3756_v38 = vadd.f32 %v3755_v37, %v3672_v23 }
 0x814   :  { %v3741_v62 = vpop.f32.mrf.mxu0 }
 0x815   :  { %v6031_v43 = vmul.f32 -1.442695, %v3747_v18  ;;  %v6032_v45 = vmul.f32 -1.442695, %v3756_v38  ;;  %v3742_v21 = vadd.f32 %v8075_v56, %v3741_v62  ;;  %v3999_v38 = vld [vmem:[#allocation3 + $0xa] sm:$0x3] }
 0x816   :  { %v6500_v11 = vpop.f32.mrf.mxu0 }
 0x817   :  { %6757 = vpow2.f32 %v6031_v43 }
 0x818   :  { %6759 = vpow2.f32 %v6027_v36 }
 0x81b   :  { %v6756_v39 = vpop.eup %6755 }
 0x81c   :  { %v3511_v40 = vadd.f32 1.0, %v6756_v39 }
 0x81e   :  { %6761 = vrcp.f32 %v3511_v40  ;;  %v4230_v40 = vld [vmem:[#allocation5 + $0x4] sm:$0x3] }
 0x81f   :  { %6763 = vpow2.f32 %v6032_v45 }
 0x824   :  { %v6758_v20 = vpop.eup %6757 }
 0x825   :  { %v3751_v32 = vadd.f32 1.0, %v6758_v20  ;;  %v6760_v42 = vpop.eup %6759 }
 0x826   :  { %v3520_v34 = vadd.f32 1.0, %v6760_v42 }
 0x827   :  { %6765 = vrcp.f32 %v3751_v32 }
 0x828   :  { %6767 = vrcp.f32 %v3520_v34 }
 0x82b   :  { %v6762_v51 = vpop.eup %6761 }
 0x82c   :  { %v6764_v2 = vpop.eup %6763  ;;  %v3525_v9 = vmul.f32 %v6762_v51, %v3502_v8 }
 0x82d   :  { %v3760_v41 = vadd.f32 1.0, %v6764_v2 }
 0x82e   :  { %v3526_v14 = vadd.f32 %v3525_v9, %v3524_v10 }
 0x830   :  { %6769 = vtanh.f32 %v3526_v14  ;;  %v4239_v14 = vld [vmem:[#allocation6 + $0x4] sm:$0x3] }
 0x831   :  { %6771 = vrcp.f32 %v3760_v41 }
 0x834   :  { %v6766_v31 = vpop.eup %6765 }
 0x835   :  { %v3765_v5 = vmul.f32 %v6766_v31, %v3742_v21  ;;  %v6768_v24 = vpop.eup %6767 }
 0x836   :  { %v3528_v26 = vsub.f32 1.0, %v6768_v24  ;;  %v3530_v60 = vmul.f32 %v6768_v24, %v8079_v44 }
 0x837   :  { %v3766_v16 = vadd.f32 %v3765_v5, %v3764_v12 }
 0x839   :  { %6773 = vtanh.f32 %v3766_v16 }
 0x83d   :  { %v6770_v63 = vpop.eup %6769 }
 0x83e   :  { %v3529_v29 = vmul.f32 %v6770_v63, %v3528_v26  ;;  %v6772_v57 = vpop.eup %6771 }
 0x83f   :  { %v3768_v48 = vsub.f32 1.0, %v6772_v57  ;;  %v3770_v52 = vmul.f32 %v6772_v57, %v8101_v30 }
 0x840   :  { %v8150_v28 = vadd.f32 %v3530_v60, %v3529_v29 }
 0x842   :  { %3773 = vst.msk [vmem:[#allocation8 + $0x8] sm:$0x3] %vm1836_vm7, %v8150_v28  ;;  %6506 = vmatmul.mubr.msk.f32.vlgmr.msra.gmra.mxu1 %vm295_vm2, %v8150_v28  ;;  %6513 = vmatmul.mubr.msk.f32.vlgmr.msra.gmra.mxu0 %vm295_vm2, %v8150_v28 }
 0x843   :  { %6516 = vmatpush3.msra.mxu1 %v7888_v1  ;;  %6523 = vmatpush3.msra.mxu0 %v7894_v6 }
 0x844   :  { %6517 = vmatprep.subr.mxu1 %v7095_v25  ;;  %6519 = vmatprep.mubr.msk.f32.mxu1 %vm7096_vm5, %v7095_v25 }
 0x845   :  { %6518 = vmatpush3.msra.mxu1 %v7903_v19  ;;  %6524 = vmatprep.subr.mxu0 %v7095_v25 }
 0x846   :  { %v6774_v27 = vpop.eup %6773  ;;  %6520 = vmatmul.mubr.msk.f32.vlgmr.msra.gmra.mxu1 %vm295_vm2, %v8150_v28  ;;  %6525 = vmatpush3.msra.mxu0 %v7913_v4 }
 0x847   :  { %v3769_v44 = vmul.f32 %v6774_v27, %v3768_v48  ;;  %6529 = vmatprep.subr.mxu1 %v7095_v25  ;;  %6526 = vmatprep.mubr.msk.f32.mxu0 %vm7096_vm5, %v7095_v25  ;;  %v4008_v48 = vld [vmem:[#allocation4 + $0xa] sm:$0x3] }
 0x848   :  { %6530 = vmatpush3.msra.mxu1 %v7924_v35  ;;  %6536 = vmatprep.subr.mxu0 %v7095_v25 }
 0x849   :  { %v8172_v53 = vadd.f32 %v3770_v52, %v3769_v44  ;;  %6531 = vmatprep.subr.mxu1 %v7095_v25  ;;  %6533 = vmatprep.mubr.msk.f32.mxu1 %vm7096_vm5, %v7095_v25 }
 0x84a   :  { %6532 = vmatpush3.msra.mxu1 %v7936_v49 }
 0x84b   :  { %3775 = vst.msk [vmem:[#allocation9 + $0x6] sm:$0x3] %vm1836_vm7, %v8172_v53  ;;  %6527 = vmatmul.mubr.msk.f32.vlgmr.msra.gmra.mxu0 %vm295_vm2, %v8172_v53  ;;  %6534 = vmatmul.mubr.msk.f32.vlgmr.msra.gmra.mxu1 %vm295_vm2, %v8172_v53 }
 0x84c   :  { %6537 = vmatpush3.msra.mxu0 %v7944_v13  ;;  %6540 = vmatprep.mubr.msk.f32.mxu0 %vm7096_vm5, %v7095_v25 }
 0x84d   :  { %6538 = vmatprep.subr.mxu0 %v7095_v25  ;;  %6543 = vmatprep.subr.mxu1 %v7095_v25 }
 0x84e   :  { %6539 = vmatpush3.msra.mxu0 %v7955_v22  ;;  %6544 = vmatpush3.msra.mxu1 %v7965_v15 }
 0x84f   :  { %6541 = vmatmul.mubr.msk.f32.vlgmr.msra.gmra.mxu0 %vm295_vm2, %v8172_v53  ;;  %6550 = vmatprep.subr.mxu0 %v7095_v25 }
 0x850   :  { %6551 = vmatpush3.msra.mxu0 %v7971_v17  ;;  %6545 = vmatprep.subr.mxu1 %v7095_v25 }
 0x851   :  { %6552 = vmatprep.subr.mxu0 %v7095_v25  ;;  %6546 = vmatpush3.msra.mxu1 %v7979_v46 }
 0x852   :  { %6547 = vmatprep.mubr.msk.f32.mxu1 %vm7096_vm5, %v7095_v25  ;;  %6553 = vmatpush3.msra.mxu0 %v7987_v55 }
 0x853   :  { %6554 = vmatprep.mubr.msk.f32.mxu0 %vm7096_vm5, %v7095_v25  ;;  %6557 = vmatprep.subr.mxu1 %v7095_v25 }
 0x854   :  { %6564 = vmatprep.subr.mxu0 %v7095_v25 }
 0x902   :  { %v3845_v30 = vpop.f32.mrf.mxu1  ;;  %v3915_v54 = vpop.f32.mrf.mxu0 }
 0x903   :  { %v3846_v58 = vadd.f32 %v8058_v33, %v3845_v30  ;;  %v3916_v36 = vadd.f32 %v8137_v0, %v3915_v54 }
 0x904   :  { %v6507_v18 = vpop.f32.mrf.mxu1  ;;  %v6514_v59 = vpop.f32.mrf.mxu0 }
 0x905   :  { %v3991_v43 = vadd.f32 %v3990_v3, %v3846_v58  ;;  %v4000_v45 = vadd.f32 %v3999_v38, %v3916_v36  ;;  %v4248_v58 = vld [vmem:[#allocation7 + $0x4] sm:$0x3] }
 0x906   :  { %v3985_v23 = vpop.f32.mrf.mxu1 }
 0x907   :  { %v6036_v62 = vmul.f32 -1.442695, %v3991_v43  ;;  %v6037_v9 = vmul.f32 -1.442695, %v4000_v45  ;;  %v3986_v63 = vadd.f32 %v8069_v50, %v3985_v23  ;;  %v4483_v45 = vld [vmem:[#allocation3 + $0xc] sm:$0x3] }
 0x908   :  { %v6521_v11 = vpop.f32.mrf.mxu1 }
 0x909   :  { %6775 = vpow2.f32 %v6036_v62 }
 0x90b   :  { %v4085_v37 = vpop.f32.mrf.mxu0  ;;  %v4155_v32 = vpop.f32.mrf.mxu1 }
 0x90c   :  { %v4086_v39 = vadd.f32 %v8065_v7, %v4085_v37  ;;  %v4156_v51 = vadd.f32 %v8144_v61, %v4155_v32  ;;  %v4714_v32 = vld [vmem:[#allocation5 + $0x2] sm:$0x3] }
 0x90d   :  { %v6528_v20 = vpop.f32.mrf.mxu0  ;;  %v6535_v34 = vpop.f32.mrf.mxu1 }
 0x90e   :  { %v4231_v42 = vadd.f32 %v4230_v40, %v4086_v39  ;;  %v4240_v41 = vadd.f32 %v4239_v14, %v4156_v51 }
 0x90f   :  { %v4225_v2 = vpop.f32.mrf.mxu0 }
 0x910   :  { %v6041_v8 = vmul.f32 -1.442695, %v4231_v42  ;;  %v6042_v31 = vmul.f32 -1.442695, %v4240_v41  ;;  %v4226_v52 = vadd.f32 %v8075_v56, %v4225_v2 }
 0x911   :  { %v6542_v10 = vpop.f32.mrf.mxu0 }
 0x912   :  { %6777 = vpow2.f32 %v6041_v8 }
 0x913   :  { %6779 = vpow2.f32 %v6037_v9 }
 0x916   :  { %v6776_v21 = vpop.eup %6775 }
 0x917   :  { %v3995_v5 = vadd.f32 1.0, %v6776_v21  ;;  %v4723_v21 = vld [vmem:[#allocation6 + $0x2] sm:$0x3] }
 0x919   :  { %6781 = vrcp.f32 %v3995_v5 }
 0x91a   :  { %6783 = vpow2.f32 %v6042_v31 }
 0x91f   :  { %v6778_v12 = vpop.eup %6777 }
 0x920   :  { %v4235_v16 = vadd.f32 1.0, %v6778_v12  ;;  %v6780_v24 = vpop.eup %6779 }
 0x921   :  { %v4004_v26 = vadd.f32 1.0, %v6780_v24 }
 0x922   :  { %6785 = vrcp.f32 %v4235_v16 }
 0x923   :  { %6787 = vrcp.f32 %v4004_v26 }
 0x926   :  { %v6782_v29 = vpop.eup %6781 }
 0x927   :  { %v6784_v60 = vpop.eup %6783  ;;  %v4009_v57 = vmul.f32 %v6782_v29, %v3986_v63 }
 0x928   :  { %v4244_v44 = vadd.f32 1.0, %v6784_v60 }
 0x929   :  { %v4010_v27 = vadd.f32 %v4009_v57, %v4008_v48 }
 0x92b   :  { %6789 = vtanh.f32 %v4010_v27 }
 0x92c   :  { %6791 = vrcp.f32 %v4244_v44  ;;  %v4492_v44 = vld [vmem:[#allocation4 + $0xc] sm:$0x3] }
 0x92f   :  { %v6786_v30 = vpop.eup %6785 }
 0x930   :  { %v4249_v54 = vmul.f32 %v6786_v30, %v4226_v52  ;;  %v6788_v18 = vpop.eup %6787 }
 0x931   :  { %v4012_v59 = vsub.f32 1.0, %v6788_v18  ;;  %v4014_v62 = vmul.f32 %v6788_v18, %v8150_v28  ;;  %v4732_v18 = vld [vmem:[#allocation7 + $0x2] sm:$0x3] }
 0x932   :  { %v4250_v3 = vadd.f32 %v4249_v54, %v4248_v58 }
 0x934   :  { %6793 = vtanh.f32 %v4250_v3 }
 0x938   :  { %v6790_v43 = vpop.eup %6789 }
 0x939   :  { %v4013_v23 = vmul.f32 %v6790_v43, %v4012_v59  ;;  %v6792_v36 = vpop.eup %6791 }
 0x93a   :  { %v4252_v37 = vsub.f32 1.0, %v6792_v36  ;;  %v4254_v39 = vmul.f32 %v6792_v36, %v8172_v53 }
 0x93b   :  { %v8214_v11 = vadd.f32 %v4014_v62, %v4013_v23 }
 0x93d   :  { %4257 = vst.msk [vmem:[#allocation8 + $0xa] sm:$0x3] %vm1836_vm7, %v8214_v11  ;;  %6548 = vmatmul.mubr.msk.f32.vlgmr.msra.gmra.mxu1 %vm295_vm2, %v8214_v11  ;;  %6555 = vmatmul.mubr.msk.f32.vlgmr.msra.gmra.mxu0 %vm295_vm2, %v8214_v11 }
 0x93e   :  { %6558 = vmatpush3.msra.mxu1 %v7888_v1  ;;  %6565 = vmatpush3.msra.mxu0 %v7894_v6 }
 0x93f   :  { %6559 = vmatprep.subr.mxu1 %v7095_v25  ;;  %6561 = vmatprep.mubr.msk.f32.mxu1 %vm7096_vm5, %v7095_v25 }
 0x940   :  { %6560 = vmatpush3.msra.mxu1 %v7903_v19  ;;  %6566 = vmatprep.subr.mxu0 %v7095_v25 }
 0x941   :  { %v6794_v38 = vpop.eup %6793  ;;  %6562 = vmatmul.mubr.msk.f32.vlgmr.msra.gmra.mxu1 %vm295_vm2, %v8214_v11  ;;  %6567 = vmatpush3.msra.mxu0 %v7913_v4 }
 0x942   :  { %v4253_v28 = vmul.f32 %v6794_v38, %v4252_v37  ;;  %6571 = vmatprep.subr.mxu1 %v7095_v25  ;;  %6568 = vmatprep.mubr.msk.f32.mxu0 %vm7096_vm5, %v7095_v25  ;;  %v7100_v38 = vmov 1983009808  }
 0x943   :  { %6572 = vmatpush3.msra.mxu1 %v7924_v35  ;;  %6578 = vmatprep.subr.mxu0 %v7095_v25  ;;  %v4474_v35 = vld [vmem:[#allocation2 + $0xc] sm:$0x3] }
 0x944   :  { %v8236_v1 = vadd.f32 %v4254_v39, %v4253_v28  ;;  %6573 = vmatprep.subr.mxu1 %v7095_v25  ;;  %6575 = vmatprep.mubr.msk.f32.mxu1 %vm7096_vm5, %v7095_v25  ;;  %v5256_v28 = vunpack.c.l.s4 %v7100_v38 }
 0x945   :  { %6574 = vmatpush3.msra.mxu1 %v7936_v49 }
 0x946   :  { %4259 = vst.msk [vmem:[#allocation9 + $0x4] sm:$0x3] %vm1836_vm7, %v8236_v1  ;;  %6569 = vmatmul.mubr.msk.f32.vlgmr.msra.gmra.mxu0 %vm295_vm2, %v8236_v1  ;;  %6576 = vmatmul.mubr.msk.f32.vlgmr.msra.gmra.mxu1 %vm295_vm2, %v8236_v1 }
 0x947   :  { %6579 = vmatpush3.msra.mxu0 %v7944_v13  ;;  %6582 = vmatprep.mubr.msk.f32.mxu0 %vm7096_vm5, %v7095_v25 }
 0x948   :  { %6580 = vmatprep.subr.mxu0 %v7095_v25  ;;  %6585 = vmatprep.subr.mxu1 %v7095_v25 }
 0x949   :  { %6581 = vmatpush3.msra.mxu0 %v7955_v22  ;;  %6586 = vmatpush3.msra.mxu1 %v7965_v15 }
 0x94a   :  { %6583 = vmatmul.mubr.msk.f32.vlgmr.msra.gmra.mxu0 %vm295_vm2, %v8236_v1  ;;  %6592 = vmatprep.subr.mxu0 %v7095_v25 }
 0x94b   :  { %6593 = vmatpush3.msra.mxu0 %v7971_v17  ;;  %6587 = vmatprep.subr.mxu1 %v7095_v25 }
 0x94c   :  { %6594 = vmatprep.subr.mxu0 %v7095_v25  ;;  %6588 = vmatpush3.msra.mxu1 %v7979_v46 }
 0x94d   :  { %6589 = vmatprep.mubr.msk.f32.mxu1 %vm7096_vm5, %v7095_v25  ;;  %6595 = vmatpush3.msra.mxu0 %v7987_v55 }
 0x94e   :  { %6596 = vmatprep.mubr.msk.f32.mxu0 %vm7096_vm5, %v7095_v25  ;;  %6599 = vmatprep.subr.mxu1 %v7095_v25 }
 0x94f   :  { %6606 = vmatprep.subr.mxu0 %v7095_v25 }
 0x9fd   :  { %v4329_v6 = vpop.f32.mrf.mxu1  ;;  %v4399_v19 = vpop.f32.mrf.mxu0 }
 0x9fe   :  { %v4330_v4 = vadd.f32 %v8058_v33, %v4329_v6  ;;  %v4400_v46 = vadd.f32 %v8137_v0, %v4399_v19  ;;  %v5227_v19 = vld [vmem:[#allocation8 + $0x6] sm:$0x3] }
 0x9ff   :  { %v6549_v49 = vpop.f32.mrf.mxu1  ;;  %v6556_v13 = vpop.f32.mrf.mxu0 }
 0xa00   :  { %v4475_v22 = vadd.f32 %v4474_v35, %v4330_v4  ;;  %v4484_v20 = vadd.f32 %v4483_v45, %v4400_v46  ;;  %v6861_v4 = vld [vmem:[%s8501_s11 + $0x28] sm:$0xff]  ;;  %v5257_v49 = vunpack.c.0.s8 %v5256_v28  ;;  %v6864_v45 = vld [vmem:[%s8503_s13] sm:$0xff] }
 0xa01   :  { %v4469_v15 = vpop.f32.mrf.mxu1 }
 0xa02   :  { %v6046_v17 = vmul.f32 -1.442695, %v4475_v22  ;;  %v6047_v14 = vmul.f32 -1.442695, %v4484_v20  ;;  %v4470_v60 = vadd.f32 %v8069_v50, %v4469_v15  ;;  %v5225_v22 = vld [vmem:[#allocation8 + $0x2] sm:$0x3] }
 0xa03   :  { %v6563_v55 = vpop.f32.mrf.mxu1  ;;  %v5226_v15 = vld [vmem:[#allocation8 + $0x4] sm:$0x3] }
 0xa04   :  { %6795 = vpow2.f32 %v6046_v17  ;;  %v6863_v17 = vld [vmem:[%s8501_s11 + $0x20] sm:$0xff] }
 0xa06   :  { %v4569_v53 = vpop.f32.mrf.mxu0  ;;  %v4639_v34 = vpop.f32.mrf.mxu1 }
 0xa07   :  { %v4570_v40 = vadd.f32 %v8065_v7, %v4569_v53  ;;  %v4640_v9 = vadd.f32 %v8144_v61, %v4639_v34  ;;  %v5375_v53 = vcombine.low %v5226_v15, %v5227_v19  ;;  %v4976_v15 = vld [vmem:[#allocation4 + $0xe] sm:$0x3] }
 0xa08   :  { %v6570_v42 = vpop.f32.mrf.mxu0  ;;  %v6577_v51 = vpop.f32.mrf.mxu1 }
 0xa09   :  { %v4715_v8 = vadd.f32 %v4714_v32, %v4570_v40  ;;  %v4724_v31 = vadd.f32 %v4723_v21, %v4640_v9  ;;  %v5224_v40 = vld [vmem:[#allocation8] sm:$0x3]  ;;  %v8311_v32 = vsub.s32 %v5257_v49, %v7377_v47  ;;  %v6865_v42 = vld [vmem:[%s8503_s13 + $0x18] sm:$0xff]  ;;  %v6866_v47 = vld [vmem:[%s8503_s13 + $0x10] sm:$0xff] }
 0xa0a   :  { %v4709_v10 = vpop.f32.mrf.mxu0  ;;  %v6063_v21 = vld [vmem:[%s8505_s15 + $0x10] sm:$0xff] }
 0xa0b   :  { %v6051_v2 = vmul.f32 -1.442695, %v4715_v8  ;;  %v6052_v12 = vmul.f32 -1.442695, %v4724_v31  ;;  %v4710_v54 = vadd.f32 %v8075_v56, %v4709_v10  ;;  %v5389_v34 = vrot.slane %v5375_v53, %v8311_v32  ;;  %v6867_v8 = vld [vmem:[%s8503_s13 + $0x28] sm:$0xff]  ;;  %v8367_v31 = vld [vmem:[%s8507_s17 + $0x18] sm:$0xff] }
 0xa0c   :  { %v6584_v41 = vpop.f32.mrf.mxu0  ;;  %v5241_v10 = vld [vmem:[%s8505_s15 + $0x8] sm:$0xff] }
 0xa0d   :  { %6797 = vpow2.f32 %v6051_v2  ;;  %v6868_v2 = vld [vmem:[%s8503_s13 + $0x20] sm:$0xff]  ;;  %v6064_v41 = vld [vmem:[%s8505_s15 + $0x18] sm:$0xff] }
 0xa0e   :  { %6799 = vpow2.f32 %v6047_v14  ;;  %v8355_v14 = vld [vmem:[%s8507_s17 + $0x8] sm:$0xff] }
 0xa11   :  { %v6796_v5 = vpop.eup %6795 }
 0xa12   :  { %v4479_v16 = vadd.f32 1.0, %v6796_v5 }
 0xa14   :  { %6801 = vrcp.f32 %v4479_v16 }
 0xa15   :  { %6803 = vpow2.f32 %v6052_v12 }
 0xa1a   :  { %v6798_v24 = vpop.eup %6797 }
 0xa1b   :  { %v4719_v26 = vadd.f32 1.0, %v6798_v24  ;;  %v6800_v63 = vpop.eup %6799  ;;  %v4958_v24 = vld [vmem:[#allocation2 + $0xe] sm:$0x3] }
 0xa1c   :  { %v4488_v29 = vadd.f32 1.0, %v6800_v63 }
 0xa1d   :  { %6805 = vrcp.f32 %v4719_v26 }
 0xa1e   :  { %6807 = vrcp.f32 %v4488_v29 }
 0xa21   :  { %v6802_v57 = vpop.eup %6801 }
 0xa22   :  { %v6804_v48 = vpop.eup %6803  ;;  %v4493_v27 = vmul.f32 %v6802_v57, %v4470_v60 }
 0xa23   :  { %v4728_v30 = vadd.f32 1.0, %v6804_v48 }
 0xa24   :  { %v4494_v52 = vadd.f32 %v4493_v27, %v4492_v44 }
 0xa26   :  { %6809 = vtanh.f32 %v4494_v52  ;;  %v4967_v52 = vld [vmem:[#allocation3 + $0xe] sm:$0x3] }
 0xa27   :  { %6811 = vrcp.f32 %v4728_v30 }
 0xa2a   :  { %v6806_v58 = vpop.eup %6805 }
 0xa2b   :  { %v4733_v3 = vmul.f32 %v6806_v58, %v4710_v54  ;;  %v6808_v43 = vpop.eup %6807  ;;  %v5197_v58 = vld [vmem:[#allocation5] sm:$0x3] }
 0xa2c   :  { %v4496_v23 = vsub.f32 1.0, %v6808_v43  ;;  %v4498_v37 = vmul.f32 %v6808_v43, %v8214_v11  ;;  %v6862_v11 = vld [vmem:[%s8503_s13 + $0x8] sm:$0xff] }
 0xa2d   :  { %v4734_v59 = vadd.f32 %v4733_v3, %v4732_v18 }
 0xa2f   :  { %6813 = vtanh.f32 %v4734_v59 }
 0xa33   :  { %v6810_v62 = vpop.eup %6809 }
 0xa34   :  { %v4497_v36 = vmul.f32 %v6810_v62, %v4496_v23  ;;  %v6812_v39 = vpop.eup %6811 }
 0xa35   :  { %v4736_v35 = vsub.f32 1.0, %v6812_v39  ;;  %v4738_v55 = vmul.f32 %v6812_v39, %v8236_v1  ;;  %v5374_v1 = vcombine.low %v5224_v40, %v5225_v22  ;;  %v5213_v40 = vld [vmem:[#allocation7] sm:$0x3] }
 0xa36   :  { %v8278_v6 = vadd.f32 %v4498_v37, %v4497_v36 }
 0xa37   :  { %v5382_v51 = vrot.slane %v5374_v1, %v8311_v32 }
 0xa38   :  { %4741 = vst.msk [vmem:[#allocation8 + $0xc] sm:$0x3] %vm1836_vm7, %v8278_v6  ;;  %6590 = vmatmul.mubr.msk.f32.vlgmr.msra.gmra.mxu1 %vm295_vm2, %v8278_v6  ;;  %6597 = vmatmul.mubr.msk.f32.vlgmr.msra.gmra.mxu0 %vm295_vm2, %v8278_v6 }
 0xa39   :  { %6600 = vmatpush3.msra.mxu1 %v6861_v4  ;;  %6607 = vmatpush3.msra.mxu0 %v6862_v11  ;;  %v8340_v9 = vcombine.low %v5382_v51, %v5389_v34 }
 0xa3a   :  { %6601 = vmatprep.subr.mxu1 %v7095_v25  ;;  %6603 = vmatprep.mubr.msk.f32.mxu1 %vm7096_vm5, %v7095_v25 }
 0xa3b   :  { %6602 = vmatpush3.msra.mxu1 %v6863_v17  ;;  %6608 = vmatprep.subr.mxu0 %v7095_v25 }
 0xa3c   :  { %v6814_v13 = vpop.eup %6813  ;;  %6604 = vmatmul.mubr.msk.f32.vlgmr.msra.gmra.mxu1 %vm295_vm2, %v8278_v6  ;;  %6609 = vmatpush3.msra.mxu0 %v6864_v45 }
 0xa3d   :  { %v4737_v46 = vmul.f32 %v6814_v13, %v4736_v35  ;;  %6613 = vmatprep.subr.mxu1 %v7095_v25  ;;  %6610 = vmatprep.mubr.msk.f32.mxu0 %vm7096_vm5, %v7095_v25 }
 0xa3e   :  { %6614 = vmatpush3.msra.mxu1 %v6865_v42  ;;  %6620 = vmatprep.subr.mxu0 %v7095_v25 }
 0xa3f   :  { %v8308_v20 = vadd.f32 %v4738_v55, %v4737_v46  ;;  %6615 = vmatprep.subr.mxu1 %v7095_v25  ;;  %6617 = vmatprep.mubr.msk.f32.mxu1 %vm7096_vm5, %v7095_v25 }
 0xa40   :  { %6616 = vmatpush3.msra.mxu1 %v6866_v47 }
 0xa41   :  { %4743 = vst.msk [vmem:[#allocation9 + $0x2] sm:$0x3] %vm1836_vm7, %v8308_v20  ;;  %6611 = vmatmul.mubr.msk.f32.vlgmr.msra.gmra.mxu0 %vm295_vm2, %v8308_v20  ;;  %6618 = vmatmul.mubr.msk.f32.vlgmr.msra.gmra.mxu1 %vm295_vm2, %v8308_v20 }
 0xa42   :  { %6621 = vmatpush3.msra.mxu0 %v6867_v8  ;;  %6624 = vmatprep.mubr.msk.f32.mxu0 %vm7096_vm5, %v7095_v25 }
 0xa43   :  { %6622 = vmatprep.subr.mxu0 %v7095_v25  ;;  %v5240_v25 = vld [vmem:[%s8505_s15] sm:$0xff]  ;;  %6627 = vmatprep.subr.mxu1 %v6064_v41 }
 0xa44   :  { %6623 = vmatpush3.msra.mxu0 %v6868_v2  ;;  %6628 = vmatpush3.msra.mxu1 %v6064_v41 }
 0xa45   :  { %6625 = vmatmul.mubr.msk.f32.vlgmr.msra.gmra.mxu0 %vm295_vm2, %v8308_v20  ;;  %6634 = vmatprep.subr.mxu0 %v5241_v10 }
 0xa46   :  { %6638 = vmatprep.mubr.msk.f32.mxu0 %vm295_vm2, %v8340_v9  ;;  %6635 = vmatpush3.msra.mxu0 %v5241_v10 }
 0xa47   :  { %6636 = vmatprep.subr.mxu0 %v5240_v25  ;;  %6629 = vmatprep.subr.mxu1 %v6063_v21 }
 0xa48   :  { %6637 = vmatpush3.msra.mxu0 %v5240_v25  ;;  %6630 = vmatpush3.msra.mxu1 %v6063_v21  ;;  %v5229_v21 = vld [vmem:[#allocation8 + $0xa] sm:$0x3] }
 0xa49   :  { %6648 = vmatprep.subr.mxu0 %v8355_v14  ;;  %6641 = vmatprep.subr.mxu1 %v8367_v31 }
 0xaf8   :  { %v4813_v5 = vpop.f32.mrf.mxu1  ;;  %v4883_v12 = vpop.f32.mrf.mxu0 }
 0xaf9   :  { %v4814_v16 = vadd.f32 %v8058_v33, %v4813_v5  ;;  %v4884_v48 = vadd.f32 %v8137_v0, %v4883_v12  ;;  %v5205_v0 = vld [vmem:[#allocation6] sm:$0x3]  ;;  %v5228_v12 = vld [vmem:[#allocation8 + $0x8] sm:$0x3] }
 0xafa   :  { %v6591_v26 = vpop.f32.mrf.mxu1  ;;  %v6598_v63 = vpop.f32.mrf.mxu0 }
 0xafb   :  { %v4959_v29 = vadd.f32 %v4958_v24, %v4814_v16  ;;  %v4968_v54 = vadd.f32 %v4967_v52, %v4884_v48  ;;  %v5391_v16 = vcombine.low %v5228_v12, %v5229_v21  ;;  %v5230_v24 = vld [vmem:[#allocation8 + $0xc] sm:$0x3]  ;;  %v5237_v48 = vld [vmem:[#allocation9 + $0xa] sm:$0x3] }
 0xafc   :  { %v4953_v60 = vpop.f32.mrf.mxu1 }
 0xafd   :  { %v6056_v57 = vmul.f32 -1.442695, %v4959_v29  ;;  %v6057_v36 = vmul.f32 -1.442695, %v4968_v54  ;;  %v4954_v49 = vadd.f32 %v8069_v50, %v4953_v60  ;;  %v5399_v29 = vrot.slane %v5391_v16, %v8311_v32 }
 0xafe   :  { %v6605_v27 = vpop.f32.mrf.mxu1 }
 0xaff   :  { %6815 = vpow2.f32 %v6056_v57  ;;  %v5234_v57 = vld [vmem:[#allocation9 + $0x4] sm:$0x3]  ;;  %v5238_v27 = vld [vmem:[#allocation9 + $0xc] sm:$0x3] }
 0xb01   :  { %v5053_v44 = vpop.f32.mrf.mxu0  ;;  %v5123_v18 = vpop.f32.mrf.mxu1 }
 0xb02   :  { %v5054_v30 = vadd.f32 %v8065_v7, %v5053_v44  ;;  %v5124_v23 = vadd.f32 %v8144_v61, %v5123_v18  ;;  %v5233_v18 = vld [vmem:[#allocation9 + $0x2] sm:$0x3] }
 0xb03   :  { %v6612_v3 = vpop.f32.mrf.mxu0  ;;  %v6619_v33 = vpop.f32.mrf.mxu1 }
 0xb04   :  { %v5198_v59 = vadd.f32 %v5197_v58, %v5054_v30  ;;  %v5206_v38 = vadd.f32 %v5205_v0, %v5124_v23  ;;  %v5496_v30 = vld [vmem:[%s8507_s17] sm:$0xff]  ;;  %v5239_v58 = vld [vmem:[#allocation9 + $0xe] sm:$0x3] }
 0xb05   :  { %v5193_v62 = vpop.f32.mrf.mxu0 }
 0xb06   :  { %v6061_v43 = vmul.f32 -1.442695, %v5198_v59  ;;  %v6062_v39 = vmul.f32 -1.442695, %v5206_v38  ;;  %v5194_v55 = vadd.f32 %v8075_v56, %v5193_v62  ;;  %v5271_v59 = vcombine.low %v5238_v27, %v5239_v58 }
 0xb07   :  { %v6626_v37 = vpop.f32.mrf.mxu0 }
 0xb08   :  { %6817 = vpow2.f32 %v6061_v43 }
 0xb09   :  { %6819 = vpow2.f32 %v6057_v36  ;;  %v5285_v36 = vrot.slane %v5271_v59, %v8311_v32 }
 0xb0c   :  { %v6816_v28 = vpop.eup %6815 }
 0xb0d   :  { %v4963_v19 = vadd.f32 1.0, %v6816_v28 }
 0xb0f   :  { %6821 = vrcp.f32 %v4963_v19 }
 0xb10   :  { %6823 = vpow2.f32 %v6062_v39  ;;  %v6069_v39 = vld [vmem:[%s8506_s16] ss:$0 sm:$0xff] }
 0xb15   :  { %v6818_v7 = vpop.eup %6817 }
 0xb16   :  { %v5202_v4 = vadd.f32 1.0, %v6818_v7  ;;  %v6820_v11 = vpop.eup %6819 }
 0xb17   :  { %v4972_v35 = vadd.f32 1.0, %v6820_v11 }
 0xb18   :  { %6825 = vrcp.f32 %v5202_v4 }
 0xb19   :  { %6827 = vrcp.f32 %v4972_v35 }
 0xb1c   :  { %v6822_v61 = vpop.eup %6821 }
 0xb1d   :  { %v6824_v13 = vpop.eup %6823  ;;  %v4977_v22 = vmul.f32 %v6822_v61, %v4954_v49 }
 0xb1e   :  { %v5210_v46 = vadd.f32 1.0, %v6824_v13 }
 0xb1f   :  { %v4978_v17 = vadd.f32 %v4977_v22, %v4976_v15  ;;  %v6076_v15 = vld [vmem:[%s8508_s18] ss:$0 sm:$0xff] }
 0xb21   :  { %6829 = vtanh.f32 %v4978_v17 }
 0xb22   :  { %6831 = vrcp.f32 %v5210_v46 }
 0xb25   :  { %v6826_v53 = vpop.eup %6825 }
 0xb26   :  { %v5214_v45 = vmul.f32 %v6826_v53, %v5194_v55  ;;  %v6828_v42 = vpop.eup %6827 }
 0xb27   :  { %v4980_v34 = vsub.f32 1.0, %v6828_v42  ;;  %v4982_v50 = vmul.f32 %v6828_v42, %v8278_v6  ;;  %v5236_v6 = vld [vmem:[#allocation9 + $0x8] sm:$0x3] }
 0xb28   :  { %v5215_v1 = vadd.f32 %v5214_v45, %v5213_v40  ;;  %v5270_v52 = vcombine.low %v5236_v6, %v5237_v48 }
 0xb2a   :  { %6833 = vtanh.f32 %v5215_v1  ;;  %v5278_v43 = vrot.slane %v5270_v52, %v8311_v32 }
 0xb2c   :  { %v5286_v0 = vcombine.low %v5278_v43, %v5285_v36 }
 0xb2e   :  { %v6830_v47 = vpop.eup %6829 }
 0xb2f   :  { %v4981_v8 = vmul.f32 %v6830_v47, %v4980_v34  ;;  %v6832_v51 = vpop.eup %6831 }
 0xb30   :  { %v5217_v10 = vsub.f32 1.0, %v6832_v51  ;;  %v5219_v56 = vmul.f32 %v6832_v51, %v8308_v20  ;;  %v5235_v20 = vld [vmem:[#allocation9 + $0x6] sm:$0x3] }
 0xb31   :  { %v4983_v2 = vadd.f32 %v4982_v50, %v4981_v8  ;;  %v5254_v54 = vcombine.low %v5234_v57, %v5235_v20 }
 0xb33   :  { %5222 = vst.msk [vmem:[#allocation8 + $0xe] sm:$0x3] %vm1836_vm7, %v4983_v2  ;;  %v5268_v62 = vrot.slane %v5254_v54, %v8311_v32 }
 0xb37   :  { %v6834_v25 = vpop.eup %6833 }
 0xb38   :  { %v5218_v41 = vmul.f32 %v6834_v25, %v5217_v10 }
 0xb3a   :  { %v5220_v5 = vadd.f32 %v5219_v56, %v5218_v41  ;;  %v5231_v26 = vld [vmem:[#allocation8 + $0xe] sm:$0x3] }
 0xb3b   :  { %v5392_v63 = vcombine.low %v5230_v24, %v5231_v26 }
 0xb3c   :  { %5223 = vst.msk [vmem:[#allocation9] sm:$0x3] %vm1836_vm7, %v5220_v5 }
 0xb3d   :  { %v5406_v60 = vrot.slane %v5392_v63, %v8311_v32 }
 0xb3f   :  { %v5407_v44 = vcombine.low %v5399_v29, %v5406_v60 }
 0xb41   :  { %6639 = vmatmul.mubr.msk.f32.vlgmr.msra.gmra.mxu0 %vm295_vm2, %v5407_v44 }
 0xb42   :  { %6649 = vmatpush3.msra.mxu0 %v8355_v14  ;;  %6652 = vmatprep.mubr.msk.f32.mxu0 %vm295_vm2, %v8340_v9  ;;  %v6070_v9 = vld [vmem:[%s8507_s17 + $0x10] sm:$0xff] }
 0xb43   :  { %v5232_v3 = vld [vmem:[#allocation9] sm:$0x3]  ;;  %6650 = vmatprep.subr.mxu0 %v5496_v30 }
 0xb44   :  { %v5253_v33 = vcombine.low %v5232_v3, %v5233_v18  ;;  %6651 = vmatpush3.msra.mxu0 %v5496_v30 }
 0xb45   :  { %6653 = vmatmul.mubr.msk.f32.vlgmr.msra.gmra.mxu0 %vm295_vm2, %v5407_v44 }
 0xb46   :  { %v5261_v23 = vrot.slane %v5253_v33, %v8311_v32 }
 0xb48   :  { %v5269_v37 = vcombine.low %v5261_v23, %v5268_v62 }
 0xb4a   :  { %6631 = vmatprep.mubr.msk.f32.mxu1 %vm295_vm2, %v5269_v37 }
 0xb4b   :  { %6632 = vmatmul.mubr.msk.f32.vlgmr.msra.gmra.mxu1 %vm295_vm2, %v5286_v0 }
 0xb4c   :  { %6642 = vmatpush3.msra.mxu1 %v8367_v31  ;;  %6645 = vmatprep.mubr.msk.f32.mxu1 %vm295_vm2, %v5269_v37 }
 0xb4d   :  { %6643 = vmatprep.subr.mxu1 %v6070_v9 }
 0xb4e   :  { %6644 = vmatpush3.msra.mxu1 %v6070_v9 }
 0xb4f   :  { %6646 = vmatmul.mubr.msk.f32.vlgmr.msra.gmra.mxu1 %vm295_vm2, %v5286_v0 }
 0xc01   :  { %v6640_v14 = vpop.f32.mrf.mxu0 }
 0xc03   :  { %v5478_v38 = vpop.f32.mrf.mxu0 }
 0xc05   :  { %v6654_v4 = vpop.f32.mrf.mxu0 }
 0xc07   :  { %v5642_v46 = vpop.f32.mrf.mxu0 }
 0xc0b   :  { %v6633_v28 = vpop.f32.mrf.mxu1 }
 0xc0c   :  { %v5484_v19 = vadd.f32 %v6640_v14, %v6633_v28 }
 0xc0d   :  { %v5357_v7 = vpop.f32.mrf.mxu1 }
 0xc0e   :  { %v5495_v11 = vadd.f32 %v6069_v39, %v5484_v19  ;;  %v5479_v35 = vadd.f32 %v5478_v38, %v5357_v7 }
 0xc0f   :  { %v6647_v31 = vpop.f32.mrf.mxu1 }
 0xc10   :  { %v5717_v49 = vcombine.high %v5495_v11, %v5495_v11  ;;  %v5724_v61 = vrot.slane %v5495_v11, %v8311_v32  ;;  %v5494_v13 = vadd.f32 %v6069_v39, %v5479_v35  ;;  %v5648_v22 = vadd.f32 %v6654_v4, %v6647_v31 }
 0xc11   :  { %v5567_v17 = vpop.f32.mrf.mxu1 }
 0xc12   :  { %v5731_v55 = vrot.slane %v5717_v49, %v8311_v32  ;;  %v5732_v53 = vcombine.high %v5724_v61, %v5724_v61  ;;  %5747 = vst.msk [vmem:[#allocation10 + $0x8] sm:$0x3] %vm5742_vm8, %v5724_v61  ;;  %v5700_v45 = vcombine.high %v5494_v13, %v5494_v13  ;;  %v5707_v40 = vrot.slane %v5494_v13, %v8311_v32 }
 0xc13   :  { %v8412_v1 = vadd.f32 %v6076_v15, %v5648_v22  ;;  %v5643_v42 = vadd.f32 %v5642_v46, %v5567_v17 }
 0xc14   :  { %v5733_v34 = vcombine.high %v5731_v55, %v5731_v55  ;;  %5748 = vst.msk [vmem:[#allocation10 + $0xa] sm:$0x3] %vm5742_vm8, %v5732_v53  ;;  %5749 = vst.msk [vmem:[#allocation10 + $0xc] sm:$0x3] %vm5742_vm8, %v5731_v55  ;;  %v5714_v47 = vrot.slane %v5700_v45, %v8311_v32  ;;  %v5715_v50 = vcombine.high %v5707_v40, %v5707_v40 }
 0xc15   :  { %5743 = vst.msk [vmem:[#allocation10] sm:$0x3] %vm5742_vm8, %v5707_v40  ;;  %v5667_v8 = vand.u32 2147483647, %v8412_v1  ;;  %v8422_v2 = vadd.f32 %v6076_v15, %v5643_v42  ;;  %vm5663_vm2 = vcmp.ne.f32.partialorder %v8412_v1, %v8412_v1 }
 0xc16   :  { %5750 = vst.msk [vmem:[#allocation10 + $0xe] sm:$0x3] %vm5742_vm8, %v5733_v34  ;;  %v5716_v51 = vcombine.high %v5714_v47, %v5714_v47  ;;  %5744 = vst.msk [vmem:[#allocation10 + $0x2] sm:$0x3] %vm5742_vm8, %v5715_v50 }
 0xc17   :  { %5745 = vst.msk [vmem:[#allocation10 + $0x4] sm:$0x3] %vm5742_vm8, %v5714_v47  ;;  %v5669_v10 = vsub.f32 0.0, %v5667_v8  ;;  %v5666_v56 = vand.u32 2147483647, %v8422_v2  ;;  %v5661_v8 = vmax.f32 %v8412_v1, 0.0  ;;  %vm5662_vm4 = vcmp.ne.f32.partialorder %v8422_v2, %v8422_v2 }
 0xc18   :  { %5746 = vst.msk [vmem:[#allocation10 + $0x6] sm:$0x3] %vm5742_vm8, %v5716_v51 }
 0xc19   :  { %v5672_v25 = vmul.f32 1.442695, %v5669_v10  ;;  %v5807_v41 = vld [vmem:[#allocation10 + $0x8] sm:$0x1]  ;;  %v5879_v5 = vld [vmem:[#allocation10 + $0x9] sm:$0x1] }
 0xc1a   :  { %v5668_v16 = vsub.f32 0.0, %v5666_v56  ;;  %v5828_v20 = vrot.slane %v5807_v41, 4  ;;  %v5897_v36 = vrot.slane %v5879_v5, 4 }
 0xc1b   :  { %6835 = vpow2.f32 %v5672_v25  ;;  %v5808_v21 = vld [vmem:[#allocation10 + $0xa] sm:$0x1]  ;;  %v5809_v24 = vld [vmem:[#allocation10 + $0xc] sm:$0x1]  ;;  %v5880_v60 = vld [vmem:[#allocation10 + $0xb] sm:$0x1] }
 0xc1c   :  { %v5803_v57 = vld [vmem:[#allocation10] sm:$0x1]  ;;  %v5875_v18 = vld [vmem:[#allocation10 + $0x1] sm:$0x1]  ;;  %v5670_v43 = vmul.f32 1.442695, %v5668_v16 }
 0xc1d   :  { %v5804_v12 = vld [vmem:[#allocation10 + $0x2] sm:$0x1]  ;;  %v5810_v29 = vld [vmem:[#allocation10 + $0xe] sm:$0x1]  ;;  %v5876_v44 = vld [vmem:[#allocation10 + $0x3] sm:$0x1] }
 0xc1e   :  { %v5805_v26 = vld [vmem:[#allocation10 + $0x4] sm:$0x1]  ;;  %v5819_v6 = vrot.slane %v5804_v12, 7  ;;  %v5877_v30 = vld [vmem:[#allocation10 + $0x5] sm:$0x1]  ;;  %v5891_v58 = vrot.slane %v5876_v44, 7  ;;  %6837 = vpow2.f32 %v5670_v43 }
 0xc1f   :  { %v5806_v63 = vld [vmem:[#allocation10 + $0x6] sm:$0x1]  ;;  %v5822_v48 = vrot.slane %v5805_v26, 6  ;;  %v5878_v54 = vld [vmem:[#allocation10 + $0x7] sm:$0x1]  ;;  %v5893_v59 = vrot.slane %v5877_v30, 6 }
 0xc20   :  { %v5825_v27 = vrot.slane %v5806_v63, 5  ;;  %v5821_v52 = vsel %vm5820_vm9, %v5819_v6, %v5803_v57  ;;  %v5895_v33 = vrot.slane %v5878_v54, 5  ;;  %v5831_v23 = vrot.slane %v5808_v21, 3  ;;  %v5881_v62 = vld [vmem:[#allocation10 + $0xd] sm:$0x1] }
 0xc21   :  { %v5824_v3 = vsel %vm5823_vm10, %v5822_v48, %v5821_v52  ;;  %v5892_v0 = vsel %vm5820_vm9, %v5891_v58, %v5875_v18  ;;  %v5834_v9 = vrot.slane %v5809_v24, 2  ;;  %v5882_v14 = vld [vmem:[#allocation10 + $0xf] sm:$0x1]  ;;  %v5837_v39 = vrot.slane %v5810_v29, 1 }
 0xc22   :  { %v5827_v37 = vsel %vm5826_vm11, %v5825_v27, %v5824_v3  ;;  %v5894_v28 = vsel %vm5823_vm10, %v5893_v59, %v5892_v0  ;;  %v5899_v19 = vrot.slane %v5880_v60, 3  ;;  %v5901_v11 = vrot.slane %v5881_v62, 2 }
 0xc23   :  { %v5830_v38 = vsel %vm5829_vm12, %v5828_v20, %v5827_v37  ;;  %v5896_v4 = vsel %vm5826_vm11, %v5895_v33, %v5894_v28  ;;  %v5903_v49 = vrot.slane %v5882_v14, 1  ;;  %v5660_v60 = vmax.f32 %v8422_v2, 0.0 }
 0xc24   :  { %v5833_v7 = vsel %vm5832_vm13, %v5831_v23, %v5830_v38  ;;  %v5898_v31 = vsel %vm5829_vm12, %v5897_v36, %v5896_v4 }
 0xc25   :  { %v5836_v35 = vsel %vm5835_vm14, %v5834_v9, %v5833_v7  ;;  %v5900_v13 = vsel %vm5832_vm13, %v5899_v19, %v5898_v31 }
 0xc26   :  { %v5839_v61 = vsel %vm5838_vm15, %v5837_v39, %v5836_v35  ;;  %v5902_v15 = vsel %vm5835_vm14, %v5901_v11, %v5900_v13 }
 0xc27   :  { %5842 = vst.msk [vmem:[%s8509_s19] sm:$0xff] %vm5841_vm0, %v5839_v61  ;;  %v5904_v17 = vsel %vm5838_vm15, %v5903_v49, %v5902_v15 }
 0xc28   :  { %v6836_v22 = vpop.eup %6835  ;;  %6077 = vst.msk [vmem:[%s8509_s19 + $0x8] sm:$0xff] %vm5841_vm0, %v5904_v17 }
 0xc29   :  { %v5683_v46 = vadd.f32 1.0, %v6836_v22  ;;  %v5686_v53 = vmul.f32 -0.5, %v6836_v22  ;;  %v5689_v42 = vand.u32 2147483647, %v6836_v22 }
 0xc2b   :  { %6839 = vlog2.f32 %v5683_v46  ;;  %v6838_v55 = vpop.eup %6837  ;;  %v5687_v40 = vadd.f32 1.0, %v5686_v53  ;;  %vm5690_vm1 = vcmp.lt.f32.partialorder %v5689_v42, 0.0004427343 }
 0xc2c   :  { %v5674_v45 = vadd.f32 1.0, %v6838_v55  ;;  %v5677_v51 = vmul.f32 -0.5, %v6838_v55  ;;  %v5680_v5 = vand.u32 2147483647, %v6838_v55 }
 0xc2d   :  { %v5688_v50 = vmul.f32 %v6836_v22, %v5687_v40 }
 0xc2e   :  { %6841 = vlog2.f32 %v5674_v45  ;;  %v5678_v41 = vadd.f32 1.0, %v5677_v51  ;;  %vm5681_vm3 = vcmp.lt.f32.partialorder %v5680_v5, 0.0004427343 }
 0xc30   :  { %v5679_v63 = vmul.f32 %v6838_v55, %v5678_v41 }
 0xc38   :  { %v6840_v34 = vpop.eup %6839 }
 0xc39   :  { %v5685_v47 = vmul.f32 0.6931472, %v6840_v34 }
 0xc3b   :  { %v5691_v10 = vsel %vm5690_vm1, %v5688_v50, %v5685_v47  ;;  %v6842_v12 = vpop.eup %6841 }
 0xc3c   :  { %v5693_v25 = vadd.f32 %v5691_v10, %v5661_v8  ;;  %v5676_v26 = vmul.f32 0.6931472, %v6842_v12 }
 0xc3e   :  { %v5695_v56 = vsel %vm5663_vm2, %v8412_v1, %v5693_v25  ;;  %v5682_v57 = vsel %vm5681_vm3, %v5679_v63, %v5676_v26 }
 0xc3f   :  { %v5697_v21 = vadd.f32 1e-06, %v5695_v56  ;;  %v5692_v1 = vadd.f32 %v5682_v57, %v5660_v60 }
 0xc41   :  { %v5770_v16 = vcombine.high %v5697_v21, %v5697_v21  ;;  %v5777_v24 = vrot.slane %v5697_v21, %v8311_v32  ;;  %v5694_v27 = vsel %vm5662_vm4, %v8422_v2, %v5692_v1 }
 0xc42   :  { %v5696_v44 = vadd.f32 1e-06, %v5694_v27 }
 0xc43   :  { %v5784_v6 = vrot.slane %v5770_v16, %v8311_v32  ;;  %v5785_v29 = vcombine.high %v5777_v24, %v5777_v24  ;;  %5799 = vst.msk [vmem:[#allocation11 + $0x8] sm:$0x3] %vm5742_vm8, %v5777_v24 }
 0xc44   :  { %v5753_v20 = vcombine.high %v5696_v44, %v5696_v44  ;;  %v5760_v52 = vrot.slane %v5696_v44, %v8311_v32 }
 0xc45   :  { %v5786_v48 = vcombine.high %v5784_v6, %v5784_v6  ;;  %5800 = vst.msk [vmem:[#allocation11 + $0xa] sm:$0x3] %vm5742_vm8, %v5785_v29  ;;  %5801 = vst.msk [vmem:[#allocation11 + $0xc] sm:$0x3] %vm5742_vm8, %v5784_v6 }
 0xc46   :  { %v5767_v30 = vrot.slane %v5753_v20, %v8311_v32  ;;  %v5768_v54 = vcombine.high %v5760_v52, %v5760_v52  ;;  %5795 = vst.msk [vmem:[#allocation11] sm:$0x3] %vm5742_vm8, %v5760_v52 }
 0xc47   :  { %5802 = vst.msk [vmem:[#allocation11 + $0xe] sm:$0x3] %vm5742_vm8, %v5786_v48 }
 0xc48   :  { %v5769_v58 = vcombine.high %v5767_v30, %v5767_v30  ;;  %5796 = vst.msk [vmem:[#allocation11 + $0x2] sm:$0x3] %vm5742_vm8, %v5768_v54  ;;  %5797 = vst.msk [vmem:[#allocation11 + $0x4] sm:$0x3] %vm5742_vm8, %v5767_v30 }
 0xc4a   :  { %5798 = vst.msk [vmem:[#allocation11 + $0x6] sm:$0x3] %vm5742_vm8, %v5769_v58  ;;  %v5847_v3 = vld [vmem:[#allocation11 + $0x8] sm:$0x1]  ;;  %v5912_v18 = vld [vmem:[#allocation11 + $0x9] sm:$0x1] }
 0xc4b   :  { %v5865_v49 = vrot.slane %v5847_v3, 4  ;;  %v5930_v13 = vrot.slane %v5912_v18, 4 }
 0xc4c   :  { %v5848_v59 = vld [vmem:[#allocation11 + $0xa] sm:$0x1]  ;;  %v5913_v2 = vld [vmem:[#allocation11 + $0xb] sm:$0x1]  ;;  %v5849_v39 = vld [vmem:[#allocation11 + $0xc] sm:$0x1] }
 0xc4d   :  { %v5843_v33 = vld [vmem:[#allocation11] sm:$0x1]  ;;  %v5908_v62 = vld [vmem:[#allocation11 + $0x1] sm:$0x1]  ;;  %v5914_v19 = vld [vmem:[#allocation11 + $0xd] sm:$0x1] }
 0xc4e   :  { %v5850_v31 = vld [vmem:[#allocation11 + $0xe] sm:$0x1]  ;;  %v5915_v61 = vld [vmem:[#allocation11 + $0xf] sm:$0x1]  ;;  %v5867_v17 = vrot.slane %v5848_v59, 3  ;;  %v5932_v46 = vrot.slane %v5913_v2, 3 }
 0xc4f   :  { %v5844_v43 = vld [vmem:[#allocation11 + $0x2] sm:$0x1]  ;;  %v5845_v23 = vld [vmem:[#allocation11 + $0x4] sm:$0x1]  ;;  %v5909_v36 = vld [vmem:[#allocation11 + $0x3] sm:$0x1] }
 0xc50   :  { %v5859_v32 = vrot.slane %v5844_v43, 7  ;;  %v5861_v37 = vrot.slane %v5845_v23, 6  ;;  %v5910_v0 = vld [vmem:[#allocation11 + $0x5] sm:$0x1]  ;;  %v5924_v9 = vrot.slane %v5909_v36, 7  ;;  %v5869_v45 = vrot.slane %v5849_v39, 2 }
 0xc51   :  { %v5846_v14 = vld [vmem:[#allocation11 + $0x6] sm:$0x1]  ;;  %v5911_v38 = vld [vmem:[#allocation11 + $0x7] sm:$0x1]  ;;  %v5926_v28 = vrot.slane %v5910_v0, 6  ;;  %v5934_v40 = vrot.slane %v5914_v19, 2 }
 0xc52   :  { %v5860_v7 = vsel %vm5820_vm9, %v5859_v32, %v5843_v33  ;;  %v5863_v4 = vrot.slane %v5846_v14, 5  ;;  %v5925_v11 = vsel %vm5820_vm9, %v5924_v9, %v5908_v62  ;;  %v5928_v35 = vrot.slane %v5911_v38, 5 }
 0xc53   :  { %v5862_v22 = vsel %vm5823_vm10, %v5861_v37, %v5860_v7  ;;  %v5927_v15 = vsel %vm5823_vm10, %v5926_v28, %v5925_v11  ;;  %v5871_v47 = vrot.slane %v5850_v31, 1  ;;  %v5936_v50 = vrot.slane %v5915_v61, 1 }
 0xc54   :  { %v5864_v55 = vsel %vm5826_vm11, %v5863_v4, %v5862_v22  ;;  %v5929_v53 = vsel %vm5826_vm11, %v5928_v35, %v5927_v15 }
 0xc55   :  { %v5866_v42 = vsel %vm5829_vm12, %v5865_v49, %v5864_v55  ;;  %v5931_v34 = vsel %vm5829_vm12, %v5930_v13, %v5929_v53 }
 0xc56   :  { %v5868_v8 = vsel %vm5832_vm13, %v5867_v17, %v5866_v42  ;;  %v5933_v51 = vsel %vm5832_vm13, %v5932_v46, %v5931_v34 }
 0xc57   :  { %v5870_v10 = vsel %vm5835_vm14, %v5869_v45, %v5868_v8  ;;  %v5935_v25 = vsel %vm5835_vm14, %v5934_v40, %v5933_v51 }
 0xc58   :  { %v5872_v56 = vsel %vm5838_vm15, %v5871_v47, %v5870_v10  ;;  %v5937_v41 = vsel %vm5838_vm15, %v5936_v50, %v5935_v25 }
 0xc59   :  { %5874 = vst.msk [vmem:[%s8510_s20] sm:$0xff] %vm5841_vm0, %v5872_v56  ;;  %6078 = vst.msk [vmem:[%s8510_s20 + $0x8] sm:$0xff] %vm5841_vm0, %v5937_v41 }
 0xc5a   :  { %5949 = vsyncpa [#allocation13], 1 }
 0xc5b   :  { %5950 = vsyncpa [#allocation15], 1 }
 0xc5c   :  { %5951 = vsyncpa [#allocation18], 1 }
 0xc5d   :  { %5952 = vsyncpa [#allocation21], 1 }
 0xc5e   :  { %5953 = vsyncpa [#allocation24], 1 }
 0xc5f   :  { %5954 = vsyncpa [#allocation27], 1 }

</bundles_post_ra>
